<compile_context>
chip_gen: v6e
topology: v6e:2x2x1
jax: 0.10.0
libtpu: 0.0.40
codegen_flags: <defaults>
</compile_context>

<pallas_src>
import functools

import numpy as np
import jax
import jax.numpy as jnp
from jax.experimental import pallas as pl
from jax.experimental.pallas import tpu as pltpu


# Per-kernel double-buffered block budget (safe on v5e/v6e/v7x; v7x has 64 MiB
# physical VMEM / 32 MiB default scoped).
_VMEM_BLOCK_BUDGET = 12 * 1024 * 1024
_VMEM_LIMIT_BYTES = 32 * 1024 * 1024


def _sublane_fold(hw):
    """Fold the flattened H*W axis into (sublanes, lanes) so vregs are full."""
    return (8, hw // 8) if hw % 8 == 0 else (1, hw)


def _pick_lane_tile(L, per_lane_bytes, budget_bytes=_VMEM_BLOCK_BUDGET):
    """Largest lane tile (a multiple of 128 dividing L, or L itself) whose
    double-buffered block footprint stays under the VMEM budget."""
    if L * per_lane_bytes <= budget_bytes or L <= 128:
        return L                      # single step: no per-step pipeline overhead
    best = None
    t = 128
    while t <= L:
        if L % t == 0:
            if t * per_lane_bytes <= budget_bytes:
                best = t
            elif best is not None:
                break
        t += 128
    # No 128-multiple divisor fits the budget -> fall back to the full extent
    # (always correct; budget is only a pipelining heuristic).
    return best if best is not None else L


def _global_max_2d(x3):
    """Max over a (N, S, tl) block, returned as a (1, 1) array (no rank-0)."""
    m = jnp.max(x3, axis=0)                    # (S, tl): elementwise over slabs (VPU)
    m = jnp.max(m, axis=1, keepdims=True)      # (S, 1):  lane reduce (XLU)
    return jnp.max(m, axis=0, keepdims=True)   # (1, 1):  sublane reduce


# ----------------------------------------------------------------------------
# Pallas kernel 1: fused (in-kernel) normalize + concat + 1x1 conv -> flow
# ----------------------------------------------------------------------------
def _flow_kernel(wb_ref, pred_ref, gt_ref, o_ref, *, batch, cin, cout,
                 fuse_max, eps):
    # wb_ref (SMEM): (cout, 2*cin+1) = [w_pred | w_gt | bias]; when fuse_max is
    # False the 1/max factors are already folded into the weights in glue.
    # pred_ref/gt_ref: (batch*cin, S, tl) VMEM blocks; o_ref: (batch*cout, S, tl).
    if fuse_max:
        # Single-block mode: the block IS the whole tensor, so the global maxes
        # are computed here (one extra pass over VMEM, zero extra HBM traffic).
        inv_p = 1.0 / (_global_max_2d(pred_ref[...]) + eps)   # (1, 1)
        inv_g = 1.0 / (_global_max_2d(gt_ref[...]) + eps)     # (1, 1)
    for b in range(batch):
        for co in range(cout):
            acc_p = wb_ref[co, 0] * pred_ref[b * cin + 0]
            for k in range(1, cin):
                acc_p = acc_p + wb_ref[co, k] * pred_ref[b * cin + k]
            acc_g = wb_ref[co, cin] * gt_ref[b * cin + 0]
            for k in range(1, cin):
                acc_g = acc_g + wb_ref[co, cin + k] * gt_ref[b * cin + k]
            if fuse_max:
                o_ref[b * cout + co] = (acc_p * inv_p + acc_g * inv_g
                                        + wb_ref[co, 2 * cin])
            else:
                o_ref[b * cout + co] = acc_p + acc_g + wb_ref[co, 2 * cin]


def alignment_net(pred, gt, w_t, bias):
    """Synthetic alignment net: 1x1 conv (6 -> 2) over concat(pred/max, gt/max).

    The concat never materializes in HBM; the /max normalization is applied
    in-kernel (single-block mode) or folded into the weights (tiled fallback)."""
    B, C, H, W = pred.shape
    HW = H * W
    cout = 2
    eps_n = 1e-6
    S, L = _sublane_fold(HW)
    pred3d = pred.reshape(B * C, S, L)
    gt3d = gt.reshape(B * C, S, L)

    per_lane = 2 * (2 * B * C * S + B * cout * S) * 4     # double-buffered in+out
    tl = _pick_lane_tile(L, per_lane)
    n_tiles = L // tl
    fuse_max = (n_tiles == 1)

    if fuse_max:
        wb = jnp.concatenate([w_t, bias], axis=1).astype(jnp.float32)   # (2, 7)
    else:
        # TODO(synk): multi-tile fallback still pays two XLA full-tensor maxes;
        # a tiny Pallas dual-max pre-pass would read pred/gt only once.
        inv_p = 1.0 / (jnp.max(pred) + eps_n)
        inv_g = 1.0 / (jnp.max(gt) + eps_n)
        wb = jnp.concatenate([w_t[:, :C] * inv_p, w_t[:, C:] * inv_g, bias],
                             axis=1).astype(jnp.float32)

    kern = functools.partial(_flow_kernel, batch=B, cin=C, cout=cout,
                             fuse_max=fuse_max, eps=eps_n)
    flow3d = pl.pallas_call(
        kern,
        out_shape=jax.ShapeDtypeStruct((B * cout, S, L), jnp.float32),
        grid=(n_tiles,),
        in_specs=[
            pl.BlockSpec(memory_space=pltpu.MemorySpace.SMEM),       # weights+bias
            pl.BlockSpec((B * C, S, tl), lambda t: (0, 0, t)),
            pl.BlockSpec((B * C, S, tl), lambda t: (0, 0, t)),
        ],
        out_specs=pl.BlockSpec((B * cout, S, tl), lambda t: (0, 0, t)),
        compiler_params=pltpu.CompilerParams(
            dimension_semantics=("parallel",),        # tiles are independent
            vmem_limit_bytes=_VMEM_LIMIT_BYTES),
    )(wb, pred3d, gt3d)
    return flow3d.reshape(B, cout, H, W)


# ----------------------------------------------------------------------------
# Pallas kernel 2: fused 3x3 color transform + masked MSE reduction
# ----------------------------------------------------------------------------
def _color_mse_kernel(ct_ref, pred_ref, gt_ref, v_ref, num_ref, den_ref,
                      num_acc, den_acc, *, batch, cin):
    # ct_ref (SMEM): (batch, cin*cin) color matrices (row-major [c, d]).
    # pred_ref/gt_ref: (batch*cin, S, tl) blocks; v_ref: (batch, S, tl) mask.
    # num_acc/den_acc: (S, tl) VMEM accumulators; num_ref/den_ref: (1, 1).
    t = pl.program_id(0)

    @pl.when(t == 0)
    def _():
        num_acc[...] = jnp.zeros_like(num_acc)
        den_acc[...] = jnp.zeros_like(den_acc)

    num = None
    den = None
    for b in range(batch):                       # static, tiny batch
        v = v_ref[b]                             # (S, tl)
        den = v if den is None else den + v
        for d in range(cin):
            # y[d] = sum_c c_mat[b, c, d] * pred[b, c]  (== (pred^T @ c_mat)^T)
            y = ct_ref[b, d] * pred_ref[b * cin + 0]
            for c in range(1, cin):
                y = y + ct_ref[b, c * cin + d] * pred_ref[b * cin + c]
            dif = y - gt_ref[b * cin + d]
            e = dif * dif * v
            num = e if num is None else num + e
    num_acc[...] += num                          # pure-VPU elementwise per step
    den_acc[...] += den

    @pl.when(t == pl.num_programs(0) - 1)
    def _():                                     # one cross-lane reduce, at the end
        ns = jnp.sum(num_acc[...], axis=1, keepdims=True)   # (S, 1)
        num_ref[...] = jnp.sum(ns, axis=0, keepdims=True)   # (1, 1)
        ds = jnp.sum(den_acc[...], axis=1, keepdims=True)
        den_ref[...] = jnp.sum(ds, axis=0, keepdims=True)


def color_transform_masked_mse(pred_warped, c_mat, gt, valid):
    """Fused per-batch 3x3 color transform + masked MSE, streamed over HW."""
    B, C, H, W = pred_warped.shape
    HW = H * W
    S, L = _sublane_fold(HW)
    pred3d = pred_warped.reshape(B * C, S, L)
    gt3d = gt.reshape(B * C, S, L)
    valid3d = valid.astype(jnp.float32).reshape(B, S, L)
    ct = c_mat.reshape(B, C * C).astype(jnp.float32)

    per_lane = 2 * (2 * B * C * S + B * S) * 4 + 2 * S * 4
    tl = _pick_lane_tile(L, per_lane)
    n_tiles = L // tl

    kern = functools.partial(_color_mse_kernel, batch=B, cin=C)
    num, den = pl.pallas_call(
        kern,
        out_shape=(jax.ShapeDtypeStruct((1, 1), jnp.float32),
                   jax.ShapeDtypeStruct((1, 1), jnp.float32)),
        grid=(n_tiles,),
        in_specs=[
            pl.BlockSpec(memory_space=pltpu.MemorySpace.SMEM),   # c_mat scalars
            pl.BlockSpec((B * C, S, tl), lambda t: (0, 0, t)),
            pl.BlockSpec((B * C, S, tl), lambda t: (0, 0, t)),
            pl.BlockSpec((B, S, tl), lambda t: (0, 0, t)),
        ],
        out_specs=(pl.BlockSpec((1, 1), lambda t: (0, 0)),
                   pl.BlockSpec((1, 1), lambda t: (0, 0))),
        scratch_shapes=[pltpu.VMEM((S, tl), jnp.float32),
                        pltpu.VMEM((S, tl), jnp.float32)],
        compiler_params=pltpu.CompilerParams(
            # Accumulator scratch carried across tiles -> the grid axis MUST stay
            # sequential; do not mark "parallel" / shard across TCs.
            dimension_semantics=("arbitrary",),
            vmem_limit_bytes=_VMEM_LIMIT_BYTES),
    )(ct, pred3d, gt3d, valid3d)
    return num[0, 0], den[0, 0]


# ----------------------------------------------------------------------------
# Plain-JAX glue (gathers, tiny linear algebra, tiny 12x12 blur, params)
# ----------------------------------------------------------------------------
def get_gaussian_kernel(sd=1.5):
    """sca_utils.get_gaussian_kernel: normalized Gaussian, ksz = 4*sd + 1.
    Returns the normalized 1-D taps (the 2-D kernel == outer(taps, taps))."""
    ksz = int(4 * sd + 1)
    assert ksz % 2 == 1
    k = np.arange(ksz, dtype=np.float64) - (ksz - 1) / 2.0
    g1 = np.exp(-(k ** 2) / (2.0 * sd ** 2))
    g1 = g1 / g1.sum()
    return g1.astype(np.float32), ksz


def gauss_blur_pair(im_a, im_b, taps_np, ksz):
    """Depthwise separable Gaussian blur (reflect padding) of two NCHW tensors.
    The maps here are 12x12 (~7 KiB total output), so a Pallas kernel is pure
    dispatch overhead with 12-lane masked stores; plain XLA fuses this fine."""
    # TODO(synk): lane-dense Pallas blur (flatten H*W onto lanes + pltpu.roll)
    # only pays off if these maps grow to >=128 lanes.
    taps = [float(t) for t in taps_np]
    p = ksz // 2

    def blur(x):
        _, _, H, W = x.shape
        xp = jnp.pad(x, ((0, 0), (0, 0), (p, p), (p, p)), mode="reflect")
        h = taps[0] * xp[:, :, :, 0:W]
        for j in range(1, ksz):
            h = h + taps[j] * xp[:, :, :, j:j + W]
        out = taps[0] * h[:, :, 0:H, :]
        for i in range(1, ksz):
            out = out + taps[i] * h[:, :, i:i + H, :]
        return out

    return blur(im_a), blur(im_b)


def _interp_coords(in_size, out_size, align_corners, scale_factor=None):
    dst = jnp.arange(out_size, dtype=jnp.float32)
    if align_corners:
        src = dst * (in_size - 1) / max(out_size - 1, 1)
    else:
        s = (1.0 / scale_factor) if scale_factor is not None else (in_size / out_size)
        src = s * (dst + 0.5) - 0.5
        src = jnp.maximum(src, 0.0)
    i0 = jnp.clip(jnp.floor(src).astype(jnp.int32), 0, in_size - 1)
    i1 = jnp.minimum(i0 + 1, in_size - 1)
    w1 = src - i0.astype(jnp.float32)
    w0 = 1.0 - w1
    return i0, i1, w0, w1


def bilinear_resize(x, out_h, out_w, align_corners, scale_factor=None):
    """F.interpolate(mode='bilinear') on NCHW input."""
    # TODO(synk): gather-based resize kept in plain JAX (no clean Pallas gather).
    i0, i1, wy0, wy1 = _interp_coords(x.shape[2], out_h, align_corners, scale_factor)
    j0, j1, wx0, wx1 = _interp_coords(x.shape[3], out_w, align_corners, scale_factor)
    r0 = jnp.take(x, i0, axis=2)
    r1 = jnp.take(x, i1, axis=2)
    xr = r0 * wy0[None, None, :, None] + r1 * wy1[None, None, :, None]
    c0 = jnp.take(xr, j0, axis=3)
    c1 = jnp.take(xr, j1, axis=3)
    return c0 * wx0[None, None, None, :] + c1 * wx1[None, None, None, :]


def warp(feat, flow):
    """DBSR utils.warp: grid_sample(bilinear, zeros, align_corners=False).
    DBSR builds the grid from pixel centers (j+0.5, i+0.5)+flow and normalizes
    by 2g/W-1; grid_sample(align_corners=False) maps back via ((gn+1)*W-1)/2 =
    g-0.5, so the half-pixel offsets cancel and sampling at raw pixel coords
    (j+flow_x, i+flow_y) with zero padding is exact."""
    # TODO(synk): data-dependent bilinear gather kept in plain JAX.
    B, C, H, W = feat.shape
    jj = jnp.arange(W, dtype=jnp.float32)[None, None, :]
    ii = jnp.arange(H, dtype=jnp.float32)[None, :, None]
    x = jj + flow[:, 0]
    y = ii + flow[:, 1]
    x0 = jnp.floor(x)
    y0 = jnp.floor(y)
    x1 = x0 + 1.0
    y1 = y0 + 1.0
    wx1 = x - x0
    wx0 = 1.0 - wx1
    wy1 = y - y0
    wy0 = 1.0 - wy1
    feat_flat = feat.reshape(B, C, H * W)

    def gather(yy, xx):
        yi = yy.astype(jnp.int32)
        xi = xx.astype(jnp.int32)
        inb = ((yi >= 0) & (yi < H) & (xi >= 0) & (xi < W)).astype(feat.dtype)
        yc = jnp.clip(yi, 0, H - 1)
        xc = jnp.clip(xi, 0, W - 1)
        idx = (yc * W + xc).reshape(B, 1, H * W)
        vals = jnp.take_along_axis(feat_flat,
                                   jnp.broadcast_to(idx, (B, C, H * W)), axis=2)
        return vals.reshape(B, C, H, W) * inb[:, None]

    out = (gather(y0, x0) * (wy0 * wx0)[:, None]
           + gather(y0, x1) * (wy0 * wx1)[:, None]
           + gather(y1, x0) * (wy1 * wx0)[:, None]
           + gather(y1, x1) * (wy1 * wx1)[:, None])
    return out


def init_alignment_params(key):
    """Deterministic synthetic alignment net: 1x1 conv (6 -> 2), small weights."""
    w_t = 0.05 * jax.random.normal(key, (2, 6), dtype=jnp.float32)   # (Cout, Cin)
    bias = jnp.zeros((2, 1), dtype=jnp.float32)                      # (Cout, 1)
    return w_t, bias


def match_colors(im_ref, im_q, im_test, ksz, gauss_taps):
    """sca_utils.match_colors: returns (c_mat, valid); applying c_mat to im_test
    is deferred to the fused Pallas masked-MSE kernel."""
    bi = 5
    im_ref_mean, im_q_mean = gauss_blur_pair(im_ref, im_q, gauss_taps, ksz)
    im_ref_mean = im_ref_mean[:, :, bi:-bi, bi:-bi]
    im_q_mean = im_q_mean[:, :, bi:-bi, bi:-bi]

    B, C, hc, wc = im_ref_mean.shape
    im_ref_mean_re = im_ref_mean.reshape(B, C, -1)
    im_q_mean_re = im_q_mean.reshape(B, C, -1)

    # Batched least squares:  im_q^T @ c  ~=  im_ref^T   (3x3 per batch)
    # TODO(synk): tiny (P x 3) pinv kept in plain JAX.
    A = jnp.transpose(im_q_mean_re, (0, 2, 1))        # (B, P, 3)
    Bm = jnp.transpose(im_ref_mean_re, (0, 2, 1))     # (B, P, 3)
    c_mat = jnp.matmul(jnp.linalg.pinv(A), Bm)        # (B, 3, 3)

    im_q_mean_conv = jnp.einsum('bcd,bcp->bdp', c_mat, im_q_mean_re)
    err = jnp.linalg.norm((im_q_mean_conv - im_ref_mean_re) * 255.0, axis=1)
    valid = (err < 20.0).reshape(B, hc, wc)

    pad = (im_q.shape[-1] - valid.shape[-1]) // 2
    valid = jnp.pad(valid, ((0, 0), (pad, pad), (pad, pad)))

    upsample_factor = im_test.shape[-1] / valid.shape[-1]
    out_h = int(valid.shape[-2] * upsample_factor)
    out_w = int(valid.shape[-1] * upsample_factor)
    valid = bilinear_resize(valid[:, None].astype(jnp.float32), out_h, out_w,
                            align_corners=False, scale_factor=upsample_factor)
    valid = valid > 0.9                                # (B, 1, H, W) bool
    return c_mat, valid


def aligned_l2(pred, gt, burst_input, w_t, bias, gauss_taps, ksz, sr_factor=4):
    """Forward pass of AlignedL2 (boundary_ignore=None)."""
    flow = alignment_net(pred, gt, w_t, bias)          # Pallas kernel 1

    pred_warped = warp(pred, flow)

    ds_factor = 1.0 / float(2.0 * sr_factor)
    H, W = pred.shape[-2:]
    out_h, out_w = int(H * ds_factor), int(W * ds_factor)
    flow_ds = bilinear_resize(flow, out_h, out_w, align_corners=True) * ds_factor

    burst_0 = burst_input[:, 0][:, jnp.array([0, 1, 3])]
    burst_0_warped = warp(burst_0, flow_ds)
    frame_gt_ds = bilinear_resize(gt, out_h, out_w, align_corners=True)

    c_mat, valid = match_colors(frame_gt_ds, burst_0_warped, pred_warped,
                                ksz, gauss_taps)

    num, den = color_transform_masked_mse(pred_warped, c_mat, gt, valid)  # Pallas 2

    eps = 1e-12
    elem_ratio = float(pred.shape[1])    # mse.numel() / valid.numel() == C == 3
    mse = num / (den * elem_ratio + eps)
    return mse


if __name__ == "__main__":
    key = jax.random.PRNGKey(0)
    k1, k2, k3, k4 = jax.random.split(key, 4)

    B, H, W = 2, 96, 96
    sr_factor = 4
    burst_size = 4
    hb, wb = H // (2 * sr_factor), W // (2 * sr_factor)   # 12 x 12 raw burst frames

    pred = jax.random.uniform(k1, (B, 3, H, W), dtype=jnp.float32)
    gt = jax.random.uniform(k2, (B, 3, H, W), dtype=jnp.float32)
    burst_input = jax.random.uniform(k3, (B, burst_size, 4, hb, wb), dtype=jnp.float32)

    w_t, bias = init_alignment_params(k4)
    gauss_taps, ksz = get_gaussian_kernel(sd=1.5)

    fwd = jax.jit(functools.partial(aligned_l2, gauss_taps=gauss_taps, ksz=ksz,
                                    sr_factor=sr_factor))
    mse = fwd(pred, gt, burst_input, w_t, bias)
    jax.block_until_ready(mse)
    assert mse.shape == () and jnp.isfinite(mse)
    print("KERNEL_OK")
</pallas_src>

<mosaic_0001>
module attributes {stable_mosaic.version = 11 : i64} {
  func.func @_flow_kernel(%arg0: i32, %arg1: memref<2x7xf32, #tpu.memory_space<smem>>, %arg2: memref<6x8x1152xf32, #tpu.memory_space<vmem>>, %arg3: memref<6x8x1152xf32, #tpu.memory_space<vmem>>, %arg4: memref<4x8x1152xf32, #tpu.memory_space<vmem>>) attributes {dimension_semantics = [#tpu.dimension_semantics<parallel>], iteration_bounds = array<i64: 1>, scalar_prefetch = 0 : i64, scratch_operands = 0 : i64, tpu.core_type = #tpu.core_type<tc>, window_params = [{transform_indices = @transform_0, window_bounds = array<i64: 2, 7>}, {transform_indices = @transform_1, window_bounds = array<i64: 6, 8, 1152>}, {transform_indices = @transform_2, window_bounds = array<i64: 6, 8, 1152>}, {transform_indices = @transform_3, window_bounds = array<i64: 4, 8, 1152>}]} {
    %c0 = arith.constant 0 : index
    %c0_0 = arith.constant 0 : index
    %c0_1 = arith.constant 0 : index
    %0 = vector.load %arg2[%c0, %c0_0, %c0_1] : memref<6x8x1152xf32, #tpu.memory_space<vmem>>, vector<6x8x1152xf32>
    %cst = arith.constant dense<0xFF800000> : vector<8x1152xf32>
    %1 = vector.multi_reduction <maximumf>, %0, %cst [0] : vector<6x8x1152xf32> to vector<8x1152xf32>
    %cst_2 = arith.constant dense<0xFF800000> : vector<8xf32>
    %2 = vector.multi_reduction <maximumf>, %1, %cst_2 [1] : vector<8x1152xf32> to vector<8xf32>
    %3 = vector.shape_cast %2 : vector<8xf32> to vector<8x1xf32>
    %cst_3 = arith.constant dense<0xFF800000> : vector<1xf32>
    %4 = vector.multi_reduction <maximumf>, %3, %cst_3 [0] : vector<8x1xf32> to vector<1xf32>
    %5 = vector.shape_cast %4 : vector<1xf32> to vector<1x1xf32>
    %cst_4 = arith.constant 9.99999997E-7 : f32
    %6 = vector.broadcast %cst_4 : f32 to vector<1x1xf32>
    %7 = arith.addf %5, %6 : vector<1x1xf32>
    %cst_5 = arith.constant 1.000000e+00 : f32
    %8 = vector.broadcast %cst_5 : f32 to vector<1x1xf32>
    %9 = arith.divf %8, %7 : vector<1x1xf32>
    %c0_6 = arith.constant 0 : index
    %c0_7 = arith.constant 0 : index
    %c0_8 = arith.constant 0 : index
    %10 = vector.load %arg3[%c0_6, %c0_7, %c0_8] : memref<6x8x1152xf32, #tpu.memory_space<vmem>>, vector<6x8x1152xf32>
    %cst_9 = arith.constant dense<0xFF800000> : vector<8x1152xf32>
    %11 = vector.multi_reduction <maximumf>, %10, %cst_9 [0] : vector<6x8x1152xf32> to vector<8x1152xf32>
    %cst_10 = arith.constant dense<0xFF800000> : vector<8xf32>
    %12 = vector.multi_reduction <maximumf>, %11, %cst_10 [1] : vector<8x1152xf32> to vector<8xf32>
    %13 = vector.shape_cast %12 : vector<8xf32> to vector<8x1xf32>
    %cst_11 = arith.constant dense<0xFF800000> : vector<1xf32>
    %14 = vector.multi_reduction <maximumf>, %13, %cst_11 [0] : vector<8x1xf32> to vector<1xf32>
    %15 = vector.shape_cast %14 : vector<1xf32> to vector<1x1xf32>
    %cst_12 = arith.constant 9.99999997E-7 : f32
    %16 = vector.broadcast %cst_12 : f32 to vector<1x1xf32>
    %17 = arith.addf %15, %16 : vector<1x1xf32>
    %cst_13 = arith.constant 1.000000e+00 : f32
    %18 = vector.broadcast %cst_13 : f32 to vector<1x1xf32>
    %19 = arith.divf %18, %17 : vector<1x1xf32>
    %c0_14 = arith.constant 0 : index
    %c0_15 = arith.constant 0 : index
    %20 = memref.load %arg1[%c0_14, %c0_15] : memref<2x7xf32, #tpu.memory_space<smem>>
    %c0_16 = arith.constant 0 : index
    %c0_17 = arith.constant 0 : index
    %c0_18 = arith.constant 0 : index
    %21 = vector.load %arg2[%c0_16, %c0_17, %c0_18] : memref<6x8x1152xf32, #tpu.memory_space<vmem>>, vector<1x8x1152xf32>
    %22 = vector.shape_cast %21 : vector<1x8x1152xf32> to vector<8x1152xf32>
    %23 = vector.broadcast %20 : f32 to vector<8x1152xf32>
    %24 = arith.mulf %23, %22 : vector<8x1152xf32>
    %c0_19 = arith.constant 0 : index
    %c1 = arith.constant 1 : index
    %25 = memref.load %arg1[%c0_19, %c1] : memref<2x7xf32, #tpu.memory_space<smem>>
    %c1_20 = arith.constant 1 : index
    %c0_21 = arith.constant 0 : index
    %c0_22 = arith.constant 0 : index
    %26 = vector.load %arg2[%c1_20, %c0_21, %c0_22] : memref<6x8x1152xf32, #tpu.memory_space<vmem>>, vector<1x8x1152xf32>
    %27 = vector.shape_cast %26 : vector<1x8x1152xf32> to vector<8x1152xf32>
    %28 = vector.broadcast %25 : f32 to vector<8x1152xf32>
    %29 = arith.mulf %28, %27 : vector<8x1152xf32>
    %30 = arith.addf %24, %29 : vector<8x1152xf32>
    %c0_23 = arith.constant 0 : index
    %c2 = arith.constant 2 : index
    %31 = memref.load %arg1[%c0_23, %c2] : memref<2x7xf32, #tpu.memory_space<smem>>
    %c2_24 = arith.constant 2 : index
    %c0_25 = arith.constant 0 : index
    %c0_26 = arith.constant 0 : index
    %32 = vector.load %arg2[%c2_24, %c0_25, %c0_26] : memref<6x8x1152xf32, #tpu.memory_space<vmem>>, vector<1x8x1152xf32>
    %33 = vector.shape_cast %32 : vector<1x8x1152xf32> to vector<8x1152xf32>
    %34 = vector.broadcast %31 : f32 to vector<8x1152xf32>
    %35 = arith.mulf %34, %33 : vector<8x1152xf32>
    %36 = arith.addf %30, %35 : vector<8x1152xf32>
    %c0_27 = arith.constant 0 : index
    %c3 = arith.constant 3 : index
    %37 = memref.load %arg1[%c0_27, %c3] : memref<2x7xf32, #tpu.memory_space<smem>>
    %c0_28 = arith.constant 0 : index
    %c0_29 = arith.constant 0 : index
    %c0_30 = arith.constant 0 : index
    %38 = vector.load %arg3[%c0_28, %c0_29, %c0_30] : memref<6x8x1152xf32, #tpu.memory_space<vmem>>, vector<1x8x1152xf32>
    %39 = vector.shape_cast %38 : vector<1x8x1152xf32> to vector<8x1152xf32>
    %40 = vector.broadcast %37 : f32 to vector<8x1152xf32>
    %41 = arith.mulf %40, %39 : vector<8x1152xf32>
    %c0_31 = arith.constant 0 : index
    %c4 = arith.constant 4 : index
    %42 = memref.load %arg1[%c0_31, %c4] : memref<2x7xf32, #tpu.memory_space<smem>>
    %c1_32 = arith.constant 1 : index
    %c0_33 = arith.constant 0 : index
    %c0_34 = arith.constant 0 : index
    %43 = vector.load %arg3[%c1_32, %c0_33, %c0_34] : memref<6x8x1152xf32, #tpu.memory_space<vmem>>, vector<1x8x1152xf32>
    %44 = vector.shape_cast %43 : vector<1x8x1152xf32> to vector<8x1152xf32>
    %45 = vector.broadcast %42 : f32 to vector<8x1152xf32>
    %46 = arith.mulf %45, %44 : vector<8x1152xf32>
    %47 = arith.addf %41, %46 : vector<8x1152xf32>
    %c0_35 = arith.constant 0 : index
    %c5 = arith.constant 5 : index
    %48 = memref.load %arg1[%c0_35, %c5] : memref<2x7xf32, #tpu.memory_space<smem>>
    %c2_36 = arith.constant 2 : index
    %c0_37 = arith.constant 0 : index
    %c0_38 = arith.constant 0 : index
    %49 = vector.load %arg3[%c2_36, %c0_37, %c0_38] : memref<6x8x1152xf32, #tpu.memory_space<vmem>>, vector<1x8x1152xf32>
    %50 = vector.shape_cast %49 : vector<1x8x1152xf32> to vector<8x1152xf32>
    %51 = vector.broadcast %48 : f32 to vector<8x1152xf32>
    %52 = arith.mulf %51, %50 : vector<8x1152xf32>
    %53 = arith.addf %47, %52 : vector<8x1152xf32>
    %54 = vector.broadcast %9 : vector<1x1xf32> to vector<8x1152xf32>
    %55 = arith.mulf %36, %54 : vector<8x1152xf32>
    %56 = vector.broadcast %19 : vector<1x1xf32> to vector<8x1152xf32>
    %57 = arith.mulf %53, %56 : vector<8x1152xf32>
    %58 = arith.addf %55, %57 : vector<8x1152xf32>
    %c0_39 = arith.constant 0 : index
    %c6 = arith.constant 6 : index
    %59 = memref.load %arg1[%c0_39, %c6] : memref<2x7xf32, #tpu.memory_space<smem>>
    %60 = vector.broadcast %59 : f32 to vector<8x1152xf32>
    %61 = arith.addf %58, %60 : vector<8x1152xf32>
    %c0_40 = arith.constant 0 : index
    %c0_41 = arith.constant 0 : index
    %c0_42 = arith.constant 0 : index
    %62 = vector.load %arg4[%c0_40, %c0_41, %c0_42] : memref<4x8x1152xf32, #tpu.memory_space<vmem>>, vector<1x8x1152xf32>
    %63 = vector.shape_cast %62 : vector<1x8x1152xf32> to vector<8x1152xf32>
    %64 = vector.shape_cast %61 : vector<8x1152xf32> to vector<1x8x1152xf32>
    tpu.vector_store %arg4[%c0_40, %c0_41, %c0_42], %64 {strides = array<i32>} : memref<4x8x1152xf32, #tpu.memory_space<vmem>>, vector<1x8x1152xf32>,
    %c1_43 = arith.constant 1 : index
    %c0_44 = arith.constant 0 : index
    %65 = memref.load %arg1[%c1_43, %c0_44] : memref<2x7xf32, #tpu.memory_space<smem>>
    %c0_45 = arith.constant 0 : index
    %c0_46 = arith.constant 0 : index
    %c0_47 = arith.constant 0 : index
    %66 = vector.load %arg2[%c0_45, %c0_46, %c0_47] : memref<6x8x1152xf32, #tpu.memory_space<vmem>>, vector<1x8x1152xf32>
    %67 = vector.shape_cast %66 : vector<1x8x1152xf32> to vector<8x1152xf32>
    %68 = vector.broadcast %65 : f32 to vector<8x1152xf32>
    %69 = arith.mulf %68, %67 : vector<8x1152xf32>
    %c1_48 = arith.constant 1 : index
    %c1_49 = arith.constant 1 : index
    %70 = memref.load %arg1[%c1_48, %c1_49] : memref<2x7xf32, #tpu.memory_space<smem>>
    %c1_50 = arith.constant 1 : index
    %c0_51 = arith.constant 0 : index
    %c0_52 = arith.constant 0 : index
    %71 = vector.load %arg2[%c1_50, %c0_51, %c0_52] : memref<6x8x1152xf32, #tpu.memory_space<vmem>>, vector<1x8x1152xf32>
    %72 = vector.shape_cast %71 : vector<1x8x1152xf32> to vector<8x1152xf32>
    %73 = vector.broadcast %70 : f32 to vector<8x1152xf32>
    %74 = arith.mulf %73, %72 : vector<8x1152xf32>
    %75 = arith.addf %69, %74 : vector<8x1152xf32>
    %c1_53 = arith.constant 1 : index
    %c2_54 = arith.constant 2 : index
    %76 = memref.load %arg1[%c1_53, %c2_54] : memref<2x7xf32, #tpu.memory_space<smem>>
    %c2_55 = arith.constant 2 : index
    %c0_56 = arith.constant 0 : index
    %c0_57 = arith.constant 0 : index
    %77 = vector.load %arg2[%c2_55, %c0_56, %c0_57] : memref<6x8x1152xf32, #tpu.memory_space<vmem>>, vector<1x8x1152xf32>
    %78 = vector.shape_cast %77 : vector<1x8x1152xf32> to vector<8x1152xf32>
    %79 = vector.broadcast %76 : f32 to vector<8x1152xf32>
    %80 = arith.mulf %79, %78 : vector<8x1152xf32>
    %81 = arith.addf %75, %80 : vector<8x1152xf32>
    %c1_58 = arith.constant 1 : index
    %c3_59 = arith.constant 3 : index
    %82 = memref.load %arg1[%c1_58, %c3_59] : memref<2x7xf32, #tpu.memory_space<smem>>
    %c0_60 = arith.constant 0 : index
    %c0_61 = arith.constant 0 : index
    %c0_62 = arith.constant 0 : index
    %83 = vector.load %arg3[%c0_60, %c0_61, %c0_62] : memref<6x8x1152xf32, #tpu.memory_space<vmem>>, vector<1x8x1152xf32>
    %84 = vector.shape_cast %83 : vector<1x8x1152xf32> to vector<8x1152xf32>
    %85 = vector.broadcast %82 : f32 to vector<8x1152xf32>
    %86 = arith.mulf %85, %84 : vector<8x1152xf32>
    %c1_63 = arith.constant 1 : index
    %c4_64 = arith.constant 4 : index
    %87 = memref.load %arg1[%c1_63, %c4_64] : memref<2x7xf32, #tpu.memory_space<smem>>
    %c1_65 = arith.constant 1 : index
    %c0_66 = arith.constant 0 : index
    %c0_67 = arith.constant 0 : index
    %88 = vector.load %arg3[%c1_65, %c0_66, %c0_67] : memref<6x8x1152xf32, #tpu.memory_space<vmem>>, vector<1x8x1152xf32>
    %89 = vector.shape_cast %88 : vector<1x8x1152xf32> to vector<8x1152xf32>
    %90 = vector.broadcast %87 : f32 to vector<8x1152xf32>
    %91 = arith.mulf %90, %89 : vector<8x1152xf32>
    %92 = arith.addf %86, %91 : vector<8x1152xf32>
    %c1_68 = arith.constant 1 : index
    %c5_69 = arith.constant 5 : index
    %93 = memref.load %arg1[%c1_68, %c5_69] : memref<2x7xf32, #tpu.memory_space<smem>>
    %c2_70 = arith.constant 2 : index
    %c0_71 = arith.constant 0 : index
    %c0_72 = arith.constant 0 : index
    %94 = vector.load %arg3[%c2_70, %c0_71, %c0_72] : memref<6x8x1152xf32, #tpu.memory_space<vmem>>, vector<1x8x1152xf32>
    %95 = vector.shape_cast %94 : vector<1x8x1152xf32> to vector<8x1152xf32>
    %96 = vector.broadcast %93 : f32 to vector<8x1152xf32>
    %97 = arith.mulf %96, %95 : vector<8x1152xf32>
    %98 = arith.addf %92, %97 : vector<8x1152xf32>
    %99 = vector.broadcast %9 : vector<1x1xf32> to vector<8x1152xf32>
    %100 = arith.mulf %81, %99 : vector<8x1152xf32>
    %101 = vector.broadcast %19 : vector<1x1xf32> to vector<8x1152xf32>
    %102 = arith.mulf %98, %101 : vector<8x1152xf32>
    %103 = arith.addf %100, %102 : vector<8x1152xf32>
    %c1_73 = arith.constant 1 : index
    %c6_74 = arith.constant 6 : index
    %104 = memref.load %arg1[%c1_73, %c6_74] : memref<2x7xf32, #tpu.memory_space<smem>>
    %105 = vector.broadcast %104 : f32 to vector<8x1152xf32>
    %106 = arith.addf %103, %105 : vector<8x1152xf32>
    %c1_75 = arith.constant 1 : index
    %c0_76 = arith.constant 0 : index
    %c0_77 = arith.constant 0 : index
    %107 = vector.load %arg4[%c1_75, %c0_76, %c0_77] : memref<4x8x1152xf32, #tpu.memory_space<vmem>>, vector<1x8x1152xf32>
    %108 = vector.shape_cast %107 : vector<1x8x1152xf32> to vector<8x1152xf32>
    %109 = vector.shape_cast %106 : vector<8x1152xf32> to vector<1x8x1152xf32>
    tpu.vector_store %arg4[%c1_75, %c0_76, %c0_77], %109 {strides = array<i32>} : memref<4x8x1152xf32, #tpu.memory_space<vmem>>, vector<1x8x1152xf32>,
    %c0_78 = arith.constant 0 : index
    %c0_79 = arith.constant 0 : index
    %110 = memref.load %arg1[%c0_78, %c0_79] : memref<2x7xf32, #tpu.memory_space<smem>>
    %c3_80 = arith.constant 3 : index
    %c0_81 = arith.constant 0 : index
    %c0_82 = arith.constant 0 : index
    %111 = vector.load %arg2[%c3_80, %c0_81, %c0_82] : memref<6x8x1152xf32, #tpu.memory_space<vmem>>, vector<1x8x1152xf32>
    %112 = vector.shape_cast %111 : vector<1x8x1152xf32> to vector<8x1152xf32>
    %113 = vector.broadcast %110 : f32 to vector<8x1152xf32>
    %114 = arith.mulf %113, %112 : vector<8x1152xf32>
    %c0_83 = arith.constant 0 : index
    %c1_84 = arith.constant 1 : index
    %115 = memref.load %arg1[%c0_83, %c1_84] : memref<2x7xf32, #tpu.memory_space<smem>>
    %c4_85 = arith.constant 4 : index
    %c0_86 = arith.constant 0 : index
    %c0_87 = arith.constant 0 : index
    %116 = vector.load %arg2[%c4_85, %c0_86, %c0_87] : memref<6x8x1152xf32, #tpu.memory_space<vmem>>, vector<1x8x1152xf32>
    %117 = vector.shape_cast %116 : vector<1x8x1152xf32> to vector<8x1152xf32>
    %118 = vector.broadcast %115 : f32 to vector<8x1152xf32>
    %119 = arith.mulf %118, %117 : vector<8x1152xf32>
    %120 = arith.addf %114, %119 : vector<8x1152xf32>
    %c0_88 = arith.constant 0 : index
    %c2_89 = arith.constant 2 : index
    %121 = memref.load %arg1[%c0_88, %c2_89] : memref<2x7xf32, #tpu.memory_space<smem>>
    %c5_90 = arith.constant 5 : index
    %c0_91 = arith.constant 0 : index
    %c0_92 = arith.constant 0 : index
    %122 = vector.load %arg2[%c5_90, %c0_91, %c0_92] : memref<6x8x1152xf32, #tpu.memory_space<vmem>>, vector<1x8x1152xf32>
    %123 = vector.shape_cast %122 : vector<1x8x1152xf32> to vector<8x1152xf32>
    %124 = vector.broadcast %121 : f32 to vector<8x1152xf32>
    %125 = arith.mulf %124, %123 : vector<8x1152xf32>
    %126 = arith.addf %120, %125 : vector<8x1152xf32>
    %c0_93 = arith.constant 0 : index
    %c3_94 = arith.constant 3 : index
    %127 = memref.load %arg1[%c0_93, %c3_94] : memref<2x7xf32, #tpu.memory_space<smem>>
    %c3_95 = arith.constant 3 : index
    %c0_96 = arith.constant 0 : index
    %c0_97 = arith.constant 0 : index
    %128 = vector.load %arg3[%c3_95, %c0_96, %c0_97] : memref<6x8x1152xf32, #tpu.memory_space<vmem>>, vector<1x8x1152xf32>
    %129 = vector.shape_cast %128 : vector<1x8x1152xf32> to vector<8x1152xf32>
    %130 = vector.broadcast %127 : f32 to vector<8x1152xf32>
    %131 = arith.mulf %130, %129 : vector<8x1152xf32>
    %c0_98 = arith.constant 0 : index
    %c4_99 = arith.constant 4 : index
    %132 = memref.load %arg1[%c0_98, %c4_99] : memref<2x7xf32, #tpu.memory_space<smem>>
    %c4_100 = arith.constant 4 : index
    %c0_101 = arith.constant 0 : index
    %c0_102 = arith.constant 0 : index
    %133 = vector.load %arg3[%c4_100, %c0_101, %c0_102] : memref<6x8x1152xf32, #tpu.memory_space<vmem>>, vector<1x8x1152xf32>
    %134 = vector.shape_cast %133 : vector<1x8x1152xf32> to vector<8x1152xf32>
    %135 = vector.broadcast %132 : f32 to vector<8x1152xf32>
    %136 = arith.mulf %135, %134 : vector<8x1152xf32>
    %137 = arith.addf %131, %136 : vector<8x1152xf32>
    %c0_103 = arith.constant 0 : index
    %c5_104 = arith.constant 5 : index
    %138 = memref.load %arg1[%c0_103, %c5_104] : memref<2x7xf32, #tpu.memory_space<smem>>
    %c5_105 = arith.constant 5 : index
    %c0_106 = arith.constant 0 : index
    %c0_107 = arith.constant 0 : index
    %139 = vector.load %arg3[%c5_105, %c0_106, %c0_107] : memref<6x8x1152xf32, #tpu.memory_space<vmem>>, vector<1x8x1152xf32>
    %140 = vector.shape_cast %139 : vector<1x8x1152xf32> to vector<8x1152xf32>
    %141 = vector.broadcast %138 : f32 to vector<8x1152xf32>
    %142 = arith.mulf %141, %140 : vector<8x1152xf32>
    %143 = arith.addf %137, %142 : vector<8x1152xf32>
    %144 = vector.broadcast %9 : vector<1x1xf32> to vector<8x1152xf32>
    %145 = arith.mulf %126, %144 : vector<8x1152xf32>
    %146 = vector.broadcast %19 : vector<1x1xf32> to vector<8x1152xf32>
    %147 = arith.mulf %143, %146 : vector<8x1152xf32>
    %148 = arith.addf %145, %147 : vector<8x1152xf32>
    %c0_108 = arith.constant 0 : index
    %c6_109 = arith.constant 6 : index
    %149 = memref.load %arg1[%c0_108, %c6_109] : memref<2x7xf32, #tpu.memory_space<smem>>
    %150 = vector.broadcast %149 : f32 to vector<8x1152xf32>
    %151 = arith.addf %148, %150 : vector<8x1152xf32>
    %c2_110 = arith.constant 2 : index
    %c0_111 = arith.constant 0 : index
    %c0_112 = arith.constant 0 : index
    %152 = vector.load %arg4[%c2_110, %c0_111, %c0_112] : memref<4x8x1152xf32, #tpu.memory_space<vmem>>, vector<1x8x1152xf32>
    %153 = vector.shape_cast %152 : vector<1x8x1152xf32> to vector<8x1152xf32>
    %154 = vector.shape_cast %151 : vector<8x1152xf32> to vector<1x8x1152xf32>
    tpu.vector_store %arg4[%c2_110, %c0_111, %c0_112], %154 {strides = array<i32>} : memref<4x8x1152xf32, #tpu.memory_space<vmem>>, vector<1x8x1152xf32>,
    %c1_113 = arith.constant 1 : index
    %c0_114 = arith.constant 0 : index
    %155 = memref.load %arg1[%c1_113, %c0_114] : memref<2x7xf32, #tpu.memory_space<smem>>
    %c3_115 = arith.constant 3 : index
    %c0_116 = arith.constant 0 : index
    %c0_117 = arith.constant 0 : index
    %156 = vector.load %arg2[%c3_115, %c0_116, %c0_117] : memref<6x8x1152xf32, #tpu.memory_space<vmem>>, vector<1x8x1152xf32>
    %157 = vector.shape_cast %156 : vector<1x8x1152xf32> to vector<8x1152xf32>
    %158 = vector.broadcast %155 : f32 to vector<8x1152xf32>
    %159 = arith.mulf %158, %157 : vector<8x1152xf32>
    %c1_118 = arith.constant 1 : index
    %c1_119 = arith.constant 1 : index
    %160 = memref.load %arg1[%c1_118, %c1_119] : memref<2x7xf32, #tpu.memory_space<smem>>
    %c4_120 = arith.constant 4 : index
    %c0_121 = arith.constant 0 : index
    %c0_122 = arith.constant 0 : index
    %161 = vector.load %arg2[%c4_120, %c0_121, %c0_122] : memref<6x8x1152xf32, #tpu.memory_space<vmem>>, vector<1x8x1152xf32>
    %162 = vector.shape_cast %161 : vector<1x8x1152xf32> to vector<8x1152xf32>
    %163 = vector.broadcast %160 : f32 to vector<8x1152xf32>
    %164 = arith.mulf %163, %162 : vector<8x1152xf32>
    %165 = arith.addf %159, %164 : vector<8x1152xf32>
    %c1_123 = arith.constant 1 : index
    %c2_124 = arith.constant 2 : index
    %166 = memref.load %arg1[%c1_123, %c2_124] : memref<2x7xf32, #tpu.memory_space<smem>>
    %c5_125 = arith.constant 5 : index
    %c0_126 = arith.constant 0 : index
    %c0_127 = arith.constant 0 : index
    %167 = vector.load %arg2[%c5_125, %c0_126, %c0_127] : memref<6x8x1152xf32, #tpu.memory_space<vmem>>, vector<1x8x1152xf32>
    %168 = vector.shape_cast %167 : vector<1x8x1152xf32> to vector<8x1152xf32>
    %169 = vector.broadcast %166 : f32 to vector<8x1152xf32>
    %170 = arith.mulf %169, %168 : vector<8x1152xf32>
    %171 = arith.addf %165, %170 : vector<8x1152xf32>
    %c1_128 = arith.constant 1 : index
    %c3_129 = arith.constant 3 : index
    %172 = memref.load %arg1[%c1_128, %c3_129] : memref<2x7xf32, #tpu.memory_space<smem>>
    %c3_130 = arith.constant 3 : index
    %c0_131 = arith.constant 0 : index
    %c0_132 = arith.constant 0 : index
    %173 = vector.load %arg3[%c3_130, %c0_131, %c0_132] : memref<6x8x1152xf32, #tpu.memory_space<vmem>>, vector<1x8x1152xf32>
    %174 = vector.shape_cast %173 : vector<1x8x1152xf32> to vector<8x1152xf32>
    %175 = vector.broadcast %172 : f32 to vector<8x1152xf32>
    %176 = arith.mulf %175, %174 : vector<8x1152xf32>
    %c1_133 = arith.constant 1 : index
    %c4_134 = arith.constant 4 : index
    %177 = memref.load %arg1[%c1_133, %c4_134] : memref<2x7xf32, #tpu.memory_space<smem>>
    %c4_135 = arith.constant 4 : index
    %c0_136 = arith.constant 0 : index
    %c0_137 = arith.constant 0 : index
    %178 = vector.load %arg3[%c4_135, %c0_136, %c0_137] : memref<6x8x1152xf32, #tpu.memory_space<vmem>>, vector<1x8x1152xf32>
    %179 = vector.shape_cast %178 : vector<1x8x1152xf32> to vector<8x1152xf32>
    %180 = vector.broadcast %177 : f32 to vector<8x1152xf32>
    %181 = arith.mulf %180, %179 : vector<8x1152xf32>
    %182 = arith.addf %176, %181 : vector<8x1152xf32>
    %c1_138 = arith.constant 1 : index
    %c5_139 = arith.constant 5 : index
    %183 = memref.load %arg1[%c1_138, %c5_139] : memref<2x7xf32, #tpu.memory_space<smem>>
    %c5_140 = arith.constant 5 : index
    %c0_141 = arith.constant 0 : index
    %c0_142 = arith.constant 0 : index
    %184 = vector.load %arg3[%c5_140, %c0_141, %c0_142] : memref<6x8x1152xf32, #tpu.memory_space<vmem>>, vector<1x8x1152xf32>
    %185 = vector.shape_cast %184 : vector<1x8x1152xf32> to vector<8x1152xf32>
    %186 = vector.broadcast %183 : f32 to vector<8x1152xf32>
    %187 = arith.mulf %186, %185 : vector<8x1152xf32>
    %188 = arith.addf %182, %187 : vector<8x1152xf32>
    %189 = vector.broadcast %9 : vector<1x1xf32> to vector<8x1152xf32>
    %190 = arith.mulf %171, %189 : vector<8x1152xf32>
    %191 = vector.broadcast %19 : vector<1x1xf32> to vector<8x1152xf32>
    %192 = arith.mulf %188, %191 : vector<8x1152xf32>
    %193 = arith.addf %190, %192 : vector<8x1152xf32>
    %c1_143 = arith.constant 1 : index
    %c6_144 = arith.constant 6 : index
    %194 = memref.load %arg1[%c1_143, %c6_144] : memref<2x7xf32, #tpu.memory_space<smem>>
    %195 = vector.broadcast %194 : f32 to vector<8x1152xf32>
    %196 = arith.addf %193, %195 : vector<8x1152xf32>
    %c3_145 = arith.constant 3 : index
    %c0_146 = arith.constant 0 : index
    %c0_147 = arith.constant 0 : index
    %197 = vector.load %arg4[%c3_145, %c0_146, %c0_147] : memref<4x8x1152xf32, #tpu.memory_space<vmem>>, vector<1x8x1152xf32>
    %198 = vector.shape_cast %197 : vector<1x8x1152xf32> to vector<8x1152xf32>
    %199 = vector.shape_cast %196 : vector<8x1152xf32> to vector<1x8x1152xf32>
    tpu.vector_store %arg4[%c3_145, %c0_146, %c0_147], %199 {strides = array<i32>} : memref<4x8x1152xf32, #tpu.memory_space<vmem>>, vector<1x8x1152xf32>,
    return
  }
  func.func @transform_0(%arg0: i32) -> (i32, i32) {
    %c0_i32 = arith.constant 0 : i32
    %c0_i32_0 = arith.constant 0 : i32
    %c0_i32_1 = arith.constant 0 : i32
    return %c0_i32, %c0_i32_0 : i32, i32
  }
  func.func @transform_1(%arg0: i32) -> (i32, i32, i32) {
    %c0_i32 = arith.constant 0 : i32
    %c0_i32_0 = arith.constant 0 : i32
    %c0_i32_1 = arith.constant 0 : i32
    return %c0_i32, %c0_i32_0, %arg0 : i32, i32, i32
  }
  func.func @transform_2(%arg0: i32) -> (i32, i32, i32) {
    %c0_i32 = arith.constant 0 : i32
    %c0_i32_0 = arith.constant 0 : i32
    %c0_i32_1 = arith.constant 0 : i32
    return %c0_i32, %c0_i32_0, %arg0 : i32, i32, i32
  }
  func.func @transform_3(%arg0: i32) -> (i32, i32, i32) {
    %c0_i32 = arith.constant 0 : i32
    %c0_i32_0 = arith.constant 0 : i32
    %c0_i32_1 = arith.constant 0 : i32
    return %c0_i32, %c0_i32_0, %arg0 : i32, i32, i32
  }
}

module attributes {stable_mosaic.version = 11 : i64} {
  func.func @_color_mse_kernel(%arg0: i32, %arg1: memref<2x9xf32, #tpu.memory_space<smem>>, %arg2: memref<6x8x1152xf32, #tpu.memory_space<vmem>>, %arg3: memref<6x8x1152xf32, #tpu.memory_space<vmem>>, %arg4: memref<2x8x1152xf32, #tpu.memory_space<vmem>>, %arg5: memref<1x1xf32, #tpu.memory_space<vmem>>, %arg6: memref<1x1xf32, #tpu.memory_space<vmem>>, %arg7: memref<8x1152xf32, #tpu.memory_space<vmem>>, %arg8: memref<8x1152xf32, #tpu.memory_space<vmem>>) attributes {dimension_semantics = [#tpu.dimension_semantics<arbitrary>], iteration_bounds = array<i64: 1>, scalar_prefetch = 0 : i64, scratch_operands = 2 : i64, tpu.core_type = #tpu.core_type<tc>, window_params = [{transform_indices = @transform_0, window_bounds = array<i64: 2, 9>}, {transform_indices = @transform_1, window_bounds = array<i64: 6, 8, 1152>}, {transform_indices = @transform_2, window_bounds = array<i64: 6, 8, 1152>}, {transform_indices = @transform_3, window_bounds = array<i64: 2, 8, 1152>}, {pipeline_mode = #tpu.pipeline_mode<synchronous>, transform_indices = @transform_4, window_bounds = array<i64: 1, 1>}, {pipeline_mode = #tpu.pipeline_mode<synchronous>, transform_indices = @transform_5, window_bounds = array<i64: 1, 1>}]} {
    %c0_i32 = arith.constant 0 : i32
    %0 = arith.cmpi eq, %arg0, %c0_i32 : i32
    %1 = arith.extui %0 : i1 to i32
    %c0_i32_0 = arith.constant 0 : i32
    %2 = arith.cmpi ne, %1, %c0_i32_0 : i32
    scf.if %2 {
      %cst = arith.constant 0.000000e+00 : f32
      %154 = vector.broadcast %cst : f32 to vector<8x1152xf32>
      %c0_116 = arith.constant 0 : index
      %c0_117 = arith.constant 0 : index
      %155 = vector.load %arg7[%c0_116, %c0_117] : memref<8x1152xf32, #tpu.memory_space<vmem>>, vector<8x1152xf32>
      tpu.vector_store %arg7[%c0_116, %c0_117], %154 {strides = array<i32>} : memref<8x1152xf32, #tpu.memory_space<vmem>>, vector<8x1152xf32>,
      %cst_118 = arith.constant 0.000000e+00 : f32
      %156 = vector.broadcast %cst_118 : f32 to vector<8x1152xf32>
      %c0_119 = arith.constant 0 : index
      %c0_120 = arith.constant 0 : index
      %157 = vector.load %arg8[%c0_119, %c0_120] : memref<8x1152xf32, #tpu.memory_space<vmem>>, vector<8x1152xf32>
      tpu.vector_store %arg8[%c0_119, %c0_120], %156 {strides = array<i32>} : memref<8x1152xf32, #tpu.memory_space<vmem>>, vector<8x1152xf32>,
    } else {
    }
    %c0 = arith.constant 0 : index
    %c0_1 = arith.constant 0 : index
    %c0_2 = arith.constant 0 : index
    %3 = vector.load %arg4[%c0, %c0_1, %c0_2] : memref<2x8x1152xf32, #tpu.memory_space<vmem>>, vector<1x8x1152xf32>
    %4 = vector.shape_cast %3 : vector<1x8x1152xf32> to vector<8x1152xf32>
    %c0_3 = arith.constant 0 : index
    %c0_4 = arith.constant 0 : index
    %5 = memref.load %arg1[%c0_3, %c0_4] : memref<2x9xf32, #tpu.memory_space<smem>>
    %c0_5 = arith.constant 0 : index
    %c0_6 = arith.constant 0 : index
    %c0_7 = arith.constant 0 : index
    %6 = vector.load %arg2[%c0_5, %c0_6, %c0_7] : memref<6x8x1152xf32, #tpu.memory_space<vmem>>, vector<1x8x1152xf32>
    %7 = vector.shape_cast %6 : vector<1x8x1152xf32> to vector<8x1152xf32>
    %8 = vector.broadcast %5 : f32 to vector<8x1152xf32>
    %9 = arith.mulf %8, %7 : vector<8x1152xf32>
    %c0_8 = arith.constant 0 : index
    %c3 = arith.constant 3 : index
    %10 = memref.load %arg1[%c0_8, %c3] : memref<2x9xf32, #tpu.memory_space<smem>>
    %c1 = arith.constant 1 : index
    %c0_9 = arith.constant 0 : index
    %c0_10 = arith.constant 0 : index
    %11 = vector.load %arg2[%c1, %c0_9, %c0_10] : memref<6x8x1152xf32, #tpu.memory_space<vmem>>, vector<1x8x1152xf32>
    %12 = vector.shape_cast %11 : vector<1x8x1152xf32> to vector<8x1152xf32>
    %13 = vector.broadcast %10 : f32 to vector<8x1152xf32>
    %14 = arith.mulf %13, %12 : vector<8x1152xf32>
    %15 = arith.addf %9, %14 : vector<8x1152xf32>
    %c0_11 = arith.constant 0 : index
    %c6 = arith.constant 6 : index
    %16 = memref.load %arg1[%c0_11, %c6] : memref<2x9xf32, #tpu.memory_space<smem>>
    %c2 = arith.constant 2 : index
    %c0_12 = arith.constant 0 : index
    %c0_13 = arith.constant 0 : index
    %17 = vector.load %arg2[%c2, %c0_12, %c0_13] : memref<6x8x1152xf32, #tpu.memory_space<vmem>>, vector<1x8x1152xf32>
    %18 = vector.shape_cast %17 : vector<1x8x1152xf32> to vector<8x1152xf32>
    %19 = vector.broadcast %16 : f32 to vector<8x1152xf32>
    %20 = arith.mulf %19, %18 : vector<8x1152xf32>
    %21 = arith.addf %15, %20 : vector<8x1152xf32>
    %c0_14 = arith.constant 0 : index
    %c0_15 = arith.constant 0 : index
    %c0_16 = arith.constant 0 : index
    %22 = vector.load %arg3[%c0_14, %c0_15, %c0_16] : memref<6x8x1152xf32, #tpu.memory_space<vmem>>, vector<1x8x1152xf32>
    %23 = vector.shape_cast %22 : vector<1x8x1152xf32> to vector<8x1152xf32>
    %24 = arith.subf %21, %23 : vector<8x1152xf32>
    %25 = arith.mulf %24, %24 : vector<8x1152xf32>
    %26 = arith.mulf %25, %4 : vector<8x1152xf32>
    %c0_17 = arith.constant 0 : index
    %c1_18 = arith.constant 1 : index
    %27 = memref.load %arg1[%c0_17, %c1_18] : memref<2x9xf32, #tpu.memory_space<smem>>
    %c0_19 = arith.constant 0 : index
    %c0_20 = arith.constant 0 : index
    %c0_21 = arith.constant 0 : index
    %28 = vector.load %arg2[%c0_19, %c0_20, %c0_21] : memref<6x8x1152xf32, #tpu.memory_space<vmem>>, vector<1x8x1152xf32>
    %29 = vector.shape_cast %28 : vector<1x8x1152xf32> to vector<8x1152xf32>
    %30 = vector.broadcast %27 : f32 to vector<8x1152xf32>
    %31 = arith.mulf %30, %29 : vector<8x1152xf32>
    %c0_22 = arith.constant 0 : index
    %c4 = arith.constant 4 : index
    %32 = memref.load %arg1[%c0_22, %c4] : memref<2x9xf32, #tpu.memory_space<smem>>
    %c1_23 = arith.constant 1 : index
    %c0_24 = arith.constant 0 : index
    %c0_25 = arith.constant 0 : index
    %33 = vector.load %arg2[%c1_23, %c0_24, %c0_25] : memref<6x8x1152xf32, #tpu.memory_space<vmem>>, vector<1x8x1152xf32>
    %34 = vector.shape_cast %33 : vector<1x8x1152xf32> to vector<8x1152xf32>
    %35 = vector.broadcast %32 : f32 to vector<8x1152xf32>
    %36 = arith.mulf %35, %34 : vector<8x1152xf32>
    %37 = arith.addf %31, %36 : vector<8x1152xf32>
    %c0_26 = arith.constant 0 : index
    %c7 = arith.constant 7 : index
    %38 = memref.load %arg1[%c0_26, %c7] : memref<2x9xf32, #tpu.memory_space<smem>>
    %c2_27 = arith.constant 2 : index
    %c0_28 = arith.constant 0 : index
    %c0_29 = arith.constant 0 : index
    %39 = vector.load %arg2[%c2_27, %c0_28, %c0_29] : memref<6x8x1152xf32, #tpu.memory_space<vmem>>, vector<1x8x1152xf32>
    %40 = vector.shape_cast %39 : vector<1x8x1152xf32> to vector<8x1152xf32>
    %41 = vector.broadcast %38 : f32 to vector<8x1152xf32>
    %42 = arith.mulf %41, %40 : vector<8x1152xf32>
    %43 = arith.addf %37, %42 : vector<8x1152xf32>
    %c1_30 = arith.constant 1 : index
    %c0_31 = arith.constant 0 : index
    %c0_32 = arith.constant 0 : index
    %44 = vector.load %arg3[%c1_30, %c0_31, %c0_32] : memref<6x8x1152xf32, #tpu.memory_space<vmem>>, vector<1x8x1152xf32>
    %45 = vector.shape_cast %44 : vector<1x8x1152xf32> to vector<8x1152xf32>
    %46 = arith.subf %43, %45 : vector<8x1152xf32>
    %47 = arith.mulf %46, %46 : vector<8x1152xf32>
    %48 = arith.mulf %47, %4 : vector<8x1152xf32>
    %49 = arith.addf %26, %48 : vector<8x1152xf32>
    %c0_33 = arith.constant 0 : index
    %c2_34 = arith.constant 2 : index
    %50 = memref.load %arg1[%c0_33, %c2_34] : memref<2x9xf32, #tpu.memory_space<smem>>
    %c0_35 = arith.constant 0 : index
    %c0_36 = arith.constant 0 : index
    %c0_37 = arith.constant 0 : index
    %51 = vector.load %arg2[%c0_35, %c0_36, %c0_37] : memref<6x8x1152xf32, #tpu.memory_space<vmem>>, vector<1x8x1152xf32>
    %52 = vector.shape_cast %51 : vector<1x8x1152xf32> to vector<8x1152xf32>
    %53 = vector.broadcast %50 : f32 to vector<8x1152xf32>
    %54 = arith.mulf %53, %52 : vector<8x1152xf32>
    %c0_38 = arith.constant 0 : index
    %c5 = arith.constant 5 : index
    %55 = memref.load %arg1[%c0_38, %c5] : memref<2x9xf32, #tpu.memory_space<smem>>
    %c1_39 = arith.constant 1 : index
    %c0_40 = arith.constant 0 : index
    %c0_41 = arith.constant 0 : index
    %56 = vector.load %arg2[%c1_39, %c0_40, %c0_41] : memref<6x8x1152xf32, #tpu.memory_space<vmem>>, vector<1x8x1152xf32>
    %57 = vector.shape_cast %56 : vector<1x8x1152xf32> to vector<8x1152xf32>
    %58 = vector.broadcast %55 : f32 to vector<8x1152xf32>
    %59 = arith.mulf %58, %57 : vector<8x1152xf32>
    %60 = arith.addf %54, %59 : vector<8x1152xf32>
    %c0_42 = arith.constant 0 : index
    %c8 = arith.constant 8 : index
    %61 = memref.load %arg1[%c0_42, %c8] : memref<2x9xf32, #tpu.memory_space<smem>>
    %c2_43 = arith.constant 2 : index
    %c0_44 = arith.constant 0 : index
    %c0_45 = arith.constant 0 : index
    %62 = vector.load %arg2[%c2_43, %c0_44, %c0_45] : memref<6x8x1152xf32, #tpu.memory_space<vmem>>, vector<1x8x1152xf32>
    %63 = vector.shape_cast %62 : vector<1x8x1152xf32> to vector<8x1152xf32>
    %64 = vector.broadcast %61 : f32 to vector<8x1152xf32>
    %65 = arith.mulf %64, %63 : vector<8x1152xf32>
    %66 = arith.addf %60, %65 : vector<8x1152xf32>
    %c2_46 = arith.constant 2 : index
    %c0_47 = arith.constant 0 : index
    %c0_48 = arith.constant 0 : index
    %67 = vector.load %arg3[%c2_46, %c0_47, %c0_48] : memref<6x8x1152xf32, #tpu.memory_space<vmem>>, vector<1x8x1152xf32>
    %68 = vector.shape_cast %67 : vector<1x8x1152xf32> to vector<8x1152xf32>
    %69 = arith.subf %66, %68 : vector<8x1152xf32>
    %70 = arith.mulf %69, %69 : vector<8x1152xf32>
    %71 = arith.mulf %70, %4 : vector<8x1152xf32>
    %72 = arith.addf %49, %71 : vector<8x1152xf32>
    %c1_49 = arith.constant 1 : index
    %c0_50 = arith.constant 0 : index
    %c0_51 = arith.constant 0 : index
    %73 = vector.load %arg4[%c1_49, %c0_50, %c0_51] : memref<2x8x1152xf32, #tpu.memory_space<vmem>>, vector<1x8x1152xf32>
    %74 = vector.shape_cast %73 : vector<1x8x1152xf32> to vector<8x1152xf32>
    %75 = arith.addf %4, %74 : vector<8x1152xf32>
    %c1_52 = arith.constant 1 : index
    %c0_53 = arith.constant 0 : index
    %76 = memref.load %arg1[%c1_52, %c0_53] : memref<2x9xf32, #tpu.memory_space<smem>>
    %c3_54 = arith.constant 3 : index
    %c0_55 = arith.constant 0 : index
    %c0_56 = arith.constant 0 : index
    %77 = vector.load %arg2[%c3_54, %c0_55, %c0_56] : memref<6x8x1152xf32, #tpu.memory_space<vmem>>, vector<1x8x1152xf32>
    %78 = vector.shape_cast %77 : vector<1x8x1152xf32> to vector<8x1152xf32>
    %79 = vector.broadcast %76 : f32 to vector<8x1152xf32>
    %80 = arith.mulf %79, %78 : vector<8x1152xf32>
    %c1_57 = arith.constant 1 : index
    %c3_58 = arith.constant 3 : index
    %81 = memref.load %arg1[%c1_57, %c3_58] : memref<2x9xf32, #tpu.memory_space<smem>>
    %c4_59 = arith.constant 4 : index
    %c0_60 = arith.constant 0 : index
    %c0_61 = arith.constant 0 : index
    %82 = vector.load %arg2[%c4_59, %c0_60, %c0_61] : memref<6x8x1152xf32, #tpu.memory_space<vmem>>, vector<1x8x1152xf32>
    %83 = vector.shape_cast %82 : vector<1x8x1152xf32> to vector<8x1152xf32>
    %84 = vector.broadcast %81 : f32 to vector<8x1152xf32>
    %85 = arith.mulf %84, %83 : vector<8x1152xf32>
    %86 = arith.addf %80, %85 : vector<8x1152xf32>
    %c1_62 = arith.constant 1 : index
    %c6_63 = arith.constant 6 : index
    %87 = memref.load %arg1[%c1_62, %c6_63] : memref<2x9xf32, #tpu.memory_space<smem>>
    %c5_64 = arith.constant 5 : index
    %c0_65 = arith.constant 0 : index
    %c0_66 = arith.constant 0 : index
    %88 = vector.load %arg2[%c5_64, %c0_65, %c0_66] : memref<6x8x1152xf32, #tpu.memory_space<vmem>>, vector<1x8x1152xf32>
    %89 = vector.shape_cast %88 : vector<1x8x1152xf32> to vector<8x1152xf32>
    %90 = vector.broadcast %87 : f32 to vector<8x1152xf32>
    %91 = arith.mulf %90, %89 : vector<8x1152xf32>
    %92 = arith.addf %86, %91 : vector<8x1152xf32>
    %c3_67 = arith.constant 3 : index
    %c0_68 = arith.constant 0 : index
    %c0_69 = arith.constant 0 : index
    %93 = vector.load %arg3[%c3_67, %c0_68, %c0_69] : memref<6x8x1152xf32, #tpu.memory_space<vmem>>, vector<1x8x1152xf32>
    %94 = vector.shape_cast %93 : vector<1x8x1152xf32> to vector<8x1152xf32>
    %95 = arith.subf %92, %94 : vector<8x1152xf32>
    %96 = arith.mulf %95, %95 : vector<8x1152xf32>
    %97 = arith.mulf %96, %74 : vector<8x1152xf32>
    %98 = arith.addf %72, %97 : vector<8x1152xf32>
    %c1_70 = arith.constant 1 : index
    %c1_71 = arith.constant 1 : index
    %99 = memref.load %arg1[%c1_70, %c1_71] : memref<2x9xf32, #tpu.memory_space<smem>>
    %c3_72 = arith.constant 3 : index
    %c0_73 = arith.constant 0 : index
    %c0_74 = arith.constant 0 : index
    %100 = vector.load %arg2[%c3_72, %c0_73, %c0_74] : memref<6x8x1152xf32, #tpu.memory_space<vmem>>, vector<1x8x1152xf32>
    %101 = vector.shape_cast %100 : vector<1x8x1152xf32> to vector<8x1152xf32>
    %102 = vector.broadcast %99 : f32 to vector<8x1152xf32>
    %103 = arith.mulf %102, %101 : vector<8x1152xf32>
    %c1_75 = arith.constant 1 : index
    %c4_76 = arith.constant 4 : index
    %104 = memref.load %arg1[%c1_75, %c4_76] : memref<2x9xf32, #tpu.memory_space<smem>>
    %c4_77 = arith.constant 4 : index
    %c0_78 = arith.constant 0 : index
    %c0_79 = arith.constant 0 : index
    %105 = vector.load %arg2[%c4_77, %c0_78, %c0_79] : memref<6x8x1152xf32, #tpu.memory_space<vmem>>, vector<1x8x1152xf32>
    %106 = vector.shape_cast %105 : vector<1x8x1152xf32> to vector<8x1152xf32>
    %107 = vector.broadcast %104 : f32 to vector<8x1152xf32>
    %108 = arith.mulf %107, %106 : vector<8x1152xf32>
    %109 = arith.addf %103, %108 : vector<8x1152xf32>
    %c1_80 = arith.constant 1 : index
    %c7_81 = arith.constant 7 : index
    %110 = memref.load %arg1[%c1_80, %c7_81] : memref<2x9xf32, #tpu.memory_space<smem>>
    %c5_82 = arith.constant 5 : index
    %c0_83 = arith.constant 0 : index
    %c0_84 = arith.constant 0 : index
    %111 = vector.load %arg2[%c5_82, %c0_83, %c0_84] : memref<6x8x1152xf32, #tpu.memory_space<vmem>>, vector<1x8x1152xf32>
    %112 = vector.shape_cast %111 : vector<1x8x1152xf32> to vector<8x1152xf32>
    %113 = vector.broadcast %110 : f32 to vector<8x1152xf32>
    %114 = arith.mulf %113, %112 : vector<8x1152xf32>
    %115 = arith.addf %109, %114 : vector<8x1152xf32>
    %c4_85 = arith.constant 4 : index
    %c0_86 = arith.constant 0 : index
    %c0_87 = arith.constant 0 : index
    %116 = vector.load %arg3[%c4_85, %c0_86, %c0_87] : memref<6x8x1152xf32, #tpu.memory_space<vmem>>, vector<1x8x1152xf32>
    %117 = vector.shape_cast %116 : vector<1x8x1152xf32> to vector<8x1152xf32>
    %118 = arith.subf %115, %117 : vector<8x1152xf32>
    %119 = arith.mulf %118, %118 : vector<8x1152xf32>
    %120 = arith.mulf %119, %74 : vector<8x1152xf32>
    %121 = arith.addf %98, %120 : vector<8x1152xf32>
    %c1_88 = arith.constant 1 : index
    %c2_89 = arith.constant 2 : index
    %122 = memref.load %arg1[%c1_88, %c2_89] : memref<2x9xf32, #tpu.memory_space<smem>>
    %c3_90 = arith.constant 3 : index
    %c0_91 = arith.constant 0 : index
    %c0_92 = arith.constant 0 : index
    %123 = vector.load %arg2[%c3_90, %c0_91, %c0_92] : memref<6x8x1152xf32, #tpu.memory_space<vmem>>, vector<1x8x1152xf32>
    %124 = vector.shape_cast %123 : vector<1x8x1152xf32> to vector<8x1152xf32>
    %125 = vector.broadcast %122 : f32 to vector<8x1152xf32>
    %126 = arith.mulf %125, %124 : vector<8x1152xf32>
    %c1_93 = arith.constant 1 : index
    %c5_94 = arith.constant 5 : index
    %127 = memref.load %arg1[%c1_93, %c5_94] : memref<2x9xf32, #tpu.memory_space<smem>>
    %c4_95 = arith.constant 4 : index
    %c0_96 = arith.constant 0 : index
    %c0_97 = arith.constant 0 : index
    %128 = vector.load %arg2[%c4_95, %c0_96, %c0_97] : memref<6x8x1152xf32, #tpu.memory_space<vmem>>, vector<1x8x1152xf32>
    %129 = vector.shape_cast %128 : vector<1x8x1152xf32> to vector<8x1152xf32>
    %130 = vector.broadcast %127 : f32 to vector<8x1152xf32>
    %131 = arith.mulf %130, %129 : vector<8x1152xf32>
    %132 = arith.addf %126, %131 : vector<8x1152xf32>
    %c1_98 = arith.constant 1 : index
    %c8_99 = arith.constant 8 : index
    %133 = memref.load %arg1[%c1_98, %c8_99] : memref<2x9xf32, #tpu.memory_space<smem>>
    %c5_100 = arith.constant 5 : index
    %c0_101 = arith.constant 0 : index
    %c0_102 = arith.constant 0 : index
    %134 = vector.load %arg2[%c5_100, %c0_101, %c0_102] : memref<6x8x1152xf32, #tpu.memory_space<vmem>>, vector<1x8x1152xf32>
    %135 = vector.shape_cast %134 : vector<1x8x1152xf32> to vector<8x1152xf32>
    %136 = vector.broadcast %133 : f32 to vector<8x1152xf32>
    %137 = arith.mulf %136, %135 : vector<8x1152xf32>
    %138 = arith.addf %132, %137 : vector<8x1152xf32>
    %c5_103 = arith.constant 5 : index
    %c0_104 = arith.constant 0 : index
    %c0_105 = arith.constant 0 : index
    %139 = vector.load %arg3[%c5_103, %c0_104, %c0_105] : memref<6x8x1152xf32, #tpu.memory_space<vmem>>, vector<1x8x1152xf32>
    %140 = vector.shape_cast %139 : vector<1x8x1152xf32> to vector<8x1152xf32>
    %141 = arith.subf %138, %140 : vector<8x1152xf32>
    %142 = arith.mulf %141, %141 : vector<8x1152xf32>
    %143 = arith.mulf %142, %74 : vector<8x1152xf32>
    %144 = arith.addf %121, %143 : vector<8x1152xf32>
    %c0_106 = arith.constant 0 : index
    %c0_107 = arith.constant 0 : index
    %145 = vector.load %arg7[%c0_106, %c0_107] : memref<8x1152xf32, #tpu.memory_space<vmem>>, vector<8x1152xf32>
    %146 = arith.addf %145, %144 : vector<8x1152xf32>
    %c0_108 = arith.constant 0 : index
    %c0_109 = arith.constant 0 : index
    %147 = vector.load %arg7[%c0_108, %c0_109] : memref<8x1152xf32, #tpu.memory_space<vmem>>, vector<8x1152xf32>
    tpu.vector_store %arg7[%c0_108, %c0_109], %146 {strides = array<i32>} : memref<8x1152xf32, #tpu.memory_space<vmem>>, vector<8x1152xf32>,
    %c0_110 = arith.constant 0 : index
    %c0_111 = arith.constant 0 : index
    %148 = vector.load %arg8[%c0_110, %c0_111] : memref<8x1152xf32, #tpu.memory_space<vmem>>, vector<8x1152xf32>
    %149 = arith.addf %148, %75 : vector<8x1152xf32>
    %c0_112 = arith.constant 0 : index
    %c0_113 = arith.constant 0 : index
    %150 = vector.load %arg8[%c0_112, %c0_113] : memref<8x1152xf32, #tpu.memory_space<vmem>>, vector<8x1152xf32>
    tpu.vector_store %arg8[%c0_112, %c0_113], %149 {strides = array<i32>} : memref<8x1152xf32, #tpu.memory_space<vmem>>, vector<8x1152xf32>,
    %c0_i32_114 = arith.constant 0 : i32
    %151 = arith.cmpi eq, %arg0, %c0_i32_114 : i32
    %152 = arith.extui %151 : i1 to i32
    %c0_i32_115 = arith.constant 0 : i32
    %153 = arith.cmpi ne, %152, %c0_i32_115 : i32
    scf.if %153 {
      %c0_116 = arith.constant 0 : index
      %c0_117 = arith.constant 0 : index
      %154 = vector.load %arg7[%c0_116, %c0_117] : memref<8x1152xf32, #tpu.memory_space<vmem>>, vector<8x1152xf32>
      %cst = arith.constant dense<0.000000e+00> : vector<8xf32>
      %155 = vector.multi_reduction <add>, %154, %cst [1] : vector<8x1152xf32> to vector<8xf32>
      %156 = vector.shape_cast %155 : vector<8xf32> to vector<8x1xf32>
      %cst_118 = arith.constant dense<0.000000e+00> : vector<1xf32>
      %157 = vector.multi_reduction <add>, %156, %cst_118 [0] : vector<8x1xf32> to vector<1xf32>
      %158 = vector.shape_cast %157 : vector<1xf32> to vector<1x1xf32>
      %c0_119 = arith.constant 0 : index
      %c0_120 = arith.constant 0 : index
      %159 = vector.load %arg5[%c0_119, %c0_120] : memref<1x1xf32, #tpu.memory_space<vmem>>, vector<1x1xf32>
      tpu.vector_store %arg5[%c0_119, %c0_120], %158 {strides = array<i32>} : memref<1x1xf32, #tpu.memory_space<vmem>>, vector<1x1xf32>,
      %c0_121 = arith.constant 0 : index
      %c0_122 = arith.constant 0 : index
      %160 = vector.load %arg8[%c0_121, %c0_122] : memref<8x1152xf32, #tpu.memory_space<vmem>>, vector<8x1152xf32>
      %cst_123 = arith.constant dense<0.000000e+00> : vector<8xf32>
      %161 = vector.multi_reduction <add>, %160, %cst_123 [1] : vector<8x1152xf32> to vector<8xf32>
      %162 = vector.shape_cast %161 : vector<8xf32> to vector<8x1xf32>
      %cst_124 = arith.constant dense<0.000000e+00> : vector<1xf32>
      %163 = vector.multi_reduction <add>, %162, %cst_124 [0] : vector<8x1xf32> to vector<1xf32>
      %164 = vector.shape_cast %163 : vector<1xf32> to vector<1x1xf32>
      %c0_125 = arith.constant 0 : index
      %c0_126 = arith.constant 0 : index
      %165 = vector.load %arg6[%c0_125, %c0_126] : memref<1x1xf32, #tpu.memory_space<vmem>>, vector<1x1xf32>
      tpu.vector_store %arg6[%c0_125, %c0_126], %164 {strides = array<i32>} : memref<1x1xf32, #tpu.memory_space<vmem>>, vector<1x1xf32>,
    } else {
    }
    return
  }
  func.func @transform_0(%arg0: i32) -> (i32, i32) {
    %c0_i32 = arith.constant 0 : i32
    %c0_i32_0 = arith.constant 0 : i32
    %c0_i32_1 = arith.constant 0 : i32
    return %c0_i32, %c0_i32_0 : i32, i32
  }
  func.func @transform_1(%arg0: i32) -> (i32, i32, i32) {
    %c0_i32 = arith.constant 0 : i32
    %c0_i32_0 = arith.constant 0 : i32
    %c0_i32_1 = arith.constant 0 : i32
    return %c0_i32, %c0_i32_0, %arg0 : i32, i32, i32
  }
  func.func @transform_2(%arg0: i32) -> (i32, i32, i32) {
    %c0_i32 = arith.constant 0 : i32
    %c0_i32_0 = arith.constant 0 : i32
    %c0_i32_1 = arith.constant 0 : i32
    return %c0_i32, %c0_i32_0, %arg0 : i32, i32, i32
  }
  func.func @transform_3(%arg0: i32) -> (i32, i32, i32) {
    %c0_i32 = arith.constant 0 : i32
    %c0_i32_0 = arith.constant 0 : i32
    %c0_i32_1 = arith.constant 0 : i32
    return %c0_i32, %c0_i32_0, %arg0 : i32, i32, i32
  }
  func.func @transform_4(%arg0: i32) -> (i32, i32) {
    %c0_i32 = arith.constant 0 : i32
    %c0_i32_0 = arith.constant 0 : i32
    %c0_i32_1 = arith.constant 0 : i32
    return %c0_i32, %c0_i32_0 : i32, i32
  }
  func.func @transform_5(%arg0: i32) -> (i32, i32) {
    %c0_i32 = arith.constant 0 : i32
    %c0_i32_0 = arith.constant 0 : i32
    %c0_i32_1 = arith.constant 0 : i32
    return %c0_i32, %c0_i32_0 : i32, i32
  }
}

</mosaic_0001>

<bundles_post_ra>
// kernel: custom-call.35
= control target key start
LH: loop header
LB: loop body
LE: loop exit
PB: predicated region body
PF: predicated region fallthrough
CT: control target
= control target key end

     0   :  { %s664_s9 = smov 0   ;;  %s666_s10 = smov 0   ;;  %s810_s0 = inlined_call_operand.vmem [shape: f32[2,4,3], index: 0, kind: input, shape index: {}]   ;;  %s811_s1 = inlined_call_operand.vmem [shape: f32[2,4,3], index: 1, kind: output, shape index: {0}]   ;;  %s812_s2 = inlined_call_operand.vmem [shape: f32[2,3], index: 2, kind: output, shape index: {1}]  }
   0x1   :  { %s668_s11 = smov 0   ;;  %s670_s12 = smov 0  }
   0x2   :  { %s672_s13 = smov 0  }
   0x3 LB: > { %s28_s14 = sadd.s32 1, %s637_s12  ;;  %s519_s15 = sadd.s32 4294967295, %s641_s13   ;;  %s641_s13 = sphi %s672_s13, %s9_s13   ;;  %s637_s12 = sphi %s670_s12, %s819_s12   ;;  %s633_s11 = sphi %s668_s11, %s818_s11   ;;  %s629_s10 = sphi %s666_s10, %s817_s10   ;;  %s625_s9 = sphi %s664_s9, %s816_s9  }
   0x4   : > { %p30_p0 = scmp.ge.s32.totalorder %s28_s14, 2  ;;  %s33_s16 = ssub.s32 0, %s637_s12 }
   0x5   : > { %s521_s17 = smin.u32 %s637_s12, %s33_s16  ;;  %p57_p1 = scmp.ne.s32.totalorder %s629_s10, %s625_s9 }
   0x6   : > { %s821_s14 = smov (%p30_p0, %s28_s14), 0  ;;  %s35_s18 = sshrl.u32 %s521_s17, 3 }
   0x7   : > { %s39_s19 = ssub.s32 0, %s821_s14  ;;  %p58_p2 = scmp.eq.s32.totalorder %s519_s15, 1 }
   0x8   : > { %s522_s20 = smin.u32 %s39_s19, %s821_s14  ;;  %s47_s24 = sadd.s32 1, %s629_s10 }
   0x9   : > { %s41_s21 = sshrl.u32 %s522_s20, 3  ;;  %p699_p3 = por %p58_p2, %p57_p1 }
   0xa   : > { %s44_s23 = ssub.s32 %s35_s18, %s41_s21  ;;  %p524_p5 = scmp.ge.s32.totalorder %s641_s13, 2 }
   0xb   : > { %p45_p4 = scmp.eq.s32.totalorder %s44_s23, 0  ;;  %s82_s26 = sand.u32 (!%p524_p5), 1, %s641_s13  }
   0xc   : > { %80 = sbr.rel (%p524_p5) target bundleno = 19 (0x13), region = 16  ;;  %s526_s27 = sshll.u32 (!%p524_p5), %s637_s12, 2 }
   0xd   : > { %s705_s25 = scalar_select %p45_p4, %s629_s10, %s47_s24  }
   0xe   : > { %s525_s28 = sshll.u32 (!%p524_p5), %s82_s26, 2  ;;  %s88_s3 = scalar_lea.vmem (!%p524_p5), %s810_s0, %s526_s27 }
   0xf   : > { %s84_s4 = scalar_lea.vmem (!%p524_p5), [#allocation1], %s525_s28 }
  0x11   : > { %v105_v0 = vld [vmem:[%s88_s3] sm:$0xf] }
  0x12   : > { %106 = vst [vmem:[%s84_s4] sm:$0xf] %v105_v0 }
  0x13 PF: > { %p527_p6 = scmp.ge.s32.totalorder %s641_s13, 1  ;;  %p123_p7 = scmp.lt.s32.totalorder %s641_s13, 3 }
  0x15   : > { %p124_p8 = pnand %p527_p6, %p123_p7 }
  0x17   : > { %127 = sbr.rel (%p124_p8) target bundleno = 352 (0x160), region = 50 }
  0x1c   : > { %s134_s5 = sand.u32 1, %s519_s15   ;;  %s144_s6 = sand.u32 1, %s625_s9   ;;  %v647_v2 = vmov 0.0  }
  0x1d   : > { %s528_s7 = sshll.u32 %s134_s5, 2  ;;  %s716_s8 = sshll.u32 %s144_s6, 1 }
  0x1e   : > { %s136_s16 = scalar_lea.vmem [#allocation1], %s528_s7  ;;  %s158_s17 = sand.u32 7, %s633_s11  }
  0x1f   : > { %v150_v1 = vld [vmem:[%s136_s16] sm:$0xf]  ;;  %s719_s18 = scalar_lea.vmem [#allocation4], %s158_s17  ;;  %s722_s19 = scalar_lea.vmem [#allocation3], %s528_s7 }
  0x20   : > { %151 = vst [vmem:[#allocation0] sm:$0xf] %v150_v1  ;;  %162 = vst [vmem:[%s719_s18] sm:$0x1] %v647_v2  ;;  %s146_s15 = scalar_lea.vmem [#allocation5], %s716_s8  ;;  %s725_s20 = smov 0  }
  0x27   : > { %v160_v3 = vld [vmem:[#allocation0] sm:$0xff] }
  0x28   : > { %161 = vst [vmem:[#allocation2] sm:$0xff] %v160_v3 }
  0x29 LB: >> { %v170_v4 = vlaneseq  ;;  %v734_v6 = vstv %s645_s20  ;;  %s197_s9 = scalar_lea.vmem [#allocation2], %s645_s20  ;;  %s233_s21 = smov [#allocation2]  ;;  %v648_v60 = vmov 1.0   ;;  %v268_v61 = vld [vmem:[%s719_s18] ss:$0 sm:$0xff]  ;;  %s645_s20 = sphi %s725_s20, %s168_s20  }
  0x2a   : >> { %s255_s23 = scalar_lea.vmem [#allocation6], %s645_s20  ;;  %s271_s24 = smov [#allocation2] }
  0x2b   : >> { %v731_v5 = vshrl.u32 %v170_v4, 7  ;;  %v249_v49 = vand.u32 127, %v170_v4  ;;  %s272_s26 = smov [#allocation6] }
  0x2d   : >> { %vm174_vm0 = vcmp.gt.s32.totalorder %v731_v5, %v734_v6  ;;  %vm175_vm1 = vcmp.lt.s32.totalorder %v731_v5, 4  ;;  %v236_v5 = vmov %v731_v5  ;;  %vm749_vm12 = vcmp.eq.s32.totalorder %v249_v49, %v734_v6 }
  0x2e   : >> { %vm176_vm2 = vmand %vm174_vm0, %vm175_vm1  ;;  %vm240_vm9 = vcmp.gt.s32.totalorder %v236_v5, %v734_v6  ;;  %vm241_vm10 = vcmp.lt.s32.totalorder %v236_v5, 4  ;;  %v275_v5 = vmov %v731_v5  ;;  %vm301_vm15 = vcmp.gt.s32.totalorder %v249_v49, %v734_v6 }
  0x2f   : >> { %v169_v7 = vld [vmem:[#allocation2] sm:$0xff]  ;;  %v198_v16 = vld [vmem:[%s197_s9] ss:$0 sm:$0xff]  ;;  %vm242_vm11 = vmand %vm240_vm9, %vm241_vm10  ;;  %vm280_vm13 = vcmp.lt.s32.totalorder %v275_v5, 4  ;;  %v292_v5 = vmov %v731_v5 }
  0x30   : >> { %v177_v8 = vsel %vm176_vm2, %v169_v7, 0.0  ;;  %v199_v17 = vand.u32 2147483647, %v198_v16  ;;  %vm224_vm8 = vcmp.lt.f32.partialorder %v198_v16, 0.0  ;;  %v237_v46 = vld [vmem:[%s233_s21] sm:$0xff]  ;;  %vm309_vm14 = vcmp.ge.s32.totalorder %v292_v5, %v734_v6 }
  0x31   : >> { %v178_v9 = vmul.f32 %v177_v8, %v177_v8  ;;  %v243_v50 = vsel %vm242_vm11, %v237_v46, 0.0  ;;  %v278_v0 = vld [vmem:[%s271_s24] sm:$0xff]  ;;  %s288_s24 = smov %s271_s24  ;;  %vm310_vm0 = vmand %vm749_vm12, %vm309_vm14 }
  0x32   : >> { %v200_v22 = vmax.f32 %v199_v17, 0.0  ;;  %s313_s27 = scalar_lea.vmem %s288_s24, %s645_s20  ;;  %s168_s20 = sadd.s32 1, %s645_s20  }
  0x33   : >> { %v179_v10 = vrot.slane %v178_v9, 4  ;;  %p165_p9 = scmp.ge.s32.totalorder %s168_s20, 3  }
  0x34   : > { %s534_s28 = sshll.u32 (%p165_p9), %s633_s11, 2 }
  0x35   : >> { %v180_v11 = vadd.f32 %v179_v10, %v178_v9  ;;  %s348_s3 = scalar_lea.vmem (%p165_p9), %s811_s1, %s534_s28 }
  0x37   : >> { %v181_v12 = vrot.slane %v180_v11, 2 }
  0x39   : >> { %v182_v13 = vadd.f32 %v181_v12, %v180_v11 }
  0x3b   : >> { %v183_v14 = vrot.slane %v182_v13, 1 }
  0x3d   : >> { %v184_v15 = vadd.f32 %v183_v14, %v182_v13  ;;  %v299_v14 = vld [vmem:[%s288_s24] sm:$0xff] }
  0x3f   : >> { %589 = vrsqrt.f32 %v184_v15  ;;  %vm187_vm3 = vcmp.eq.f32.partialorder %v184_v15, inf  ;;  %v190_v19 = vand.u32 2147483648, %v184_v15  ;;  %vm189_vm4 = vcmp.eq.f32.partialorder %v184_v15, 0.0 }
  0x4c   : >> { %v590_v18 = vpop.eup %589 }
  0x4d   : >> { %v186_v20 = vmul.f32 %v590_v18, %v184_v15 }
  0x4f   : >> { %v188_v21 = vsel %vm187_vm3, %v184_v15, %v186_v20 }
  0x50   : >> { %v191_v23 = vsel %vm189_vm4, %v190_v19, %v188_v21 }
  0x51   : >> { %v201_v24 = vand.u32 2147483647, %v191_v23 }
  0x53   : >> { %v202_v25 = vmax.f32 %v200_v22, %v201_v24 }
  0x55   : >> { %591 = vrcp.f32 %v202_v25  ;;  %vm214_vm7 = vcmp.eq.f32.partialorder %v202_v25, 0.0 }
  0x62   : >> { %v592_v26 = vpop.eup %591 }
  0x63   : >> { %v204_v27 = vmul.f32 %v592_v26, %v199_v17  ;;  %v207_v28 = vmul.f32 0.0, %v592_v26  ;;  %v211_v29 = vmul.f32 %v592_v26, %v201_v24 }
  0x65   : >> { %v205_v30 = vmul.f32 %v204_v27, %v204_v27  ;;  %v208_v31 = vmul.f32 %v207_v28, %v207_v28  ;;  %v212_v32 = vmul.f32 %v211_v29, %v211_v29 }
  0x67   : >> { %v209_v33 = vadd.f32 %v208_v31, %v205_v30 }
  0x69   : >> { %v213_v34 = vadd.f32 %v212_v32, %v209_v33 }
  0x6b   : >> { %593 = vrsqrt.f32 %v213_v34  ;;  %vm217_vm5 = vcmp.eq.f32.partialorder %v213_v34, inf  ;;  %v220_v36 = vand.u32 2147483648, %v213_v34  ;;  %vm219_vm6 = vcmp.eq.f32.partialorder %v213_v34, 0.0 }
  0x78   : >> { %v594_v35 = vpop.eup %593 }
  0x79   : >> { %v216_v37 = vmul.f32 %v594_v35, %v213_v34 }
  0x7b   : >> { %v218_v38 = vsel %vm217_vm5, %v213_v34, %v216_v37 }
  0x7c   : >> { %v221_v39 = vsel %vm219_vm6, %v220_v36, %v218_v38 }
  0x7d   : >> { %v222_v40 = vmul.f32 %v221_v39, %v202_v25 }
  0x7f   : >> { %v223_v41 = vsel %vm214_vm7, 0.0, %v222_v40 }
  0x80   : >> { %v225_v42 = vxor.u32 2147483648, %v223_v41 }
  0x82   : >> { %v226_v43 = vsel %vm224_vm8, %v223_v41, %v225_v42 }
  0x83   : >> { %v742_v44 = vsel %vm189_vm4, %v198_v16, %v226_v43  ;;  %595 = vrcp.f32 %v226_v43  ;;  %v227_v47 = vsub.f32 %v226_v43, %v198_v16 }
  0x84   : >> { %v232_v45 = vsub.f32 %v198_v16, %v742_v44 }
  0x86   : >> { %597 = vrcp.f32 %v232_v45 }
  0x90   : >> { %v596_v48 = vpop.eup %595 }
  0x91   : >> { %v229_v51 = vmul.f32 %v596_v48, %v227_v47 }
  0x93   : >> { %v598_v52 = vpop.eup %597  ;;  %v231_v56 = vsel %vm189_vm4, 0.0, %v229_v51 }
  0x94   : >> { %v245_v53 = vmul.f32 %v598_v52, %v243_v50  ;;  %v261_v58 = vsel %vm749_vm12, %v231_v56, 0.0 }
  0x96   : >> { %v246_v55 = vsel %vm189_vm4, 0.0, %v245_v53 }
  0x97   : >> { %v251_v57 = vsel %vm749_vm12, %v246_v55, 0.0 }
  0x98   : >> { %252 = vadd.xlane.f32.xlu0 %v251_v57 }
  0x9c   : >> { %262 = vadd.xlane.f32.xlu0 %v261_v58 }
 0x121   : >> { %v253_v59 = vpop.xlane.xlu0 %252 }
 0x122   : >> { %254 = vst [vmem:[#allocation6] sm:$0xff] %v253_v59 }
 0x123   : >> { %256 = vst [vmem:[%s255_s23] sm:$0x1] %v648_v60 }
 0x125   : >> { %v263_v62 = vpop.xlane.xlu0 %262 }
 0x126   : >> { %v269_v63 = vsel %vm749_vm12, %v263_v62, %v268_v61 }
 0x127   : >> { %270 = vst [vmem:[%s719_s18] sm:$0x1] %v269_v63 }
 0x12a   : >> { %v277_v1 = vld [vmem:[%s272_s26] sm:$0xff]  ;;  %s289_s26 = smov %s272_s26 }
 0x12b   : >> { %v279_v2 = vmul.f32 %v278_v0, %v277_v1  ;;  %v297_v13 = vld [vmem:[%s289_s26] sm:$0xff] }
 0x12d   : >> { %v281_v3 = vsel %vm280_vm13, %v279_v2, 0.0 }
 0x12e   : >> { %v282_v4 = vrot.slane %v281_v3, 4  ;;  %v333_v6 = vld [vmem:[#allocation4] sm:$0x3] (%p165_p9) }
 0x12f   : > { %336 = vst [vmem:[%s146_s15] sm:$0x3] (%p165_p9), %v333_v6 }
 0x130   : >> { %v283_v7 = vadd.f32 %v282_v4, %v281_v3 }
 0x132   : >> { %v284_v8 = vrot.slane %v283_v7, 2 }
 0x134   : >> { %v285_v9 = vadd.f32 %v284_v8, %v283_v7 }
 0x136   : >> { %v286_v10 = vrot.slane %v285_v9, 1 }
 0x138   : >> { %v287_v11 = vadd.f32 %v286_v10, %v285_v9 }
 0x13a   : >> { %v293_v12 = vmul.f32 %v287_v11, %v263_v62 }
 0x13c   : >> { %v298_v15 = vmul.f32 %v297_v13, %v293_v12 }
 0x13e   : >> { %v302_v16 = vsub.f32 %v299_v14, %v298_v15 }
 0x140   : >> { %v303_v17 = vsel %vm301_vm15, %v302_v16, %v299_v14 }
 0x141   : >> { %v311_v18 = vsel %vm310_vm0, %v297_v13, %v303_v17 }
 0x142   : >> { %312 = vst [vmem:[%s288_s24] sm:$0xff] %v311_v18 }
 0x147   : > { %167 = sbr.rel (!%p165_p9) target bundleno = 41 (0x29), region = 167 }
 0x149   : >> { %v314_v19 = vld [vmem:[%s313_s27] ss:$0 sm:$0xff] }
 0x14a   : >> { %v319_v20 = vsel %vm749_vm12, %v742_v44, %v314_v19 }
 0x14b   : >> { %320 = vst [vmem:[%s313_s27] sm:$0x1] %v319_v20 }
 0x14c   : > { %p385_p10 = scmp.lt.s32.totalorder (%p699_p3), %s633_s11, 0  ;;  %s386_s4 = ssub.s32 (%p699_p3), 0, %s633_s11  ;;  %v409_v22 = vld [vmem:[%s146_s15] sm:$0x3] (%p699_p3) }
 0x14d   : > { %s535_s5 = smin.u32 (%p699_p3), %s633_s11, %s386_s4 }
 0x14e   : > { %s388_s6 = sshrl.u32 (%p699_p3), %s535_s5, 3 }
 0x14f   : > { %s389_s7 = ssub.s32 (%p699_p3), 0, %s388_s6 }
 0x152   : > { %v325_v5 = vld [vmem:[#allocation2] sm:$0xf] }
 0x153   : > { %328 = vst [vmem:[%s722_s19] sm:$0xf] %v325_v5 }
 0x157   : > { %384 = sbr.rel (!%p699_p3) target bundleno = 352 (0x160), region = 91 }
 0x15a   : > { %v365_v21 = vld [vmem:[%s722_s19] sm:$0xf] }
 0x15b   : > { %366 = vst [vmem:[%s348_s3] sm:$0xf] %v365_v21 }
 0x15c   : > { %s823_s7 = smov (!%p385_p10, %s389_s7), %s388_s6 }
 0x15d   : > { %s536_s16 = sshll.u32 %s823_s7, 1 }
 0x15e   : > { %s392_s19 = scalar_lea.vmem %s812_s2, %s536_s16 }
 0x15f   : > { %410 = vst [vmem:[%s392_s19] sm:$0x3] %v409_v22 }
 0x160 PF: > { %s9_s13 = sadd.s32 1, %s641_s13   ;;  %s816_s9 = smov %s629_s10 }
 0x161   : > { %p6_p11 = scmp.ge.s32.totalorder %s9_s13, 4   ;;  %s817_s10 = smov %s705_s25 }
 0x162   : > { %s818_s11 = smov %s637_s12  ;;  %s819_s12 = smov %s821_s14 }
 0x163   :  { %8 = sbr.rel (!%p6_p11) target bundleno = 3 (0x3), region = 178 }

// kernel: custom-call.123
= control target key start
LH: loop header
LB: loop body
LE: loop exit
PB: predicated region body
PF: predicated region fallthrough
CT: control target
= control target key end

     0   :  { %s651_s9 = smov 0   ;;  %s653_s10 = smov 0   ;;  %s801_s0 = inlined_call_operand.vmem [shape: f32[2,6,3], index: 0, kind: input, shape index: {}]   ;;  %s802_s1 = inlined_call_operand.vmem [shape: f32[2,6,3], index: 1, kind: output, shape index: {0}]   ;;  %s803_s2 = inlined_call_operand.vmem [shape: f32[2,3], index: 2, kind: output, shape index: {1}]  }
   0x1   :  { %s655_s11 = smov 0   ;;  %s657_s12 = smov 0  }
   0x2   :  { %s659_s13 = smov 0  }
   0x3 LB: > { %s28_s14 = sadd.s32 1, %s624_s12  ;;  %s506_s15 = sadd.s32 4294967295, %s628_s13   ;;  %s628_s13 = sphi %s659_s13, %s9_s13   ;;  %s624_s12 = sphi %s657_s12, %s810_s12   ;;  %s620_s11 = sphi %s655_s11, %s809_s11   ;;  %s616_s10 = sphi %s653_s10, %s808_s10   ;;  %s612_s9 = sphi %s651_s9, %s807_s9  }
   0x4   : > { %p30_p0 = scmp.ge.s32.totalorder %s28_s14, 2  ;;  %s33_s16 = ssub.s32 0, %s624_s12 }
   0x5   : > { %s508_s17 = smin.u32 %s624_s12, %s33_s16  ;;  %p57_p1 = scmp.ne.s32.totalorder %s616_s10, %s612_s9 }
   0x6   : > { %s812_s14 = smov (%p30_p0, %s28_s14), 0  ;;  %s35_s18 = sshrl.u32 %s508_s17, 3 }
   0x7   : > { %s39_s19 = ssub.s32 0, %s812_s14  ;;  %p58_p2 = scmp.eq.s32.totalorder %s506_s15, 1 }
   0x8   : > { %s509_s20 = smin.u32 %s39_s19, %s812_s14  ;;  %s47_s24 = sadd.s32 1, %s616_s10 }
   0x9   : > { %s41_s21 = sshrl.u32 %s509_s20, 3  ;;  %p686_p3 = por %p58_p2, %p57_p1 }
   0xa   : > { %s44_s23 = ssub.s32 %s35_s18, %s41_s21  ;;  %p511_p5 = scmp.ge.s32.totalorder %s628_s13, 2 }
   0xb   : > { %p45_p4 = scmp.eq.s32.totalorder %s44_s23, 0  ;;  %s82_s26 = sand.u32 (!%p511_p5), 1, %s628_s13  }
   0xc   : > { %80 = sbr.rel (%p511_p5) target bundleno = 19 (0x13), region = 16  ;;  %s513_s27 = sshll.u32 (!%p511_p5), %s624_s12, 3 }
   0xd   : > { %s692_s25 = scalar_select %p45_p4, %s616_s10, %s47_s24  }
   0xe   : > { %s512_s28 = sshll.u32 (!%p511_p5), %s82_s26, 3  ;;  %s88_s3 = scalar_lea.vmem (!%p511_p5), %s801_s0, %s513_s27 }
   0xf   : > { %s84_s4 = scalar_lea.vmem (!%p511_p5), [#allocation0], %s512_s28 }
  0x11   : > { %v117_v0 = vld [vmem:[%s88_s3] sm:$0xff] }
  0x12   : > { %118 = vst [vmem:[%s84_s4] sm:$0xff] %v117_v0 }
  0x13 PF: > { %p514_p6 = scmp.ge.s32.totalorder %s628_s13, 1  ;;  %p123_p7 = scmp.lt.s32.totalorder %s628_s13, 3 }
  0x15   : > { %p124_p8 = pnand %p514_p6, %p123_p7 }
  0x17   : > { %127 = sbr.rel (%p124_p8) target bundleno = 336 (0x150), region = 54 }
  0x1c   : > { %s130_s5 = sand.u32 1, %s506_s15   ;;  %s144_s6 = sand.u32 1, %s612_s9   ;;  %v634_v2 = vmov 0.0  }
  0x1d   : > { %s515_s7 = sshll.u32 %s130_s5, 3  ;;  %s703_s8 = sshll.u32 %s144_s6, 1 }
  0x1e   : > { %s153_s16 = sand.u32 7, %s620_s11   ;;  %s132_s17 = scalar_lea.vmem [#allocation0], %s515_s7 }
  0x1f   : > { %v155_v1 = vld [vmem:[%s132_s17] sm:$0xff]  ;;  %s706_s18 = scalar_lea.vmem [#allocation1], %s515_s7  ;;  %s709_s19 = scalar_lea.vmem [#allocation2], %s153_s16 }
  0x20   : > { %156 = vst [vmem:[%s706_s18] sm:$0xff] %v155_v1  ;;  %157 = vst [vmem:[%s709_s19] sm:$0x1] %v634_v2  ;;  %s146_s15 = scalar_lea.vmem [#allocation3], %s703_s8  ;;  %s713_s20 = smov 0  }
  0x21 LB: >> { %v165_v3 = vlaneseq  ;;  %v722_v5 = vstv %s632_s20  ;;  %s192_s9 = scalar_lea.vmem %s706_s18, %s632_s20 [#allocation1]  ;;  %s250_s21 = scalar_lea.vmem [#allocation4], %s632_s20  ;;  %v635_v59 = vmov 1.0   ;;  %s632_s20 = sphi %s713_s20, %s163_s20  }
  0x22   : >> { %s267_s23 = smov [#allocation4] }
  0x23   : >> { %v719_v4 = vshrl.u32 %v165_v3, 7  ;;  %v244_v48 = vand.u32 127, %v165_v3 }
  0x25   : >> { %vm169_vm0 = vcmp.gt.s32.totalorder %v719_v4, %v722_v5  ;;  %vm170_vm1 = vcmp.lt.s32.totalorder %v719_v4, 6  ;;  %v231_v4 = vmov %v719_v4  ;;  %vm740_vm12 = vcmp.eq.s32.totalorder %v244_v48, %v722_v5 }
  0x26   : >> { %vm171_vm2 = vmand %vm169_vm0, %vm170_vm1  ;;  %vm235_vm9 = vcmp.gt.s32.totalorder %v231_v4, %v722_v5  ;;  %vm236_vm10 = vcmp.lt.s32.totalorder %v231_v4, 6  ;;  %v270_v4 = vmov %v719_v4  ;;  %vm296_vm15 = vcmp.gt.s32.totalorder %v244_v48, %v722_v5 }
  0x27   : >> { %v164_v6 = vld [vmem:[%s706_s18] sm:$0xff]  ;;  %v193_v15 = vld [vmem:[%s192_s9] ss:$0 sm:$0xff]  ;;  %s228_s18 = smov %s706_s18  ;;  %vm237_vm11 = vmand %vm235_vm9, %vm236_vm10  ;;  %vm275_vm13 = vcmp.lt.s32.totalorder %v270_v4, 6  ;;  %v287_v4 = vmov %v719_v4 }
  0x28   : >> { %v172_v7 = vsel %vm171_vm2, %v164_v6, 0.0  ;;  %v194_v16 = vand.u32 2147483647, %v193_v15  ;;  %vm219_vm8 = vcmp.lt.f32.partialorder %v193_v15, 0.0  ;;  %v232_v45 = vld [vmem:[%s228_s18] sm:$0xff]  ;;  %s266_s18 = smov %s706_s18  ;;  %vm304_vm14 = vcmp.ge.s32.totalorder %v287_v4, %v722_v5 }
  0x29   : >> { %v173_v8 = vmul.f32 %v172_v7, %v172_v7  ;;  %v238_v49 = vsel %vm237_vm11, %v232_v45, 0.0  ;;  %v263_v60 = vld [vmem:[%s709_s19] ss:$0 sm:$0xff]  ;;  %vm305_vm0 = vmand %vm740_vm12, %vm304_vm14 }
  0x2a   : >> { %v195_v21 = vmax.f32 %v194_v16, 0.0  ;;  %v273_v63 = vld [vmem:[%s266_s18] sm:$0xff]  ;;  %s283_s18 = smov %s266_s18 }
  0x2b   : >> { %v174_v9 = vrot.slane %v173_v8, 4  ;;  %s308_s24 = scalar_lea.vmem %s283_s18, %s632_s20  ;;  %s163_s20 = sadd.s32 1, %s632_s20  }
  0x2c   : >> { %p160_p9 = scmp.ge.s32.totalorder %s163_s20, 3  }
  0x2d   : >> { %v175_v10 = vadd.f32 %v174_v9, %v173_v8  ;;  %s521_s26 = sshll.u32 (%p160_p9), %s620_s11, 3 }
  0x2e   : > { %s335_s29 = scalar_lea.vmem (%p160_p9), %s802_s1, %s521_s26 }
  0x2f   : >> { %v176_v11 = vrot.slane %v175_v10, 2 }
  0x31   : >> { %v177_v12 = vadd.f32 %v176_v11, %v175_v10 }
  0x33   : >> { %v178_v13 = vrot.slane %v177_v12, 1 }
  0x35   : >> { %v179_v14 = vadd.f32 %v178_v13, %v177_v12  ;;  %v294_v13 = vld [vmem:[%s283_s18] sm:$0xff] }
  0x37   : >> { %576 = vrsqrt.f32 %v179_v14  ;;  %vm182_vm3 = vcmp.eq.f32.partialorder %v179_v14, inf  ;;  %v185_v18 = vand.u32 2147483648, %v179_v14  ;;  %vm184_vm4 = vcmp.eq.f32.partialorder %v179_v14, 0.0 }
  0x44   : >> { %v577_v17 = vpop.eup %576 }
  0x45   : >> { %v181_v19 = vmul.f32 %v577_v17, %v179_v14 }
  0x47   : >> { %v183_v20 = vsel %vm182_vm3, %v179_v14, %v181_v19 }
  0x48   : >> { %v186_v22 = vsel %vm184_vm4, %v185_v18, %v183_v20 }
  0x49   : >> { %v196_v23 = vand.u32 2147483647, %v186_v22 }
  0x4b   : >> { %v197_v24 = vmax.f32 %v195_v21, %v196_v23 }
  0x4d   : >> { %578 = vrcp.f32 %v197_v24  ;;  %vm209_vm7 = vcmp.eq.f32.partialorder %v197_v24, 0.0 }
  0x5a   : >> { %v579_v25 = vpop.eup %578 }
  0x5b   : >> { %v199_v26 = vmul.f32 %v579_v25, %v194_v16  ;;  %v202_v27 = vmul.f32 0.0, %v579_v25  ;;  %v206_v28 = vmul.f32 %v579_v25, %v196_v23 }
  0x5d   : >> { %v200_v29 = vmul.f32 %v199_v26, %v199_v26  ;;  %v203_v30 = vmul.f32 %v202_v27, %v202_v27  ;;  %v207_v31 = vmul.f32 %v206_v28, %v206_v28 }
  0x5f   : >> { %v204_v32 = vadd.f32 %v203_v30, %v200_v29 }
  0x61   : >> { %v208_v33 = vadd.f32 %v207_v31, %v204_v32 }
  0x63   : >> { %580 = vrsqrt.f32 %v208_v33  ;;  %vm212_vm5 = vcmp.eq.f32.partialorder %v208_v33, inf  ;;  %v215_v35 = vand.u32 2147483648, %v208_v33  ;;  %vm214_vm6 = vcmp.eq.f32.partialorder %v208_v33, 0.0 }
  0x70   : >> { %v581_v34 = vpop.eup %580 }
  0x71   : >> { %v211_v36 = vmul.f32 %v581_v34, %v208_v33 }
  0x73   : >> { %v213_v37 = vsel %vm212_vm5, %v208_v33, %v211_v36 }
  0x74   : >> { %v216_v38 = vsel %vm214_vm6, %v215_v35, %v213_v37 }
  0x75   : >> { %v217_v39 = vmul.f32 %v216_v38, %v197_v24 }
  0x77   : >> { %v218_v40 = vsel %vm209_vm7, 0.0, %v217_v39 }
  0x78   : >> { %v220_v41 = vxor.u32 2147483648, %v218_v40 }
  0x7a   : >> { %v221_v42 = vsel %vm219_vm8, %v218_v40, %v220_v41 }
  0x7b   : >> { %v732_v43 = vsel %vm184_vm4, %v193_v15, %v221_v42  ;;  %582 = vrcp.f32 %v221_v42  ;;  %v222_v46 = vsub.f32 %v221_v42, %v193_v15 }
  0x7c   : >> { %v227_v44 = vsub.f32 %v193_v15, %v732_v43 }
  0x7e   : >> { %584 = vrcp.f32 %v227_v44 }
  0x88   : >> { %v583_v47 = vpop.eup %582 }
  0x89   : >> { %v224_v50 = vmul.f32 %v583_v47, %v222_v46 }
  0x8b   : >> { %v585_v51 = vpop.eup %584  ;;  %v226_v55 = vsel %vm184_vm4, 0.0, %v224_v50 }
  0x8c   : >> { %v240_v52 = vmul.f32 %v585_v51, %v238_v49  ;;  %v256_v57 = vsel %vm740_vm12, %v226_v55, 0.0 }
  0x8e   : >> { %v241_v54 = vsel %vm184_vm4, 0.0, %v240_v52 }
  0x8f   : >> { %v246_v56 = vsel %vm740_vm12, %v241_v54, 0.0 }
  0x90   : >> { %247 = vadd.xlane.f32.xlu0 %v246_v56 }
  0x94   : >> { %257 = vadd.xlane.f32.xlu0 %v256_v57 }
 0x119   : >> { %v248_v58 = vpop.xlane.xlu0 %247 }
 0x11a   : >> { %249 = vst [vmem:[#allocation4] sm:$0xff] %v248_v58 }
 0x11b   : >> { %251 = vst [vmem:[%s250_s21] sm:$0x1] %v635_v59 }
 0x11d   : >> { %v258_v61 = vpop.xlane.xlu0 %257 }
 0x11e   : >> { %v264_v62 = vsel %vm740_vm12, %v258_v61, %v263_v60 }
 0x11f   : >> { %265 = vst [vmem:[%s709_s19] sm:$0x1] %v264_v62 }
 0x122   : >> { %v272_v0 = vld [vmem:[%s267_s23] sm:$0xff]  ;;  %s284_s23 = smov %s267_s23 }
 0x123   : >> { %v274_v1 = vmul.f32 %v273_v63, %v272_v0  ;;  %v292_v12 = vld [vmem:[%s284_s23] sm:$0xff] }
 0x125   : >> { %v276_v2 = vsel %vm275_vm13, %v274_v1, 0.0 }
 0x126   : >> { %v277_v3 = vrot.slane %v276_v2, 4  ;;  %v320_v4 = vld [vmem:[#allocation2] sm:$0x3] (%p160_p9) }
 0x127   : > { %323 = vst [vmem:[%s146_s15] sm:$0x3] (%p160_p9), %v320_v4 }
 0x128   : >> { %v278_v6 = vadd.f32 %v277_v3, %v276_v2 }
 0x12a   : >> { %v279_v7 = vrot.slane %v278_v6, 2 }
 0x12c   : >> { %v280_v8 = vadd.f32 %v279_v7, %v278_v6 }
 0x12e   : >> { %v281_v9 = vrot.slane %v280_v8, 1 }
 0x130   : >> { %v282_v10 = vadd.f32 %v281_v9, %v280_v8 }
 0x132   : >> { %v288_v11 = vmul.f32 %v282_v10, %v258_v61 }
 0x134   : >> { %v293_v14 = vmul.f32 %v292_v12, %v288_v11 }
 0x136   : >> { %v297_v15 = vsub.f32 %v294_v13, %v293_v14 }
 0x138   : >> { %v298_v16 = vsel %vm296_vm15, %v297_v15, %v294_v13 }
 0x139   : >> { %v306_v17 = vsel %vm305_vm0, %v292_v12, %v298_v16 }
 0x13a   : >> { %307 = vst [vmem:[%s283_s18] sm:$0xff] %v306_v17 }
 0x13f   : > { %162 = sbr.rel (!%p160_p9) target bundleno = 33 (0x21), region = 175 }
 0x141   : >> { %v309_v18 = vld [vmem:[%s308_s24] ss:$0 sm:$0xff] }
 0x142   : >> { %v314_v19 = vsel %vm740_vm12, %v732_v43, %v309_v18 }
 0x143   : >> { %315 = vst [vmem:[%s308_s24] sm:$0x1] %v314_v19 }
 0x144   : > { %p372_p10 = scmp.lt.s32.totalorder (%p686_p3), %s620_s11, 0  ;;  %s373_s30 = ssub.s32 (%p686_p3), 0, %s620_s11  ;;  %v396_v20 = vld [vmem:[%s146_s15] sm:$0x3] (%p686_p3) }
 0x145   : > { %s522_s3 = smin.u32 (%p686_p3), %s620_s11, %s373_s30 }
 0x146   : > { %s375_s4 = sshrl.u32 (%p686_p3), %s522_s3, 3 }
 0x147   : > { %371 = sbr.rel (!%p686_p3) target bundleno = 336 (0x150), region = 99  ;;  %s376_s5 = ssub.s32 (%p686_p3), 0, %s375_s4 }
 0x14a   : > { %v364_v5 = vld [vmem:[%s706_s18] sm:$0xff] }
 0x14b   : > { %365 = vst [vmem:[%s335_s29] sm:$0xff] %v364_v5 }
 0x14c   : > { %s814_s5 = smov (!%p372_p10, %s376_s5), %s375_s4 }
 0x14d   : > { %s523_s6 = sshll.u32 %s814_s5, 1 }
 0x14e   : > { %s379_s17 = scalar_lea.vmem %s803_s2, %s523_s6 }
 0x14f   : > { %397 = vst [vmem:[%s379_s17] sm:$0x3] %v396_v20 }
 0x150 PF: > { %s9_s13 = sadd.s32 1, %s628_s13   ;;  %s807_s9 = smov %s616_s10 }
 0x151   : > { %p6_p11 = scmp.ge.s32.totalorder %s9_s13, 4   ;;  %s808_s10 = smov %s692_s25 }
 0x152   : > { %s809_s11 = smov %s624_s12  ;;  %s810_s12 = smov %s812_s14 }
 0x153   :  { %8 = sbr.rel (!%p6_p11) target bundleno = 3 (0x3), region = 186 }

// kernel: aligned_l2.2
= control target key start
LH: loop header
LB: loop body
LE: loop exit
PB: predicated region body
PF: predicated region fallthrough
CT: control target
= control target key end

     0   :  { %8 = vsyncpa [#allocation3], 0  ;;  %s3109_s0 = inlined_call_operand.vmem [shape: f32[2,7], index: 0, kind: input, shape index: {}]   ;;  %s3110_s1 = inlined_call_operand.vmem [shape: f32[6,8,1152], index: 1, kind: input, shape index: {}]   ;;  %s3111_s2 = inlined_call_operand.vmem [shape: f32[6,8,1152], index: 2, kind: input, shape index: {}]   ;;  %s3112_s3 = inlined_call_operand.vmem [shape: f32[4,8,1152], index: 3, kind: output, shape index: {}]  }
   0x1   :  { %s15_s14 = sshll.u32 %s3109_s0, 4  ;;  %s16_s14 = int_to_ptr.vmem [resolvable:$true] %s15_s14 }
   0x2   :  { %s1331_s15 = scalar_lea.vmem %s16_s14, 32  ;;  %p1336_p1 = scmp.lt.s32.totalorder %s16_s14, %s16_s14 }
   0x3   :  { %p1332_p0 = scmp.ne.s32.totalorder %s16_s14, %s1331_s15  ;;  %p1337_p2 = scmp.lt.s32.totalorder %s1331_s15, %s1331_s15 }
   0x5   :  { %p1338_p3 = por %p1337_p2, %p1336_p1 }
   0x7   :  { %p1339_p4 = pnand %p1338_p3, %p1332_p0 }
   0x9   :  { %1342 = shalt.err (!%p1339_p4)
}
   0xa   :  { %s1345_s16 = smov [#allocation2]  }
   0xb   :  { %18 = dma.vmem_to_smem %s16_s14, 32, %s1345_s16, [#allocation3]  }
   0xc   :  { %1343 = dma.done.wait [#allocation3], 32  }
   0xd   :  { %1344 = vsyncadd [#allocation3], 4294967264 }
   0xe   :  { %26 = sfence }
   0xf   :  { %v1372_v0 = vld [vmem:[%s3110_s1] sm:$0xff]  ;;  %v1377_v1 = vld [vmem:[%s3110_s1 + $0x8] sm:$0xff]  ;;  %v1382_v2 = vld [vmem:[%s3110_s1 + $0x10] sm:$0xff]  ;;  %s263_s9 = sld [smem:[#allocation2]] }
  0x10   :  { %v1387_v3 = vld [vmem:[%s3110_s1 + $0x18] sm:$0xff]  ;;  %v1392_v4 = vld [vmem:[%s3110_s1 + $0x20] sm:$0xff]  ;;  %v1397_v5 = vld [vmem:[%s3110_s1 + $0x28] sm:$0xff]  ;;  %s1093_s10 = sld [smem:[#allocation2 + $0x1]] }
  0x11   :  { %v1402_v6 = vld [vmem:[%s3110_s1 + $0x30] sm:$0xff]  ;;  %v1407_v7 = vld [vmem:[%s3110_s1 + $0x38] sm:$0xff]  ;;  %v1412_v8 = vld [vmem:[%s3110_s1 + $0x40] sm:$0xff]  ;;  %s1103_s11 = sld [smem:[#allocation2 + $0x2]] }
  0x12   :  { %v1417_v9 = vld [vmem:[%s3110_s1 + $0x48] sm:$0xff]  ;;  %v1422_v10 = vld [vmem:[%s3110_s1 + $0x50] sm:$0xff]  ;;  %v1427_v11 = vld [vmem:[%s3110_s1 + $0x58] sm:$0xff]  ;;  %s1113_s12 = sld [smem:[#allocation2 + $0x3]] }
  0x13   :  { %v1432_v12 = vld [vmem:[%s3110_s1 + $0x60] sm:$0xff]  ;;  %v1437_v13 = vld [vmem:[%s3110_s1 + $0x68] sm:$0xff]  ;;  %v1442_v14 = vld [vmem:[%s3110_s1 + $0x70] sm:$0xff]  ;;  %v81_v15 = vmax.f32 %v1372_v0, %v1417_v9  ;;  %v86_v16 = vmax.f32 %v1377_v1, %v1422_v10  ;;  %v91_v17 = vmax.f32 %v1382_v2, %v1427_v11  ;;  %s1114_s13 = sld [smem:[#allocation2 + $0x4]] }
  0x14   :  { %v1453_v18 = vld [vmem:[%s3110_s1 + $0x78] sm:$0xff]  ;;  %v1458_v19 = vld [vmem:[%s3110_s1 + $0x80] sm:$0xff]  ;;  %v1463_v20 = vld [vmem:[%s3110_s1 + $0x88] sm:$0xff]  ;;  %v96_v21 = vmax.f32 %v1387_v3, %v1432_v12  ;;  %v101_v22 = vmax.f32 %v1392_v4, %v1437_v13  ;;  %v106_v23 = vmax.f32 %v1397_v5, %v1442_v14  ;;  %s1901_s14 = sld [smem:[#allocation2 + $0x5]] }
  0x15   :  { %3216 = vst [vmem:[#allocation5_spill] sm:$0xff] %v1453_v18  ;;  %3217 = vst [vmem:[#allocation6_spill] sm:$0xff] %v1458_v19  ;;  %v1474_v24 = vld [vmem:[%s3110_s1 + $0x90] sm:$0xff]  ;;  %v1479_v25 = vld [vmem:[%s3110_s1 + $0x98] sm:$0xff]  ;;  %v111_v27 = vmax.f32 %v1402_v6, %v1453_v18  ;;  %v116_v28 = vmax.f32 %v1407_v7, %v1458_v19  ;;  %v121_v29 = vmax.f32 %v1412_v8, %v1463_v20  ;;  %s1955_s15 = sld [smem:[#allocation2 + $0x80]] }
  0x16   :  { %3218 = vst [vmem:[#allocation7_spill] sm:$0xff] %v1474_v24  ;;  %3219 = vst [vmem:[#allocation8_spill] sm:$0xff] %v1479_v25  ;;  %v1484_v26 = vld [vmem:[%s3110_s1 + $0xa0] sm:$0xff]  ;;  %v1495_v30 = vld [vmem:[%s3110_s1 + $0xa8] sm:$0xff]  ;;  %v82_v33 = vmax.f32 %v81_v15, %v1474_v24  ;;  %v87_v34 = vmax.f32 %v86_v16, %v1479_v25  ;;  %s1966_s16 = sld [smem:[#allocation2 + $0x81]] }
  0x17   :  { %3220 = vst [vmem:[#allocation9_spill] sm:$0xff] %v1484_v26  ;;  %3221 = vst [vmem:[#allocation10_spill] sm:$0xff] %v1495_v30  ;;  %v1500_v31 = vld [vmem:[%s3110_s1 + $0xb0] sm:$0xff]  ;;  %v1505_v32 = vld [vmem:[%s3110_s1 + $0xb8] sm:$0xff]  ;;  %v92_v35 = vmax.f32 %v91_v17, %v1484_v26  ;;  %v97_v39 = vmax.f32 %v96_v21, %v1495_v30  ;;  %s1134_s17 = sld [smem:[#allocation2 + $0x6]] }
  0x18   :  { %3222 = vst [vmem:[#allocation11_spill] sm:$0xff] %v1500_v31  ;;  %3223 = vst [vmem:[#allocation12_spill] sm:$0xff] %v1505_v32  ;;  %v1513_v36 = vld [vmem:[%s3110_s1 + $0xc0] sm:$0xff]  ;;  %v1518_v37 = vld [vmem:[%s3110_s1 + $0xc8] sm:$0xff]  ;;  %v102_v40 = vmax.f32 %v101_v22, %v1500_v31  ;;  %v107_v41 = vmax.f32 %v106_v23, %v1505_v32  ;;  %s1982_s18 = sld [smem:[#allocation2 + $0x82]] }
  0x19   :  { %3224 = vst [vmem:[#allocation13_spill] sm:$0xff] %v1513_v36  ;;  %3225 = vst [vmem:[#allocation14_spill] sm:$0xff] %v1518_v37  ;;  %v1523_v38 = vld [vmem:[%s3110_s1 + $0xd0] sm:$0xff]  ;;  %v54_v42 = vld [vmem:[%s3110_s1 + $0xd8] sm:$0xff]  ;;  %v112_v45 = vmax.f32 %v111_v27, %v1513_v36  ;;  %v117_v46 = vmax.f32 %v116_v28, %v1518_v37  ;;  %s2034_s19 = sld [smem:[#allocation2 + $0x83]] }
  0x1a   :  { %3226 = vst [vmem:[#allocation15_spill] sm:$0xff] %v1523_v38  ;;  %v55_v43 = vld [vmem:[%s3110_s1 + $0xe0] sm:$0xff]  ;;  %v56_v44 = vld [vmem:[%s3110_s1 + $0xe8] sm:$0xff]  ;;  %v122_v47 = vmax.f32 %v121_v29, %v1523_v38  ;;  %v57_v48 = vld [vmem:[%s3110_s1 + $0xf0] sm:$0xff]  ;;  %v83_v51 = vmax.f32 %v82_v33, %v54_v42  ;;  %s2053_s0 = sld [smem:[#allocation2 + $0x84]] }
  0x1b   :  { %v58_v49 = vld [vmem:[%s3110_s1 + $0xf8] sm:$0xff]  ;;  %v59_v50 = vld [vmem:[%s3110_s1 + $0x100] sm:$0xff]  ;;  %v88_v52 = vmax.f32 %v87_v34, %v55_v43  ;;  %v93_v53 = vmax.f32 %v92_v35, %v56_v44  ;;  %v60_v54 = vld [vmem:[%s3110_s1 + $0x108] sm:$0xff]  ;;  %v98_v57 = vmax.f32 %v97_v39, %v57_v48  ;;  %s2086_s20 = sld [smem:[#allocation2 + $0x85]] }
  0x1c   :  { %v61_v55 = vld [vmem:[%s3110_s1 + $0x110] sm:$0xff]  ;;  %v62_v56 = vld [vmem:[%s3110_s1 + $0x118] sm:$0xff]  ;;  %v103_v58 = vmax.f32 %v102_v40, %v58_v49  ;;  %v108_v59 = vmax.f32 %v107_v41, %v59_v50  ;;  %v63_v60 = vld [vmem:[%s3110_s1 + $0x120] sm:$0xff]  ;;  %v113_v63 = vmax.f32 %v112_v45, %v60_v54  ;;  %s2096_s21 = sld [smem:[#allocation2 + $0x86]] }
  0x1d   :  { %v64_v61 = vld [vmem:[%s3110_s1 + $0x128] sm:$0xff]  ;;  %v65_v62 = vld [vmem:[%s3110_s1 + $0x130] sm:$0xff]  ;;  %v118_v15 = vmax.f32 %v117_v46, %v61_v55  ;;  %v123_v16 = vmax.f32 %v122_v47, %v62_v56  ;;  %v66_v17 = vld [vmem:[%s3110_s1 + $0x138] sm:$0xff]  ;;  %v84_v23 = vmax.f32 %v83_v51, %v63_v60 }
  0x1e   :  { %v67_v21 = vld [vmem:[%s3110_s1 + $0x140] sm:$0xff]  ;;  %v68_v22 = vld [vmem:[%s3110_s1 + $0x148] sm:$0xff]  ;;  %v89_v27 = vmax.f32 %v88_v52, %v64_v61  ;;  %v94_v28 = vmax.f32 %v93_v53, %v65_v62  ;;  %v69_v29 = vld [vmem:[%s3110_s1 + $0x150] sm:$0xff]  ;;  %v99_v35 = vmax.f32 %v98_v57, %v66_v17 }
  0x1f   :  { %v70_v33 = vld [vmem:[%s3110_s1 + $0x158] sm:$0xff]  ;;  %v71_v34 = vld [vmem:[%s3110_s1 + $0x160] sm:$0xff]  ;;  %v104_v39 = vmax.f32 %v103_v58, %v67_v21  ;;  %v109_v40 = vmax.f32 %v108_v59, %v68_v22  ;;  %v72_v41 = vld [vmem:[%s3110_s1 + $0x168] sm:$0xff]  ;;  %v114_v44 = vmax.f32 %v113_v63, %v69_v29 }
  0x20   :  { %v73_v42 = vld [vmem:[%s3110_s1 + $0x170] sm:$0xff]  ;;  %v74_v43 = vld [vmem:[%s3110_s1 + $0x178] sm:$0xff]  ;;  %v119_v45 = vmax.f32 %v118_v15, %v70_v33  ;;  %v124_v46 = vmax.f32 %v123_v16, %v71_v34  ;;  %v75_v47 = vld [vmem:[%s3110_s1 + $0x180] sm:$0xff]  ;;  %v85_v50 = vmax.f32 %v84_v23, %v72_v41 }
  0x21   :  { %v76_v48 = vld [vmem:[%s3110_s1 + $0x188] sm:$0xff]  ;;  %v77_v49 = vld [vmem:[%s3110_s1 + $0x190] sm:$0xff]  ;;  %v90_v51 = vmax.f32 %v89_v27, %v73_v42  ;;  %v95_v52 = vmax.f32 %v94_v28, %v74_v43  ;;  %v78_v53 = vld [vmem:[%s3110_s1 + $0x198] sm:$0xff]  ;;  %v100_v56 = vmax.f32 %v99_v35, %v75_v47 }
  0x22   :  { %v79_v54 = vld [vmem:[%s3110_s1 + $0x1a0] sm:$0xff]  ;;  %v80_v55 = vld [vmem:[%s3110_s1 + $0x1a8] sm:$0xff]  ;;  %v105_v57 = vmax.f32 %v104_v39, %v76_v48  ;;  %v110_v58 = vmax.f32 %v109_v40, %v77_v49  ;;  %v115_v59 = vmax.f32 %v114_v44, %v78_v53  ;;  %v1625_v15 = vld [vmem:[%s3111_s2 + $0x10] sm:$0xff] }
  0x23   :  { %v120_v60 = vmax.f32 %v119_v45, %v79_v54  ;;  %v125_v61 = vmax.f32 %v124_v46, %v80_v55  ;;  %v1615_v62 = vld [vmem:[%s3111_s2] sm:$0xff]  ;;  %v1620_v63 = vld [vmem:[%s3111_s2 + $0x8] sm:$0xff]  ;;  %3229 = vst [vmem:[#allocation18_spill] sm:$0xff] %v1625_v15  ;;  %v1630_v21 = vld [vmem:[%s3111_s2 + $0x18] sm:$0xff] }
  0x24   :  { %3227 = vst [vmem:[#allocation16_spill] sm:$0xff] %v1615_v62  ;;  %3228 = vst [vmem:[#allocation17_spill] sm:$0xff] %v1620_v63  ;;  %v126_v16 = vmax.f32 %v85_v50, %v105_v57  ;;  %v127_v17 = vmax.f32 %v90_v51, %v110_v58  ;;  %v1635_v22 = vld [vmem:[%s3111_s2 + $0x20] sm:$0xff]  ;;  %v1640_v23 = vld [vmem:[%s3111_s2 + $0x28] sm:$0xff]  ;;  %v128_v27 = vmax.f32 %v95_v52, %v115_v59 }
  0x25   :  { %3230 = vst [vmem:[#allocation19_spill] sm:$0xff] %v1630_v21  ;;  %3231 = vst [vmem:[#allocation20_spill] sm:$0xff] %v1635_v22  ;;  %v129_v28 = vmax.f32 %v100_v56, %v120_v60  ;;  %v1645_v29 = vld [vmem:[%s3111_s2 + $0x30] sm:$0xff]  ;;  %v1650_v33 = vld [vmem:[%s3111_s2 + $0x38] sm:$0xff] }
  0x26   :  { %3232 = vst [vmem:[#allocation21_spill] sm:$0xff] %v1640_v23  ;;  %3233 = vst [vmem:[#allocation22_spill] sm:$0xff] %v1645_v29  ;;  %v1655_v34 = vld [vmem:[%s3111_s2 + $0x40] sm:$0xff]  ;;  %v130_v35 = vmax.f32 %v126_v16, %v125_v61  ;;  %v1660_v39 = vld [vmem:[%s3111_s2 + $0x48] sm:$0xff] }
  0x27   :  { %3234 = vst [vmem:[#allocation23_spill] sm:$0xff] %v1650_v33  ;;  %3235 = vst [vmem:[#allocation24_spill] sm:$0xff] %v1655_v34  ;;  %v1665_v40 = vld [vmem:[%s3111_s2 + $0x50] sm:$0xff]  ;;  %v1670_v41 = vld [vmem:[%s3111_s2 + $0x58] sm:$0xff]  ;;  %v132_v42 = vmax.f32 %v128_v27, %v129_v28  ;;  %v199_v46 = vmax.f32 %v1615_v62, %v1660_v39 }
  0x28   :  { %3236 = vst [vmem:[#allocation25_spill] sm:$0xff] %v1660_v39  ;;  %3237 = vst [vmem:[#allocation26_spill] sm:$0xff] %v1665_v40  ;;  %v1675_v43 = vld [vmem:[%s3111_s2 + $0x60] sm:$0xff]  ;;  %v1680_v44 = vld [vmem:[%s3111_s2 + $0x68] sm:$0xff]  ;;  %v204_v47 = vmax.f32 %v1620_v63, %v1665_v40  ;;  %v209_v48 = vmax.f32 %v1625_v15, %v1670_v41  ;;  %v131_v49 = vmax.f32 %v130_v35, %v127_v17  ;;  %v1855_v40 = vstv %s263_s9 }
  0x29   :  { %3238 = vst [vmem:[#allocation27_spill] sm:$0xff] %v1670_v41  ;;  %3239 = vst [vmem:[#allocation28_spill] sm:$0xff] %v1675_v43  ;;  %v1685_v45 = vld [vmem:[%s3111_s2 + $0x70] sm:$0xff]  ;;  %v1696_v50 = vld [vmem:[%s3111_s2 + $0x78] sm:$0xff]  ;;  %v214_v53 = vmax.f32 %v1630_v21, %v1675_v43  ;;  %v219_v54 = vmax.f32 %v1635_v22, %v1680_v44 }
  0x2a   :  { %3240 = vst [vmem:[#allocation29_spill] sm:$0xff] %v1680_v44  ;;  %3241 = vst [vmem:[#allocation30_spill] sm:$0xff] %v1685_v45  ;;  %v1701_v51 = vld [vmem:[%s3111_s2 + $0x80] sm:$0xff]  ;;  %v1706_v52 = vld [vmem:[%s3111_s2 + $0x88] sm:$0xff]  ;;  %v224_v55 = vmax.f32 %v1640_v23, %v1685_v45  ;;  %v229_v59 = vmax.f32 %v1645_v29, %v1696_v50  ;;  %v133_v16 = vmax.f32 %v131_v49, %v132_v42 }
  0x2b   :  { %3242 = vst [vmem:[#allocation31_spill] sm:$0xff] %v1696_v50  ;;  %3243 = vst [vmem:[#allocation32_spill] sm:$0xff] %v1701_v51  ;;  %v1717_v56 = vld [vmem:[%s3111_s2 + $0x90] sm:$0xff]  ;;  %v1722_v57 = vld [vmem:[%s3111_s2 + $0x98] sm:$0xff]  ;;  %v234_v60 = vmax.f32 %v1650_v33, %v1701_v51  ;;  %v239_v61 = vmax.f32 %v1655_v34, %v1706_v52 }
  0x2c   :  { %3244 = vst [vmem:[#allocation33_spill] sm:$0xff] %v1706_v52  ;;  %3245 = vst [vmem:[#allocation34_spill] sm:$0xff] %v1717_v56  ;;  %v1727_v58 = vld [vmem:[%s3111_s2 + $0xa0] sm:$0xff]  ;;  %v1738_v17 = vld [vmem:[%s3111_s2 + $0xa8] sm:$0xff]  ;;  %v200_v35 = vmax.f32 %v199_v46, %v1717_v56  ;;  %v205_v52 = vmax.f32 %v204_v47, %v1722_v57  ;;  %134 = vmax.xlane.f32.xlu0 %v133_v16 }
  0x2d   :  { %3246 = vst [vmem:[#allocation35_spill] sm:$0xff] %v1722_v57  ;;  %3247 = vst [vmem:[#allocation36_spill] sm:$0xff] %v1727_v58  ;;  %v1743_v27 = vld [vmem:[%s3111_s2 + $0xb0] sm:$0xff]  ;;  %v1748_v28 = vld [vmem:[%s3111_s2 + $0xb8] sm:$0xff]  ;;  %v210_v42 = vmax.f32 %v209_v48, %v1727_v58  ;;  %v215_v46 = vmax.f32 %v214_v53, %v1738_v17 }
  0x2e   :  { %3248 = vst [vmem:[#allocation37_spill] sm:$0xff] %v1738_v17  ;;  %3249 = vst [vmem:[#allocation38_spill] sm:$0xff] %v1743_v27  ;;  %v1756_v49 = vld [vmem:[%s3111_s2 + $0xc0] sm:$0xff]  ;;  %v1761_v34 = vld [vmem:[%s3111_s2 + $0xc8] sm:$0xff]  ;;  %v220_v47 = vmax.f32 %v219_v54, %v1743_v27  ;;  %v225_v48 = vmax.f32 %v224_v55, %v1748_v28 }
  0x2f   :  { %3250 = vst [vmem:[#allocation39_spill] sm:$0xff] %v1748_v28  ;;  %3251 = vst [vmem:[#allocation40_spill] sm:$0xff] %v1756_v49  ;;  %v1766_v51 = vld [vmem:[%s3111_s2 + $0xd0] sm:$0xff]  ;;  %v172_v58 = vld [vmem:[%s3111_s2 + $0xd8] sm:$0xff]  ;;  %v230_v50 = vmax.f32 %v229_v59, %v1756_v49  ;;  %v235_v53 = vmax.f32 %v234_v60, %v1761_v34 }
  0x30   :  { %3252 = vst [vmem:[#allocation41_spill] sm:$0xff] %v1761_v34  ;;  %3253 = vst [vmem:[#allocation42_spill] sm:$0xff] %v1766_v51  ;;  %v173_v57 = vld [vmem:[%s3111_s2 + $0xe0] sm:$0xff]  ;;  %v174_v56 = vld [vmem:[%s3111_s2 + $0xe8] sm:$0xff]  ;;  %v240_v54 = vmax.f32 %v239_v61, %v1766_v51  ;;  %v201_v27 = vmax.f32 %v200_v35, %v172_v58 }
  0x31   :  { %v175_v55 = vld [vmem:[%s3111_s2 + $0xf0] sm:$0xff]  ;;  %v176_v16 = vld [vmem:[%s3111_s2 + $0xf8] sm:$0xff]  ;;  %v177_v28 = vld [vmem:[%s3111_s2 + $0x100] sm:$0xff]  ;;  %v206_v17 = vmax.f32 %v205_v52, %v173_v57  ;;  %v211_v33 = vmax.f32 %v210_v42, %v174_v56  ;;  %3254 = vst [vmem:[#allocation43_spill] sm:$0xff] %v1855_v40 }
  0x32   :  { %v178_v59 = vld [vmem:[%s3111_s2 + $0x108] sm:$0xff]  ;;  %v179_v60 = vld [vmem:[%s3111_s2 + $0x110] sm:$0xff]  ;;  %v180_v61 = vld [vmem:[%s3111_s2 + $0x118] sm:$0xff]  ;;  %v216_v51 = vmax.f32 %v215_v46, %v175_v55  ;;  %v221_v34 = vmax.f32 %v220_v47, %v176_v16  ;;  %v226_v49 = vmax.f32 %v225_v48, %v177_v28 }
  0x33   :  { %v181_v52 = vld [vmem:[%s3111_s2 + $0x120] sm:$0xff]  ;;  %v182_v56 = vld [vmem:[%s3111_s2 + $0x128] sm:$0xff]  ;;  %v183_v57 = vld [vmem:[%s3111_s2 + $0x130] sm:$0xff]  ;;  %v231_v58 = vmax.f32 %v230_v50, %v178_v59  ;;  %v236_v35 = vmax.f32 %v235_v53, %v179_v60  ;;  %v241_v42 = vmax.f32 %v240_v54, %v180_v61 }
  0x34   :  { %v184_v46 = vld [vmem:[%s3111_s2 + $0x138] sm:$0xff]  ;;  %v185_v28 = vld [vmem:[%s3111_s2 + $0x140] sm:$0xff]  ;;  %v186_v47 = vld [vmem:[%s3111_s2 + $0x148] sm:$0xff]  ;;  %v202_v48 = vmax.f32 %v201_v27, %v181_v52  ;;  %v207_v55 = vmax.f32 %v206_v17, %v182_v56  ;;  %v212_v16 = vmax.f32 %v211_v33, %v183_v57 }
  0x35   :  { %v187_v50 = vld [vmem:[%s3111_s2 + $0x150] sm:$0xff]  ;;  %v188_v53 = vld [vmem:[%s3111_s2 + $0x158] sm:$0xff]  ;;  %v189_v54 = vld [vmem:[%s3111_s2 + $0x160] sm:$0xff]  ;;  %v217_v59 = vmax.f32 %v216_v51, %v184_v46  ;;  %v222_v60 = vmax.f32 %v221_v34, %v185_v28  ;;  %v227_v61 = vmax.f32 %v226_v49, %v186_v47 }
  0x36   :  { %v190_v17 = vld [vmem:[%s3111_s2 + $0x168] sm:$0xff]  ;;  %v191_v33 = vld [vmem:[%s3111_s2 + $0x170] sm:$0xff]  ;;  %v192_v27 = vld [vmem:[%s3111_s2 + $0x178] sm:$0xff]  ;;  %v232_v52 = vmax.f32 %v231_v58, %v187_v50  ;;  %v237_v56 = vmax.f32 %v236_v35, %v188_v53  ;;  %v242_v57 = vmax.f32 %v241_v42, %v189_v54 }
  0x37   :  { %v193_v34 = vld [vmem:[%s3111_s2 + $0x180] sm:$0xff]  ;;  %v194_v51 = vld [vmem:[%s3111_s2 + $0x188] sm:$0xff]  ;;  %v195_v49 = vld [vmem:[%s3111_s2 + $0x190] sm:$0xff]  ;;  %v203_v46 = vmax.f32 %v202_v48, %v190_v17  ;;  %v208_v28 = vmax.f32 %v207_v55, %v191_v33  ;;  %v213_v47 = vmax.f32 %v212_v16, %v192_v27 }
  0x38   :  { %v196_v58 = vld [vmem:[%s3111_s2 + $0x198] sm:$0xff]  ;;  %v197_v35 = vld [vmem:[%s3111_s2 + $0x1a0] sm:$0xff]  ;;  %v198_v42 = vld [vmem:[%s3111_s2 + $0x1a8] sm:$0xff]  ;;  %v218_v50 = vmax.f32 %v217_v59, %v193_v34  ;;  %v223_v53 = vmax.f32 %v222_v60, %v194_v51  ;;  %v228_v54 = vmax.f32 %v227_v61, %v195_v49  ;;  %v1857_v59 = vstv %s1093_s10 }
  0x39   :  { %v233_v29 = vmax.f32 %v232_v52, %v196_v58  ;;  %v238_v45 = vmax.f32 %v237_v56, %v197_v35  ;;  %v243_v48 = vmax.f32 %v242_v57, %v198_v42  ;;  %3255 = vst [vmem:[#allocation44_spill] sm:$0xff] %v1857_v59  ;;  %v274_v60 = vmul.f32 %v1855_v40, %v1372_v0 }
  0x3a   :  { %v244_v55 = vmax.f32 %v203_v46, %v223_v53  ;;  %v245_v16 = vmax.f32 %v208_v28, %v228_v54  ;;  %v280_v61 = vmul.f32 %v1855_v40, %v1402_v6  ;;  %v295_v52 = vmul.f32 %v1857_v59, %v1417_v9 }
  0x3b   :  { %v246_v17 = vmax.f32 %v213_v47, %v233_v29  ;;  %v247_v33 = vmax.f32 %v218_v50, %v238_v45  ;;  %v275_v29 = vmul.f32 %v1855_v40, %v1377_v1  ;;  %v276_v45 = vmul.f32 %v1855_v40, %v1382_v2 }
  0x3c   :  { %v248_v27 = vmax.f32 %v244_v55, %v243_v48  ;;  %v296_v56 = vmul.f32 %v1857_v59, %v1422_v10  ;;  %v297_v57 = vmul.f32 %v1857_v59, %v1427_v11  ;;  %v1879_v34 = vstv %s1103_s11 }
  0x3d   :  { %v250_v44 = vmax.f32 %v246_v17, %v247_v33  ;;  %3256 = vst [vmem:[#allocation45_spill] sm:$0xff] %v1879_v34  ;;  %v298_v51 = vmul.f32 %v1857_v59, %v1432_v12  ;;  %v299_v49 = vmul.f32 %v1857_v59, %v1437_v13  ;;  %v300_v46 = vmul.f32 %v1857_v59, %v1442_v14 }
  0x3e   :  { %v249_v43 = vmax.f32 %v248_v27, %v245_v16  ;;  %v301_v28 = vmul.f32 %v1857_v59, %v1453_v18  ;;  %v281_v47 = vmul.f32 %v1855_v40, %v1407_v7  ;;  %v282_v58 = vmul.f32 %v1855_v40, %v1412_v8 }
  0x3f   :  { %v302_v35 = vmul.f32 %v1857_v59, %v1458_v19  ;;  %v303_v42 = vmul.f32 %v1857_v59, %v1463_v20  ;;  %v1897_v50 = vstv %s1113_s12  ;;  %v304_v53 = vadd.f32 %v295_v52, %v274_v60 }
  0x40   :  { %v251_v41 = vmax.f32 %v249_v43, %v250_v44  ;;  %v278_v43 = vmul.f32 %v1855_v40, %v1392_v4  ;;  %v279_v44 = vmul.f32 %v1855_v40, %v1397_v5  ;;  %3257 = vst [vmem:[#allocation46_spill] sm:$0xff] %v1897_v50  ;;  %v305_v54 = vadd.f32 %v296_v56, %v275_v29 }
  0x41   :  { %v306_v48 = vadd.f32 %v297_v57, %v276_v45  ;;  %v325_v55 = vmul.f32 %v1879_v34, %v1474_v24  ;;  %v310_v27 = vadd.f32 %v301_v28, %v280_v61  ;;  %v312_v18 = vadd.f32 %v303_v42, %v282_v58  ;;  %v3260_v58 = vld [vmem:[#allocation26_spill] sm:$0xff]  ;;  %v3261_v42 = vld [vmem:[#allocation27_spill] sm:$0xff] }
  0x42   :  { %252 = vmax.xlane.f32.xlu0 %v251_v41  ;;  %v277_v41 = vmul.f32 %v1855_v40, %v1387_v3  ;;  %v308_v17 = vadd.f32 %v299_v49, %v278_v43  ;;  %v309_v33 = vadd.f32 %v300_v46, %v279_v44  ;;  %v311_v40 = vadd.f32 %v302_v35, %v281_v47 }
  0x43   :  { %v326_v19 = vmul.f32 %v1879_v34, %v1479_v25  ;;  %v327_v59 = vmul.f32 %v1879_v34, %v1484_v26  ;;  %v328_v60 = vmul.f32 %v1879_v34, %v1495_v30  ;;  %v329_v29 = vmul.f32 %v1879_v34, %v1500_v31 }
  0x44   :  { %v307_v16 = vadd.f32 %v298_v51, %v277_v41  ;;  %v330_v45 = vmul.f32 %v1879_v34, %v1505_v32  ;;  %v1913_v41 = vstv %s1114_s13  ;;  %v331_v43 = vmul.f32 %v1879_v34, %v1513_v36 }
  0x45   :  { %3258 = vst [vmem:[#allocation47_spill] sm:$0xff] %v1913_v41  ;;  %v332_v44 = vmul.f32 %v1879_v34, %v1518_v37  ;;  %v333_v61 = vmul.f32 %v1879_v34, %v1523_v38  ;;  %v1921_v52 = vadd.f32 %v325_v55, %v304_v53  ;;  %v354_v56 = vmul.f32 %v1897_v50, %v1615_v62  ;;  %v3262_v55 = vld [vmem:[#allocation28_spill] sm:$0xff]  ;;  %v3263_v34 = vld [vmem:[#allocation29_spill] sm:$0xff]  ;;  %v3266_v62 = vld [vmem:[#allocation23_spill] sm:$0xff] }
  0x46   :  { %v355_v57 = vmul.f32 %v1897_v50, %v1620_v63  ;;  %v356_v51 = vmul.f32 %v1897_v50, %v1625_v15  ;;  %v357_v49 = vmul.f32 %v1897_v50, %v1630_v21  ;;  %v358_v46 = vmul.f32 %v1897_v50, %v1635_v22  ;;  %v3264_v22 = vld [vmem:[#allocation30_spill] sm:$0xff]  ;;  %v3267_v38 = vld [vmem:[#allocation31_spill] sm:$0xff]  ;;  %v3268_v37 = vld [vmem:[#allocation32_spill] sm:$0xff] }
  0x47   :  { %3259 = vst [vmem:[#allocation48_spill] sm:$0xff] %v1921_v52  ;;  %v359_v28 = vmul.f32 %v1897_v50, %v1640_v23  ;;  %v375_v47 = vmul.f32 %v1913_v41, %v1660_v39  ;;  %v376_v35 = vmul.f32 %v1913_v41, %v3260_v58  ;;  %v377_v53 = vmul.f32 %v1913_v41, %v3261_v42  ;;  %v3265_v63 = vld [vmem:[#allocation22_spill] sm:$0xff] }
  0x48   :  { %v378_v52 = vmul.f32 %v1913_v41, %v3262_v55  ;;  %v379_v21 = vmul.f32 %v1913_v41, %v3263_v34  ;;  %v380_v15 = vmul.f32 %v1913_v41, %v3264_v22  ;;  %v360_v23 = vmul.f32 %v1897_v50, %v3265_v63  ;;  %v3270_v34 = vld [vmem:[#allocation24_spill] sm:$0xff]  ;;  %v3271_v22 = vld [vmem:[#allocation33_spill] sm:$0xff] }
  0x49   :  { %v361_v39 = vmul.f32 %v1897_v50, %v3266_v62  ;;  %v381_v58 = vmul.f32 %v1913_v41, %v3267_v38  ;;  %v382_v42 = vmul.f32 %v1913_v41, %v3268_v37  ;;  %v1957_v55 = vadd.f32 %v326_v19, %v305_v54 }
  0x4a   :  { %v362_v36 = vmul.f32 %v1897_v50, %v3270_v34  ;;  %v383_v32 = vmul.f32 %v1913_v41, %v3271_v22  ;;  %v1964_v63 = vstv %s1901_s14  ;;  %v1968_v62 = vadd.f32 %v327_v59, %v306_v48  ;;  %v3274_v34 = vld [vmem:[#allocation34_spill] sm:$0xff]  ;;  %v3275_v22 = vld [vmem:[#allocation35_spill] sm:$0xff]  ;;  %v3276_v59 = vld [vmem:[#allocation36_spill] sm:$0xff] }
  0x4b   :  { %3269 = vst [vmem:[#allocation49_spill] sm:$0xff] %v1957_v55  ;;  %v1970_v38 = vadd.f32 %v328_v60, %v307_v16  ;;  %v384_v31 = vadd.f32 %v375_v47, %v354_v56  ;;  %v385_v37 = vadd.f32 %v376_v35, %v355_v57  ;;  %v386_v30 = vadd.f32 %v377_v53, %v356_v51  ;;  %v3277_v16 = vld [vmem:[#allocation37_spill] sm:$0xff]  ;;  %v3282_v57 = vld [vmem:[#allocation42_spill] sm:$0xff] }
  0x4c   :  { %3272 = vst [vmem:[#allocation50_spill] sm:$0xff] %v1968_v62  ;;  %v387_v26 = vadd.f32 %v378_v52, %v357_v49  ;;  %v388_v19 = vadd.f32 %v379_v21, %v358_v46  ;;  %v389_v54 = vadd.f32 %v380_v15, %v359_v28  ;;  %v390_v55 = vadd.f32 %v381_v58, %v360_v23  ;;  %v3278_v52 = vld [vmem:[#allocation38_spill] sm:$0xff]  ;;  %v3279_v21 = vld [vmem:[#allocation39_spill] sm:$0xff] }
  0x4d   :  { %3273 = vst [vmem:[#allocation51_spill] sm:$0xff] %v1970_v38  ;;  %v391_v50 = vadd.f32 %v382_v42, %v361_v39  ;;  %v405_v41 = vmul.f32 %v1964_v63, %v3274_v34  ;;  %v406_v25 = vmul.f32 %v1964_v63, %v3275_v22  ;;  %v392_v24 = vadd.f32 %v383_v32, %v362_v36  ;;  %v3280_v39 = vld [vmem:[#allocation40_spill] sm:$0xff]  ;;  %v3281_v32 = vld [vmem:[#allocation41_spill] sm:$0xff] }
  0x4e   :  { %v407_v48 = vmul.f32 %v1964_v63, %v3276_v59  ;;  %v408_v60 = vmul.f32 %v1964_v63, %v3277_v16  ;;  %v409_v15 = vmul.f32 %v1964_v63, %v3278_v52  ;;  %v410_v23 = vmul.f32 %v1964_v63, %v3279_v21 }
  0x4f   :  { %v411_v56 = vmul.f32 %v1964_v63, %v3280_v39  ;;  %v412_v36 = vmul.f32 %v1964_v63, %v3281_v32  ;;  %v413_v51 = vmul.f32 %v1964_v63, %v3282_v57  ;;  %v1992_v49 = vadd.f32 %v329_v29, %v308_v17 }
  0x50   :  { %v1994_v46 = vadd.f32 %v330_v45, %v309_v33  ;;  %v1996_v28 = vadd.f32 %v331_v43, %v310_v27  ;;  %v1998_v47 = vadd.f32 %v332_v44, %v311_v40  ;;  %v2000_v58 = vadd.f32 %v333_v61, %v312_v18  ;;  %v3300_v43 = vld [vmem:[#allocation6_spill] sm:$0xff] }
  0x51   :  { %3283 = vst [vmem:[#allocation34_spill] sm:$0xff] %v1992_v49  ;;  %v2002_v35 = vadd.f32 %v405_v41, %v384_v31  ;;  %v2004_v42 = vadd.f32 %v406_v25, %v385_v37  ;;  %v2007_v53 = vstv %s1955_s15  ;;  %v2009_v38 = vadd.f32 %v407_v48, %v386_v30  ;;  %v3303_v48 = vld [vmem:[#allocation9_spill] sm:$0xff] }
  0x52   :  { %3284 = vst [vmem:[#allocation35_spill] sm:$0xff] %v1994_v46  ;;  %3285 = vst [vmem:[#allocation36_spill] sm:$0xff] %v1996_v28  ;;  %v2011_v62 = vadd.f32 %v408_v60, %v387_v26  ;;  %v2013_v17 = vadd.f32 %v409_v15, %v388_v19  ;;  %v2016_v33 = vstv %s1966_s16  ;;  %v2018_v27 = vadd.f32 %v410_v23, %v389_v54  ;;  %v3302_v54 = vld [vmem:[#allocation8_spill] sm:$0xff]  ;;  %v3304_v15 = vld [vmem:[#allocation10_spill] sm:$0xff] }
  0x53   :  { %3286 = vst [vmem:[#allocation37_spill] sm:$0xff] %v1998_v47  ;;  %3287 = vst [vmem:[#allocation38_spill] sm:$0xff] %v2000_v58  ;;  %v2020_v40 = vadd.f32 %v411_v56, %v390_v55  ;;  %v2022_v18 = vadd.f32 %v412_v36, %v391_v50  ;;  %v2024_v31 = vadd.f32 %v413_v51, %v392_v24  ;;  %v2026_v25 = vstv %s1134_s17 }
  0x54   :  { %3288 = vst [vmem:[#allocation39_spill] sm:$0xff] %v2002_v35  ;;  %3289 = vst [vmem:[#allocation40_spill] sm:$0xff] %v2004_v42  ;;  %v481_v30 = vmul.f32 %v2007_v53, %v1372_v0  ;;  %v482_v26 = vmul.f32 %v2007_v53, %v1377_v1  ;;  %v483_v37 = vmul.f32 %v2007_v53, %v1382_v2  ;;  %v2051_v41 = vstv %s1982_s18 }
  0x55   :  { %3290 = vst [vmem:[#allocation41_spill] sm:$0xff] %v2009_v38  ;;  %3291 = vst [vmem:[#allocation42_spill] sm:$0xff] %v2011_v62  ;;  %v484_v29 = vmul.f32 %v2007_v53, %v1387_v3  ;;  %v501_v24 = vmul.f32 %v2016_v33, %v1417_v9  ;;  %v502_v50 = vmul.f32 %v2016_v33, %v1422_v10 }
  0x56   :  { %3292 = vst [vmem:[#allocation52_spill] sm:$0xff] %v2013_v17  ;;  %3293 = vst [vmem:[#allocation53_spill] sm:$0xff] %v2018_v27  ;;  %v503_v0 = vmul.f32 %v2016_v33, %v1427_v11  ;;  %v485_v1 = vmul.f32 %v2007_v53, %v1392_v4  ;;  %v486_v2 = vmul.f32 %v2007_v53, %v1397_v5  ;;  %v3299_v11 = vld [vmem:[#allocation5_spill] sm:$0xff]  ;;  %v2154_v27 = vstv %s2086_s20 }
  0x57   :  { %3294 = vst [vmem:[#allocation54_spill] sm:$0xff] %v2020_v40  ;;  %3295 = vst [vmem:[#allocation55_spill] sm:$0xff] %v2022_v18  ;;  %v504_v45 = vmul.f32 %v2016_v33, %v1432_v12  ;;  %v487_v3 = vmul.f32 %v2007_v53, %v1402_v6  ;;  %v488_v9 = vmul.f32 %v2007_v53, %v1407_v7 }
  0x58   :  { %3296 = vst [vmem:[#allocation56_spill] sm:$0xff] %v2024_v31  ;;  %3297 = vst [vmem:[#allocation57_spill] sm:$0xff] %v2026_v25  ;;  %v505_v10 = vmul.f32 %v2016_v33, %v1437_v13  ;;  %v506_v4 = vmul.f32 %v2016_v33, %v1442_v14  ;;  %v489_v5 = vmul.f32 %v2007_v53, %v1412_v8  ;;  %v3301_v13 = vld [vmem:[#allocation7_spill] sm:$0xff] }
  0x59   :  { %3298 = vst [vmem:[#allocation58_spill] sm:$0xff] %v2051_v41  ;;  %v507_v12 = vmul.f32 %v2016_v33, %v3299_v11  ;;  %v508_v44 = vmul.f32 %v2016_v33, %v3300_v43  ;;  %v509_v6 = vmul.f32 %v2016_v33, %v1463_v20  ;;  %v510_v7 = vadd.f32 %v501_v24, %v481_v30  ;;  %v3305_v20 = vld [vmem:[#allocation11_spill] sm:$0xff]  ;;  %v3306_v30 = vld [vmem:[#allocation12_spill] sm:$0xff]  ;;  %v3309_v11 = vld [vmem:[#allocation14_spill] sm:$0xff] }
  0x5a   :  { %v511_v61 = vadd.f32 %v502_v50, %v482_v26  ;;  %v512_v55 = vadd.f32 %v503_v0, %v483_v37  ;;  %v530_v19 = vmul.f32 %v2051_v41, %v3301_v13  ;;  %v513_v14 = vadd.f32 %v504_v45, %v484_v29  ;;  %v3308_v0 = vld [vmem:[#allocation13_spill] sm:$0xff] }
  0x5b   :  { %v531_v8 = vmul.f32 %v2051_v41, %v3302_v54  ;;  %v532_v60 = vmul.f32 %v2051_v41, %v3303_v48  ;;  %v533_v23 = vmul.f32 %v2051_v41, %v3304_v15  ;;  %v514_v56 = vadd.f32 %v505_v10, %v485_v1  ;;  %v3319_v54 = vld [vmem:[#allocation17_spill] sm:$0xff] }
  0x5c   :  { %v515_v36 = vadd.f32 %v506_v4, %v486_v2  ;;  %v534_v51 = vmul.f32 %v2051_v41, %v3305_v20  ;;  %v535_v26 = vmul.f32 %v2051_v41, %v3306_v30  ;;  %v516_v37 = vadd.f32 %v507_v12, %v487_v3  ;;  %v3310_v2 = vld [vmem:[#allocation15_spill] sm:$0xff] }
  0x5d   :  { %v517_v29 = vadd.f32 %v508_v44, %v488_v9  ;;  %v518_v24 = vadd.f32 %v509_v6, %v489_v5  ;;  %v2084_v50 = vstv %s2034_s19  ;;  %v536_v45 = vmul.f32 %v2051_v41, %v3308_v0  ;;  %v3318_v6 = vld [vmem:[#allocation16_spill] sm:$0xff] }
  0x5e   :  { %3307 = vst [vmem:[#allocation5_spill] sm:$0xff] %v2084_v50  ;;  %v537_v1 = vmul.f32 %v2051_v41, %v3309_v11  ;;  %v538_v10 = vmul.f32 %v2051_v41, %v3310_v2  ;;  %v2094_v4 = vadd.f32 %v530_v19, %v510_v7  ;;  %v2098_v3 = vadd.f32 %v531_v8, %v511_v61  ;;  %v3320_v19 = vld [vmem:[#allocation18_spill] sm:$0xff]  ;;  %v3321_v8 = vld [vmem:[#allocation19_spill] sm:$0xff]  ;;  %v3328_v11 = vld [vmem:[#allocation28_spill] sm:$0xff] }
  0x5f   :  { %v2100_v9 = vadd.f32 %v532_v60, %v512_v55  ;;  %v2102_v5 = vadd.f32 %v533_v23, %v513_v14  ;;  %v2105_v12 = vstv %s2053_s0  ;;  %v2107_v43 = vadd.f32 %v534_v51, %v514_v56  ;;  %v3322_v14 = vld [vmem:[#allocation20_spill] sm:$0xff]  ;;  %v3323_v60 = vld [vmem:[#allocation21_spill] sm:$0xff]  ;;  %v3324_v23 = vld [vmem:[#allocation22_spill] sm:$0xff]  ;;  %3339 = vst [vmem:[#allocation16_spill] sm:$0xff] %v2154_v27 }
  0x60   :  { %3311 = vst [vmem:[#allocation6_spill] sm:$0xff] %v2094_v4  ;;  %3312 = vst [vmem:[#allocation7_spill] sm:$0xff] %v2098_v3  ;;  %v2109_v44 = vadd.f32 %v535_v26, %v515_v36  ;;  %v559_v13 = vmul.f32 %v2084_v50, %v3318_v6  ;;  %v560_v7 = vmul.f32 %v2084_v50, %v3319_v54  ;;  %v3325_v36 = vld [vmem:[#allocation25_spill] sm:$0xff]  ;;  %v3326_v51 = vld [vmem:[#allocation26_spill] sm:$0xff] }
  0x61   :  { %3313 = vst [vmem:[#allocation8_spill] sm:$0xff] %v2100_v9  ;;  %3314 = vst [vmem:[#allocation9_spill] sm:$0xff] %v2102_v5  ;;  %v561_v61 = vmul.f32 %v2084_v50, %v3320_v19  ;;  %v562_v55 = vmul.f32 %v2084_v50, %v3321_v8  ;;  %v563_v48 = vmul.f32 %v2084_v50, %v3322_v14  ;;  %v3327_v26 = vld [vmem:[#allocation27_spill] sm:$0xff]  ;;  %v3329_v6 = vld [vmem:[#allocation29_spill] sm:$0xff] }
  0x62   :  { %3315 = vst [vmem:[#allocation10_spill] sm:$0xff] %v2105_v12  ;;  %3316 = vst [vmem:[#allocation11_spill] sm:$0xff] %v2107_v43  ;;  %v564_v15 = vmul.f32 %v2084_v50, %v3323_v60  ;;  %v565_v56 = vmul.f32 %v2084_v50, %v3324_v23  ;;  %v579_v20 = vmul.f32 %v2105_v12, %v3325_v36  ;;  %v3330_v19 = vld [vmem:[#allocation30_spill] sm:$0xff]  ;;  %v3331_v14 = vld [vmem:[#allocation31_spill] sm:$0xff] }
  0x63   :  { %3317 = vst [vmem:[#allocation12_spill] sm:$0xff] %v2109_v44  ;;  %v580_v30 = vmul.f32 %v2105_v12, %v3326_v51  ;;  %v581_v0 = vmul.f32 %v2105_v12, %v3327_v26  ;;  %v582_v2 = vmul.f32 %v2105_v12, %v3328_v11  ;;  %v583_v54 = vmul.f32 %v2105_v12, %v3329_v6  ;;  %v3332_v23 = vld [vmem:[#allocation23_spill] sm:$0xff]  ;;  %v3333_v51 = vld [vmem:[#allocation24_spill] sm:$0xff]  ;;  %v3335_v11 = vld [vmem:[#allocation33_spill] sm:$0xff] }
  0x64   :  { %v584_v8 = vmul.f32 %v2105_v12, %v3330_v19  ;;  %v585_v60 = vmul.f32 %v2105_v12, %v3331_v14  ;;  %v566_v36 = vmul.f32 %v2084_v50, %v3332_v23  ;;  %v567_v25 = vmul.f32 %v2084_v50, %v3333_v51  ;;  %v3334_v26 = vld [vmem:[#allocation32_spill] sm:$0xff]  ;;  %v2316_v50 = vld [vmem:[%s3110_s1 + $0x168] sm:$0xff]  ;;  %v2321_v41 = vld [vmem:[%s3110_s1 + $0x170] sm:$0xff] }
  0x65   :  { %v586_v31 = vmul.f32 %v2105_v12, %v3334_v26  ;;  %v587_v18 = vmul.f32 %v2105_v12, %v3335_v11  ;;  %v2147_v40 = vadd.f32 %v536_v45, %v516_v37  ;;  %v2149_v6 = vadd.f32 %v537_v1, %v517_v29  ;;  %v2159_v14 = vld [vmem:[%s3110_s1 + $0xd8] sm:$0xff]  ;;  %v2167_v37 = vld [vmem:[%s3110_s1 + $0xe0] sm:$0xff]  ;;  %v2172_v29 = vld [vmem:[%s3110_s1 + $0xe8] sm:$0xff] }
  0x66   :  { %v2151_v19 = vadd.f32 %v538_v10, %v518_v24  ;;  %v588_v23 = vadd.f32 %v579_v20, %v559_v13  ;;  %v589_v51 = vadd.f32 %v580_v30, %v560_v7  ;;  %v590_v17 = vadd.f32 %v581_v0, %v561_v61  ;;  %v2177_v24 = vld [vmem:[%s3110_s1 + $0xf0] sm:$0xff]  ;;  %v2190_v7 = vld [vmem:[%s3110_s1 + $0xf8] sm:$0xff]  ;;  %v2195_v61 = vld [vmem:[%s3110_s1 + $0x100] sm:$0xff] }
  0x67   :  { %3336 = vst [vmem:[#allocation13_spill] sm:$0xff] %v2147_v40  ;;  %3337 = vst [vmem:[#allocation14_spill] sm:$0xff] %v2149_v6  ;;  %v2162_v26 = vstv %s2096_s21  ;;  %v2179_v45 = vadd.f32 %v582_v2, %v562_v55  ;;  %v2181_v1 = vadd.f32 %v583_v54, %v563_v48  ;;  %v2183_v10 = vadd.f32 %v584_v8, %v564_v15  ;;  %v2200_v55 = vld [vmem:[%s3110_s1 + $0x108] sm:$0xff]  ;;  %v2213_v30 = vld [vmem:[%s3110_s1 + $0x110] sm:$0xff] }
  0x68   :  { %3338 = vst [vmem:[#allocation15_spill] sm:$0xff] %v2151_v19  ;;  %3340 = vst [vmem:[#allocation17_spill] sm:$0xff] %v2162_v26  ;;  %v2185_v13 = vadd.f32 %v585_v60, %v565_v56  ;;  %v2202_v48 = vadd.f32 %v586_v31, %v566_v36  ;;  %v2204_v15 = vadd.f32 %v587_v18, %v567_v25  ;;  %v2218_v0 = vld [vmem:[%s3110_s1 + $0x120] sm:$0xff]  ;;  %v2223_v18 = vld [vmem:[%s3110_s1 + $0x128] sm:$0xff] }
  0x69   :  { %v608_v56 = vmul.f32 %v2154_v27, %v3274_v34  ;;  %v609_v20 = vmul.f32 %v2154_v27, %v3275_v22  ;;  %v610_v34 = vmul.f32 %v2154_v27, %v3276_v59  ;;  %v611_v22 = vmul.f32 %v2154_v27, %v3277_v16  ;;  %v2236_v2 = vld [vmem:[%s3110_s1 + $0x130] sm:$0xff]  ;;  %v2241_v54 = vld [vmem:[%s3110_s1 + $0x138] sm:$0xff]  ;;  %v2246_v59 = vld [vmem:[%s3110_s1 + $0x140] sm:$0xff] }
  0x6a   :  { %v612_v31 = vmul.f32 %v2154_v27, %v3278_v52  ;;  %v613_v25 = vmul.f32 %v2154_v27, %v3279_v21  ;;  %v3341_v16 = vld [vmem:[#allocation43_spill] sm:$0xff]  ;;  %v2259_v36 = vld [vmem:[%s3110_s1 + $0x148] sm:$0xff]  ;;  %v2269_v26 = vld [vmem:[%s3110_s1 + $0x158] sm:$0xff]  ;;  %v614_v28 = vmul.f32 %v2154_v27, %v3280_v39  ;;  %v615_v46 = vmul.f32 %v2154_v27, %v3281_v32 }
  0x6b   :  { %v686_v52 = vmul.f32 %v2159_v14, %v3341_v16  ;;  %v687_v21 = vmul.f32 %v2167_v37, %v3341_v16  ;;  %v688_v8 = vmul.f32 %v2172_v29, %v3341_v16  ;;  %v689_v60 = vmul.f32 %v2177_v24, %v3341_v16  ;;  %v2264_v11 = vld [vmem:[%s3110_s1 + $0x150] sm:$0xff]  ;;  %3342 = vst [vmem:[#allocation18_spill] sm:$0xff] %v2269_v26  ;;  %v2282_v19 = vld [vmem:[%s3110_s1 + $0x118] sm:$0xff]  ;;  %v2287_v6 = vld [vmem:[%s3110_s1 + $0x160] sm:$0xff] }
  0x6c   :  { %v690_v62 = vmul.f32 %v2190_v7, %v3341_v16  ;;  %v691_v38 = vmul.f32 %v2195_v61, %v3341_v16  ;;  %v692_v42 = vmul.f32 %v2200_v55, %v3341_v16  ;;  %v693_v35 = vmul.f32 %v2213_v30, %v3341_v16  ;;  %v3343_v40 = vld [vmem:[#allocation44_spill] sm:$0xff] }
  0x6d   :  { %v707_v44 = vmul.f32 %v2218_v0, %v3343_v40  ;;  %v708_v43 = vmul.f32 %v2223_v18, %v3343_v40  ;;  %v709_v5 = vmul.f32 %v2236_v2, %v3343_v40  ;;  %v710_v9 = vmul.f32 %v2241_v54, %v3343_v40 }
  0x6e   :  { %v711_v3 = vmul.f32 %v2246_v59, %v3343_v40  ;;  %v712_v4 = vmul.f32 %v2259_v36, %v3343_v40  ;;  %v713_v58 = vmul.f32 %v2264_v11, %v3343_v40  ;;  %v714_v47 = vmul.f32 %v2269_v26, %v3343_v40 }
  0x6f   :  { %v616_v49 = vmul.f32 %v2154_v27, %v3282_v57  ;;  %v2311_v12 = vadd.f32 %v608_v56, %v588_v23  ;;  %v2323_v26 = vadd.f32 %v609_v20, %v589_v51  ;;  %v2325_v39 = vadd.f32 %v610_v34, %v590_v17  ;;  %v2334_v23 = vld [vmem:[%s3110_s1 + $0x178] sm:$0xff]  ;;  %v2339_v56 = vld [vmem:[%s3110_s1 + $0x180] sm:$0xff]  ;;  %v2344_v17 = vld [vmem:[%s3110_s1 + $0x188] sm:$0xff] }
  0x70   :  { %v694_v32 = vmul.f32 %v2282_v19, %v3341_v16  ;;  %v715_v57 = vmul.f32 %v2287_v6, %v3343_v40  ;;  %v716_v51 = vadd.f32 %v707_v44, %v686_v52  ;;  %v717_v20 = vadd.f32 %v708_v43, %v687_v21  ;;  %v2349_v40 = vld [vmem:[%s3110_s1 + $0x190] sm:$0xff]  ;;  %v3350_v52 = vld [vmem:[#allocation45_spill] sm:$0xff] }
  0x71   :  { %3344 = vst [vmem:[#allocation19_spill] sm:$0xff] %v2311_v12  ;;  %3345 = vst [vmem:[#allocation20_spill] sm:$0xff] %v2323_v26  ;;  %v718_v34 = vadd.f32 %v709_v5, %v688_v8  ;;  %v719_v16 = vadd.f32 %v710_v9, %v689_v60  ;;  %v2359_v26 = vld [vmem:[%s3110_s1 + $0x1a0] sm:$0xff]  ;;  %v720_v12 = vadd.f32 %v711_v3, %v690_v62  ;;  %v2364_v9 = vld [vmem:[%s3110_s1 + $0x1a8] sm:$0xff] }
  0x72   :  { %3346 = vst [vmem:[#allocation21_spill] sm:$0xff] %v2325_v39  ;;  %3347 = vst [vmem:[#allocation22_spill] sm:$0xff] %v2349_v40  ;;  %v2354_v39 = vld [vmem:[%s3110_s1 + $0x198] sm:$0xff]  ;;  %v721_v44 = vadd.f32 %v712_v4, %v691_v38  ;;  %v722_v43 = vadd.f32 %v713_v58, %v692_v42  ;;  %v723_v5 = vadd.f32 %v714_v47, %v693_v35 }
  0x73   :  { %3348 = vst [vmem:[#allocation25_spill] sm:$0xff] %v2359_v26  ;;  %3349 = vst [vmem:[#allocation26_spill] sm:$0xff] %v2364_v9  ;;  %v737_v21 = vmul.f32 %v2316_v50, %v3350_v52  ;;  %v738_v8 = vmul.f32 %v2321_v41, %v3350_v52  ;;  %v739_v60 = vmul.f32 %v2334_v23, %v3350_v52 }
  0x74   :  { %v740_v62 = vmul.f32 %v2339_v56, %v3350_v52  ;;  %v741_v38 = vmul.f32 %v2344_v17, %v3350_v52  ;;  %v742_v47 = vmul.f32 %v2349_v40, %v3350_v52  ;;  %v743_v58 = vmul.f32 %v2354_v39, %v3350_v52  ;;  %v2397_v40 = vld [vmem:[%s3111_s2 + $0xd8] sm:$0xff] }
  0x75   :  { %v744_v35 = vmul.f32 %v2359_v26, %v3350_v52  ;;  %v2383_v42 = vadd.f32 %v611_v22, %v2179_v45  ;;  %v2386_v4 = vadd.f32 %v612_v31, %v2181_v1  ;;  %v2389_v3 = vadd.f32 %v613_v25, %v2183_v10  ;;  %v2402_v26 = vld [vmem:[%s3111_s2 + $0xe0] sm:$0xff]  ;;  %v2407_v45 = vld [vmem:[%s3111_s2 + $0xe8] sm:$0xff]  ;;  %v2424_v22 = vld [vmem:[%s3111_s2 + $0xf0] sm:$0xff] }
  0x76   :  { %v2392_v27 = vadd.f32 %v614_v28, %v2185_v13  ;;  %3355 = vst [vmem:[#allocation31_spill] sm:$0xff] %v2407_v45  ;;  %v2410_v1 = vadd.f32 %v615_v46, %v2202_v48  ;;  %v2413_v28 = vadd.f32 %v616_v49, %v2204_v15  ;;  %v2415_v10 = vadd.f32 %v715_v57, %v694_v32  ;;  %v2429_v31 = vld [vmem:[%s3111_s2 + $0xf8] sm:$0xff]  ;;  %v2434_v49 = vld [vmem:[%s3111_s2 + $0x100] sm:$0xff]  ;;  %v2452_v57 = vld [vmem:[%s3111_s2 + $0x128] sm:$0xff] }
  0x77   :  { %3351 = vst [vmem:[#allocation27_spill] sm:$0xff] %v2383_v42  ;;  %3352 = vst [vmem:[#allocation28_spill] sm:$0xff] %v2386_v4  ;;  %v2419_v13 = vmul.f32 %v2364_v9, %v3350_v52  ;;  %v2436_v46 = vadd.f32 %v737_v21, %v716_v51  ;;  %v2438_v48 = vadd.f32 %v738_v8, %v717_v20  ;;  %v2447_v32 = vld [vmem:[%s3111_s2 + $0x120] sm:$0xff]  ;;  %v2457_v51 = vld [vmem:[%s3111_s2 + $0x130] sm:$0xff] }
  0x78   :  { %3353 = vst [vmem:[#allocation29_spill] sm:$0xff] %v2389_v3  ;;  %3354 = vst [vmem:[#allocation30_spill] sm:$0xff] %v2392_v27  ;;  %v2440_v15 = vadd.f32 %v739_v60, %v718_v34  ;;  %v2442_v25 = vadd.f32 %v740_v62, %v719_v16  ;;  %v2459_v20 = vadd.f32 %v741_v38, %v720_v12  ;;  %v2470_v21 = vld [vmem:[%s3111_s2 + $0x108] sm:$0xff]  ;;  %v2475_v8 = vld [vmem:[%s3111_s2 + $0x138] sm:$0xff] }
  0x79   :  { %3356 = vst [vmem:[#allocation23_spill] sm:$0xff] %v2410_v1  ;;  %3357 = vst [vmem:[#allocation24_spill] sm:$0xff] %v2413_v28  ;;  %v2461_v34 = vadd.f32 %v742_v47, %v721_v44  ;;  %v2463_v16 = vadd.f32 %v743_v58, %v722_v43  ;;  %v2465_v52 = vadd.f32 %v744_v35, %v723_v5  ;;  %v2480_v12 = vld [vmem:[%s3111_s2 + $0x140] sm:$0xff]  ;;  %v2485_v43 = vld [vmem:[%s3111_s2 + $0x110] sm:$0xff] }
  0x7a   :  { %3358 = vst [vmem:[#allocation32_spill] sm:$0xff] %v2424_v22  ;;  %3359 = vst [vmem:[#allocation33_spill] sm:$0xff] %v2429_v31  ;;  %v2490_v5 = vld [vmem:[%s3111_s2 + $0x118] sm:$0xff]  ;;  %v3377_v60 = vld [vmem:[#allocation46_spill] sm:$0xff] }
  0x7b   :  { %3360 = vst [vmem:[#allocation43_spill] sm:$0xff] %v2434_v49  ;;  %3361 = vst [vmem:[#allocation44_spill] sm:$0xff] %v2436_v46  ;;  %v767_v62 = vmul.f32 %v2397_v40, %v3377_v60  ;;  %v768_v38 = vmul.f32 %v2402_v26, %v3377_v60  ;;  %v769_v47 = vmul.f32 %v2407_v45, %v3377_v60  ;;  %v2503_v35 = vld [vmem:[%s3111_s2 + $0x148] sm:$0xff]  ;;  %v2508_v1 = vld [vmem:[%s3111_s2 + $0x150] sm:$0xff] }
  0x7c   :  { %3362 = vst [vmem:[#allocation45_spill] sm:$0xff] %v2438_v48  ;;  %3363 = vst [vmem:[#allocation59_spill] sm:$0xff] %v2440_v15  ;;  %v770_v58 = vmul.f32 %v2424_v22, %v3377_v60  ;;  %v2513_v27 = vld [vmem:[%s3111_s2 + $0x158] sm:$0xff]  ;;  %v2518_v3 = vld [vmem:[%s3111_s2 + $0x160] sm:$0xff]  ;;  %v773_v46 = vmul.f32 %v2470_v21, %v3377_v60  ;;  %v774_v9 = vmul.f32 %v2485_v43, %v3377_v60 }
  0x7d   :  { %3364 = vst [vmem:[#allocation60_spill] sm:$0xff] %v2442_v25  ;;  %3365 = vst [vmem:[#allocation61_spill] sm:$0xff] %v2447_v32  ;;  %v3382_v4 = vld [vmem:[#allocation47_spill] sm:$0xff]  ;;  %v2586_v22 = vld [vmem:[%s3111_s2 + $0x1a0] sm:$0xff] }
  0x7e   :  { %3366 = vst [vmem:[#allocation62_spill] sm:$0xff] %v2452_v57  ;;  %3367 = vst [vmem:[#allocation63_spill] sm:$0xff] %v2457_v51  ;;  %v788_v42 = vmul.f32 %v2447_v32, %v3382_v4  ;;  %v791_v25 = vmul.f32 %v2475_v8, %v3382_v4  ;;  %v792_v15 = vmul.f32 %v2480_v12, %v3382_v4  ;;  %v2566_v32 = vld [vmem:[%s3111_s2 + $0x180] sm:$0xff] }
  0x7f   :  { %3368 = vst [vmem:[#allocation64_spill] sm:$0xff] %v2459_v20  ;;  %3369 = vst [vmem:[#allocation65_spill] sm:$0xff] %v2461_v34  ;;  %v771_v34 = vmul.f32 %v2429_v31, %v3377_v60  ;;  %v772_v20 = vmul.f32 %v2434_v49, %v3377_v60  ;;  %v2576_v49 = vld [vmem:[%s3111_s2 + $0x190] sm:$0xff]  ;;  %v2581_v31 = vld [vmem:[%s3111_s2 + $0x198] sm:$0xff] }
  0x80   :  { %3370 = vst [vmem:[#allocation66_spill] sm:$0xff] %v2463_v16  ;;  %3371 = vst [vmem:[#allocation67_spill] sm:$0xff] %v2465_v52  ;;  %v789_v52 = vmul.f32 %v2452_v57, %v3382_v4  ;;  %v790_v16 = vmul.f32 %v2457_v51, %v3382_v4  ;;  %v775_v51 = vmul.f32 %v2490_v5, %v3377_v60  ;;  %v2543_v57 = vld [vmem:[%s3111_s2 + $0x168] sm:$0xff] }
  0x81   :  { %3372 = vst [vmem:[#allocation68_spill] sm:$0xff] %v2470_v21  ;;  %3373 = vst [vmem:[#allocation69_spill] sm:$0xff] %v2475_v8  ;;  %v2548_v8 = vld [vmem:[%s3111_s2 + $0x170] sm:$0xff]  ;;  %v796_v60 = vmul.f32 %v2518_v3, %v3382_v4 }
  0x82   :  { %3374 = vst [vmem:[#allocation70_spill] sm:$0xff] %v2480_v12  ;;  %3375 = vst [vmem:[#allocation71_spill] sm:$0xff] %v2485_v43  ;;  %v795_v12 = vmul.f32 %v2513_v27, %v3382_v4  ;;  %v798_v43 = vadd.f32 %v789_v52, %v768_v38  ;;  %v799_v21 = vadd.f32 %v790_v16, %v769_v47 }
  0x83   :  { %3376 = vst [vmem:[#allocation72_spill] sm:$0xff] %v2490_v5  ;;  %3378 = vst [vmem:[#allocation46_spill] sm:$0xff] %v2503_v35  ;;  %v2561_v5 = vld [vmem:[%s3111_s2 + $0x178] sm:$0xff]  ;;  %v821_v52 = vmul.f32 %v2566_v32, %v1964_v63  ;;  %v2605_v38 = vadd.f32 %v2419_v13, %v2415_v10 }
  0x84   :  { %3379 = vst [vmem:[#allocation73_spill] sm:$0xff] %v2508_v1  ;;  %3380 = vst [vmem:[#allocation74_spill] sm:$0xff] %v2513_v27  ;;  %v797_v27 = vadd.f32 %v788_v42, %v767_v62  ;;  %v818_v42 = vmul.f32 %v2543_v57, %v1964_v63  ;;  %v820_v16 = vmul.f32 %v2561_v5, %v1964_v63 }
  0x85   :  { %3381 = vst [vmem:[#allocation75_spill] sm:$0xff] %v2518_v3  ;;  %3383 = vst [vmem:[#allocation47_spill] sm:$0xff] %v2543_v57  ;;  %v801_v3 = vadd.f32 %v792_v15, %v771_v34  ;;  %v819_v15 = vmul.f32 %v2548_v8, %v1964_v63  ;;  %v2595_v34 = vld [vmem:[%s3111_s2 + $0x1a8] sm:$0xff] }
  0x86   :  { %3384 = vst [vmem:[#allocation76_spill] sm:$0xff] %v2548_v8  ;;  %3385 = vst [vmem:[#allocation77_spill] sm:$0xff] %v2561_v5  ;;  %v823_v8 = vmul.f32 %v2576_v49, %v1964_v63  ;;  %v824_v5 = vmul.f32 %v2581_v31, %v1964_v63  ;;  %v2615_v45 = vadd.f32 %v818_v42, %v797_v27 }
  0x87   :  { %3386 = vst [vmem:[#allocation78_spill] sm:$0xff] %v2566_v32  ;;  %v825_v32 = vmul.f32 %v2586_v22, %v1964_v63  ;;  %v2617_v10 = vadd.f32 %v819_v15, %v798_v43  ;;  %v2619_v13 = vadd.f32 %v820_v16, %v799_v21  ;;  %v899_v27 = vmul.f32 %v2190_v7, %v2007_v53 }
  0x88   :  { %v900_v21 = vmul.f32 %v2195_v61, %v2007_v53  ;;  %v919_v7 = vmul.f32 %v2246_v59, %v2016_v33  ;;  %v902_v61 = vmul.f32 %v2213_v30, %v2007_v53  ;;  %v923_v59 = vmul.f32 %v2287_v6, %v2016_v33  ;;  %v3395_v6 = vld [vmem:[#allocation58_spill] sm:$0xff] }
  0x89   :  { %v946_v16 = vmul.f32 %v2334_v23, %v3395_v6 }
  0xb5   :  { %v135_v44 = vpop.xlane.xlu0 %134 }
  0xb6   :  { %v136_v28 = vrot.slane %v135_v44, 4 }
  0xb8   :  { %v137_v48 = vmax.f32 %v135_v44, %v136_v28  ;;  %v793_v28 = vmul.f32 %v2503_v35, %v3382_v4  ;;  %v794_v44 = vmul.f32 %v2508_v1, %v3382_v4  ;;  %v2571_v1 = vld [vmem:[%s3111_s2 + $0x188] sm:$0xff]  ;;  %v800_v4 = vadd.f32 %v791_v25, %v770_v58 }
  0xb9   :  { %3387 = vst [vmem:[#allocation79_spill] sm:$0xff] %v2571_v1  ;;  %v822_v62 = vmul.f32 %v2571_v1, %v1964_v63  ;;  %v804_v58 = vadd.f32 %v795_v12, %v774_v9  ;;  %v826_v1 = vmul.f32 %v2595_v34, %v1964_v63  ;;  %v897_v12 = vmul.f32 %v2172_v29, %v2007_v53 }
  0xba   :  { %v138_v35 = vrot.slane %v137_v48, 2  ;;  %v802_v47 = vadd.f32 %v793_v28, %v772_v20  ;;  %v2621_v9 = vadd.f32 %v821_v52, %v800_v4  ;;  %v896_v20 = vmul.f32 %v2167_v37, %v2007_v53 }
  0xbb   :  { %v898_v63 = vmul.f32 %v2177_v24, %v2007_v53  ;;  %v916_v37 = vmul.f32 %v2223_v18, %v2016_v33  ;;  %v917_v29 = vmul.f32 %v2236_v2, %v2016_v33  ;;  %v918_v24 = vmul.f32 %v2241_v54, %v2016_v33  ;;  %v3390_v18 = vld [vmem:[#allocation18_spill] sm:$0xff] }
  0xbc   :  { %v139_v25 = vmax.f32 %v137_v48, %v138_v35  ;;  %v803_v48 = vadd.f32 %v794_v44, %v773_v46  ;;  %v805_v35 = vadd.f32 %v796_v60, %v775_v51  ;;  %3388 = vst [vmem:[#allocation80_spill] sm:$0xff] %v2621_v9  ;;  %v2623_v46 = vadd.f32 %v822_v62, %v801_v3  ;;  %v3417_v9 = vld [vmem:[#allocation16_spill] sm:$0xff] }
  0xbd   :  { %v895_v51 = vmul.f32 %v2159_v14, %v2007_v53  ;;  %v901_v3 = vmul.f32 %v2200_v55, %v2007_v53  ;;  %v915_v14 = vmul.f32 %v2218_v0, %v2016_v33  ;;  %v920_v55 = vmul.f32 %v2259_v36, %v2016_v33 }
  0xbe   :  { %v140_v57 = vrot.slane %v139_v25, 1  ;;  %3389 = vst [vmem:[#allocation81_spill] sm:$0xff] %v2623_v46  ;;  %v921_v0 = vmul.f32 %v2264_v11, %v2016_v33  ;;  %v2657_v28 = vadd.f32 %v823_v8, %v802_v47  ;;  %v2659_v2 = vadd.f32 %v824_v5, %v803_v48  ;;  %v3396_v48 = vld [vmem:[#allocation22_spill] sm:$0xff] }
  0xbf   :  { %v903_v54 = vmul.f32 %v2282_v19, %v2007_v53  ;;  %v2665_v30 = vadd.f32 %v825_v32, %v804_v58  ;;  %v2667_v44 = vadd.f32 %v826_v1, %v805_v35  ;;  %v924_v36 = vadd.f32 %v915_v14, %v895_v51  ;;  %v3397_v35 = vld [vmem:[#allocation5_spill] sm:$0xff] }
  0xc0   :  { %v141_v43 = vmax.f32 %v139_v25, %v140_v57  ;;  %v922_v57 = vmul.f32 %v3390_v18, %v2016_v33  ;;  %3391 = vst [vmem:[#allocation18_spill] sm:$0xff] %v2657_v28  ;;  %3392 = vst [vmem:[#allocation82_spill] sm:$0xff] %v2659_v2  ;;  %v925_v60 = vadd.f32 %v916_v37, %v896_v20  ;;  %v3398_v20 = vld [vmem:[#allocation31_spill] sm:$0xff]  ;;  %v3408_v18 = vld [vmem:[#allocation69_spill] sm:$0xff] }
  0xc1   :  { %3393 = vst [vmem:[#allocation83_spill] sm:$0xff] %v2665_v30  ;;  %3394 = vst [vmem:[#allocation84_spill] sm:$0xff] %v2667_v44  ;;  %v2669_v42 = vadd.f32 %v917_v29, %v897_v12  ;;  %v2671_v8 = vadd.f32 %v918_v24, %v898_v63  ;;  %v2673_v5 = vadd.f32 %v919_v7, %v899_v27  ;;  %v3399_v12 = vld [vmem:[#allocation32_spill] sm:$0xff]  ;;  %v3400_v63 = vld [vmem:[#allocation33_spill] sm:$0xff] }
  0xc2   :  { %v142_v4 = vadd.f32 1e-06, %v141_v43  ;;  %v929_v25 = vadd.f32 %v920_v55, %v900_v21  ;;  %v2675_v53 = vadd.f32 %v921_v0, %v901_v3  ;;  %v2677_v19 = vadd.f32 %v922_v57, %v902_v61  ;;  %v3401_v21 = vld [vmem:[#allocation43_spill] sm:$0xff]  ;;  %v3405_v43 = vld [vmem:[#allocation61_spill] sm:$0xff]  ;;  %v3406_v7 = vld [vmem:[#allocation62_spill] sm:$0xff] }
  0xc3   :  { %v2679_v33 = vadd.f32 %v923_v59, %v903_v54  ;;  %v944_v1 = vmul.f32 %v2316_v50, %v3395_v6  ;;  %v945_v32 = vmul.f32 %v2321_v41, %v3395_v6  ;;  %v947_v62 = vmul.f32 %v2339_v56, %v3395_v6  ;;  %v3407_v55 = vld [vmem:[#allocation63_spill] sm:$0xff]  ;;  %v3409_v54 = vld [vmem:[#allocation70_spill] sm:$0xff] }
  0xc4   :  { %v948_v47 = vmul.f32 %v2344_v17, %v3395_v6  ;;  %v949_v58 = vmul.f32 %v3396_v48, %v3395_v6  ;;  %1327 = vrcp.f32 %v142_v4  ;;  %v950_v50 = vmul.f32 %v2354_v39, %v3395_v6  ;;  %v3402_v39 = vld [vmem:[#allocation68_spill] sm:$0xff] }
  0xc5   :  { %v973_v41 = vmul.f32 %v2397_v40, %v3397_v35  ;;  %v974_v23 = vmul.f32 %v2402_v26, %v3397_v35  ;;  %v975_v56 = vmul.f32 %v3398_v20, %v3397_v35  ;;  %v976_v17 = vmul.f32 %v3399_v12, %v3397_v35  ;;  %v3403_v40 = vld [vmem:[#allocation71_spill] sm:$0xff]  ;;  %v3404_v26 = vld [vmem:[#allocation10_spill] sm:$0xff]  ;;  %v3413_v12 = vld [vmem:[#allocation25_spill] sm:$0xff] }
  0xc6   :  { %v977_v27 = vmul.f32 %v3400_v63, %v3397_v35  ;;  %v978_v3 = vmul.f32 %v3401_v21, %v3397_v35  ;;  %v979_v14 = vmul.f32 %v3402_v39, %v3397_v35  ;;  %v980_v37 = vmul.f32 %v3403_v40, %v3397_v35  ;;  %v3414_v21 = vld [vmem:[#allocation72_spill] sm:$0xff]  ;;  %v3415_v40 = vld [vmem:[#allocation75_spill] sm:$0xff] }
  0xc7   :  { %v993_v29 = vmul.f32 %v3405_v43, %v3404_v26  ;;  %v994_v61 = vmul.f32 %v3406_v7, %v3404_v26  ;;  %v995_v0 = vmul.f32 %v3407_v55, %v3404_v26  ;;  %v996_v57 = vmul.f32 %v3408_v18, %v3404_v26  ;;  %v3416_v7 = vld [vmem:[#allocation26_spill] sm:$0xff] }
  0xc8   :  { %v997_v59 = vmul.f32 %v3409_v54, %v3404_v26  ;;  %v951_v63 = vmul.f32 %v3413_v12, %v3395_v6  ;;  %v981_v39 = vmul.f32 %v3414_v21, %v3397_v35  ;;  %v1001_v43 = vmul.f32 %v3415_v40, %v3404_v26 }
  0xc9   :  { %v952_v55 = vmul.f32 %v3416_v7, %v3395_v6  ;;  %v2735_v18 = vadd.f32 %v944_v1, %v924_v36  ;;  %v2737_v54 = vadd.f32 %v945_v32, %v925_v60  ;;  %v1004_v44 = vadd.f32 %v995_v0, %v975_v56  ;;  %v3419_v6 = vld [vmem:[#allocation76_spill] sm:$0xff]  ;;  %v3420_v60 = vld [vmem:[#allocation77_spill] sm:$0xff]  ;;  %v3421_v32 = vld [vmem:[#allocation78_spill] sm:$0xff] }
  0xca   :  { %v1005_v30 = vadd.f32 %v996_v57, %v976_v17  ;;  %v1006_v2 = vadd.f32 %v997_v59, %v977_v27  ;;  %v1010_v21 = vadd.f32 %v1001_v43, %v981_v39  ;;  %v1023_v36 = vmul.f32 %v3419_v6, %v3417_v9  ;;  %v3433_v43 = vld [vmem:[#allocation6_spill] sm:$0xff] }
  0xcb   :  { %v253_v11 = vpop.xlane.xlu0 %252  ;;  %v1024_v1 = vmul.f32 %v3420_v60, %v3417_v9  ;;  %v1027_v17 = vmul.f32 %v2576_v49, %v3417_v9  ;;  %v1028_v27 = vmul.f32 %v2581_v31, %v3417_v9  ;;  %v959_v49 = vadd.f32 %v950_v50, %v2675_v53  ;;  %v3424_v53 = vld [vmem:[#allocation48_spill] sm:$0xff] }
  0xcc   :  { %v254_v15 = vrot.slane %v253_v11, 4  ;;  %v960_v57 = vadd.f32 %v951_v63, %v2677_v19  ;;  %v961_v31 = vadd.f32 %v952_v55, %v2679_v33  ;;  %v3425_v33 = vld [vmem:[#allocation49_spill] sm:$0xff]  ;;  %v3434_v55 = vld [vmem:[#allocation7_spill] sm:$0xff] }
  0xce   :  { %v255_v52 = vmax.f32 %v253_v11, %v254_v15  ;;  %v3410_v11 = vld [vmem:[#allocation46_spill] sm:$0xff]  ;;  %v3411_v15 = vld [vmem:[#allocation73_spill] sm:$0xff] }
  0xcf   :  { %v998_v4 = vmul.f32 %v3410_v11, %v3404_v26  ;;  %v999_v48 = vmul.f32 %v3411_v15, %v3404_v26  ;;  %v1002_v11 = vadd.f32 %v993_v29, %v973_v41  ;;  %v1025_v41 = vmul.f32 %v3421_v32, %v3417_v9 }
  0xd0   :  { %v256_v51 = vrot.slane %v255_v52, 2  ;;  %v956_v29 = vadd.f32 %v947_v62, %v2671_v8  ;;  %v3426_v62 = vld [vmem:[#allocation50_spill] sm:$0xff] }
  0xd1   :  { %v1007_v12 = vadd.f32 %v998_v4, %v978_v3  ;;  %v1008_v28 = vadd.f32 %v999_v48, %v979_v14  ;;  %v1029_v3 = vmul.f32 %v2586_v22, %v3417_v9  ;;  %v1030_v14 = vmul.f32 %v2595_v34, %v3417_v9  ;;  %v1328_v0 = vpop.eup %1327 }
  0xd2   :  { %v257_v24 = vmax.f32 %v255_v52, %v256_v51  ;;  %v3412_v52 = vld [vmem:[#allocation74_spill] sm:$0xff]  ;;  %v2767_v4 = vadd.f32 %v1024_v1, %v1004_v44  ;;  %v2769_v34 = vadd.f32 %v1025_v41, %v1005_v30  ;;  %v423_v19 = vmul.f32 %v1328_v0, %v3424_v53  ;;  %v3427_v44 = vld [vmem:[#allocation51_spill] sm:$0xff] }
  0xd3   :  { %v1000_v51 = vmul.f32 %v3412_v52, %v3404_v26  ;;  %v1003_v52 = vadd.f32 %v994_v61, %v974_v23  ;;  %v3418_v26 = vld [vmem:[#allocation47_spill] sm:$0xff]  ;;  %v958_v61 = vadd.f32 %v949_v58, %v929_v25  ;;  %v2775_v8 = vadd.f32 %v1028_v27, %v1008_v28  ;;  %v3428_v30 = vld [vmem:[#allocation34_spill] sm:$0xff]  ;;  %v3431_v28 = vld [vmem:[#allocation37_spill] sm:$0xff] }
  0xd4   :  { %v258_v20 = vrot.slane %v257_v24, 1  ;;  %v1022_v40 = vmul.f32 %v3418_v26, %v3417_v9  ;;  %v3422_v23 = vld [vmem:[#allocation79_spill] sm:$0xff]  ;;  %v2779_v25 = vadd.f32 %v1030_v14, %v1010_v21  ;;  %v426_v58 = vmul.f32 %v1328_v0, %v3427_v44  ;;  %v3440_v1 = vld [vmem:[#allocation14_spill] sm:$0xff]  ;;  %v3443_v27 = vld [vmem:[#allocation45_spill] sm:$0xff] }
  0xd5   :  { %v1009_v46 = vadd.f32 %v1000_v51, %v980_v37  ;;  %v1026_v56 = vmul.f32 %v3422_v23, %v3417_v9  ;;  %v955_v37 = vadd.f32 %v946_v16, %v2669_v42  ;;  %v2765_v22 = vadd.f32 %v1023_v36, %v1003_v52  ;;  %v3430_v51 = vld [vmem:[#allocation36_spill] sm:$0xff]  ;;  %v3437_v21 = vld [vmem:[#allocation11_spill] sm:$0xff]  ;;  %v3439_v36 = vld [vmem:[#allocation13_spill] sm:$0xff] }
  0xd6   :  { %v259_v15 = vmax.f32 %v257_v24, %v258_v20  ;;  %v957_v24 = vadd.f32 %v948_v47, %v2673_v5  ;;  %v2763_v59 = vadd.f32 %v1022_v40, %v1002_v11  ;;  %v2773_v42 = vadd.f32 %v1027_v17, %v1007_v12  ;;  %3423 = vst [vmem:[#allocation58_spill] sm:$0xff] %v2779_v25  ;;  %v3436_v12 = vld [vmem:[#allocation9_spill] sm:$0xff]  ;;  %v3438_v40 = vld [vmem:[#allocation12_spill] sm:$0xff]  ;;  %v3441_v41 = vld [vmem:[#allocation15_spill] sm:$0xff] }
  0xd7   :  { %v2771_v9 = vadd.f32 %v1026_v56, %v1006_v2  ;;  %v2777_v5 = vadd.f32 %v1029_v3, %v1009_v46  ;;  %v424_v16 = vmul.f32 %v1328_v0, %v3425_v33  ;;  %v425_v47 = vmul.f32 %v1328_v0, %v3426_v62  ;;  %v3429_v2 = vld [vmem:[#allocation35_spill] sm:$0xff]  ;;  %v3432_v46 = vld [vmem:[#allocation38_spill] sm:$0xff]  ;;  %v3442_v56 = vld [vmem:[#allocation44_spill] sm:$0xff] }
  0xd8   :  { %v260_v35 = vadd.f32 1e-06, %v259_v15  ;;  %v427_v50 = vmul.f32 %v1328_v0, %v3428_v30  ;;  %v428_v48 = vmul.f32 %v1328_v0, %v3429_v2  ;;  %v429_v20 = vmul.f32 %v1328_v0, %v3430_v51  ;;  %v3435_v15 = vld [vmem:[#allocation8_spill] sm:$0xff]  ;;  %v3444_v14 = vld [vmem:[#allocation59_spill] sm:$0xff]  ;;  %v3447_v2 = vld [vmem:[#allocation65_spill] sm:$0xff] }
  0xd9   :  { %v430_v63 = vmul.f32 %v1328_v0, %v3431_v28  ;;  %v431_v39 = vmul.f32 %v1328_v0, %v3432_v46  ;;  %v2791_v7 = vmul.f32 %v1328_v0, %v3433_v43  ;;  %v2794_v11 = vmul.f32 %v1328_v0, %v3434_v55  ;;  %v3445_v33 = vld [vmem:[#allocation60_spill] sm:$0xff]  ;;  %v3448_v28 = vld [vmem:[#allocation66_spill] sm:$0xff]  ;;  %v3449_v43 = vld [vmem:[#allocation67_spill] sm:$0xff] }
  0xda   :  { %1329 = vrcp.f32 %v260_v35  ;;  %v2797_v52 = vmul.f32 %v1328_v0, %v3435_v15  ;;  %v2800_v35 = vmul.f32 %v1328_v0, %v3436_v12  ;;  %v2803_v26 = vmul.f32 %v1328_v0, %v3437_v21  ;;  %v3446_v44 = vld [vmem:[#allocation64_spill] sm:$0xff] }
  0xdb   :  { %v2806_v6 = vmul.f32 %v1328_v0, %v3438_v40  ;;  %v2809_v60 = vmul.f32 %v1328_v0, %v3439_v36  ;;  %v2812_v32 = vmul.f32 %v1328_v0, %v3440_v1  ;;  %v2815_v23 = vmul.f32 %v1328_v0, %v3441_v41 }
  0xdc   :  { %v2818_v17 = vmul.f32 %v1328_v0, %v3442_v56  ;;  %v2821_v3 = vmul.f32 %v1328_v0, %v3443_v27  ;;  %v2824_v53 = vmul.f32 %v1328_v0, %v3444_v14  ;;  %v2827_v62 = vmul.f32 %v1328_v0, %v3445_v33  ;;  %v3460_v33 = vld [vmem:[#allocation40_spill] sm:$0xff] }
  0xdd   :  { %v2830_v30 = vmul.f32 %v1328_v0, %v3446_v44  ;;  %v2833_v51 = vmul.f32 %v1328_v0, %v3447_v2  ;;  %v2836_v46 = vmul.f32 %v1328_v0, %v3448_v28  ;;  %v2839_v55 = vmul.f32 %v1328_v0, %v3449_v43  ;;  %v3462_v44 = vld [vmem:[#allocation42_spill] sm:$0xff]  ;;  %v3464_v28 = vld [vmem:[#allocation53_spill] sm:$0xff]  ;;  %v3466_v43 = vld [vmem:[#allocation55_spill] sm:$0xff] }
  0xde   :  { %v2842_v15 = vmul.f32 %v1328_v0, %v2605_v38  ;;  %v2845_v12 = vmul.f32 %v1328_v0, %v2735_v18  ;;  %v2848_v21 = vmul.f32 %v1328_v0, %v2737_v54  ;;  %v2850_v40 = vmul.f32 %v1328_v0, %v955_v37  ;;  %v3459_v18 = vld [vmem:[#allocation39_spill] sm:$0xff] }
  0xdf   :  { %v2852_v36 = vmul.f32 %v1328_v0, %v956_v29  ;;  %v2854_v1 = vmul.f32 %v1328_v0, %v957_v24  ;;  %v2858_v56 = vmul.f32 %v1328_v0, %v958_v61  ;;  %v2860_v27 = vmul.f32 %v1328_v0, %v959_v49  ;;  %v3461_v29 = vld [vmem:[#allocation41_spill] sm:$0xff]  ;;  %v3463_v61 = vld [vmem:[#allocation52_spill] sm:$0xff] }
  0xe0   :  { %3450 = vst [vmem:[#allocation22_spill] sm:$0xff] %v2845_v12  ;;  %3451 = vst [vmem:[#allocation5_spill] sm:$0xff] %v2848_v21  ;;  %v2862_v38 = vmul.f32 %v1328_v0, %v960_v57  ;;  %v2864_v14 = vmul.f32 %v1328_v0, %v961_v31  ;;  %v3465_v0 = vld [vmem:[#allocation54_spill] sm:$0xff]  ;;  %v3468_v21 = vld [vmem:[#allocation57_spill] sm:$0xff] }
  0xe1   :  { %3452 = vst [vmem:[#allocation31_spill] sm:$0xff] %v2850_v40  ;;  %3453 = vst [vmem:[#allocation32_spill] sm:$0xff] %v2852_v36 }
  0xe2   :  { %3454 = vst [vmem:[#allocation33_spill] sm:$0xff] %v2854_v1  ;;  %3455 = vst [vmem:[#allocation43_spill] sm:$0xff] %v2858_v56 }
  0xe3   :  { %3456 = vst [vmem:[#allocation68_spill] sm:$0xff] %v2860_v27  ;;  %3457 = vst [vmem:[#allocation71_spill] sm:$0xff] %v2862_v38 }
  0xe4   :  { %3458 = vst [vmem:[#allocation10_spill] sm:$0xff] %v2864_v14  ;;  %v3467_v14 = vld [vmem:[#allocation56_spill] sm:$0xff] }
  0xe7   :  { %v2856_v41 = vpop.eup %1329 }
  0xe8   :  { %v432_v54 = vmul.f32 %v2856_v41, %v3459_v18  ;;  %v433_v37 = vmul.f32 %v2856_v41, %v3460_v33  ;;  %v434_v24 = vmul.f32 %v2856_v41, %v3461_v29  ;;  %v435_v2 = vmul.f32 %v2856_v41, %v3462_v44 }
  0xe9   :  { %v436_v49 = vmul.f32 %v2856_v41, %v3463_v61  ;;  %v437_v57 = vmul.f32 %v2856_v41, %v3464_v28  ;;  %v438_v31 = vmul.f32 %v2856_v41, %v3465_v0  ;;  %v439_v18 = vmul.f32 %v2856_v41, %v3466_v43 }
  0xea   :  { %v440_v33 = vmul.f32 %v2856_v41, %v3467_v14  ;;  %v441_v38 = vadd.f32 %v432_v54, %v423_v19  ;;  %v442_v29 = vadd.f32 %v433_v37, %v424_v16  ;;  %v443_v27 = vadd.f32 %v434_v24, %v425_v47  ;;  %v3476_v54 = vld [vmem:[#allocation23_spill] sm:$0xff]  ;;  %v3477_v24 = vld [vmem:[#allocation24_spill] sm:$0xff] }
  0xeb   :  { %v444_v56 = vadd.f32 %v435_v2, %v426_v58  ;;  %v445_v44 = vadd.f32 %v436_v49, %v427_v50  ;;  %v446_v1 = vadd.f32 %v437_v57, %v428_v48  ;;  %v447_v36 = vadd.f32 %v438_v31, %v429_v20  ;;  %v3469_v50 = vld [vmem:[#allocation19_spill] sm:$0xff]  ;;  %v3470_v20 = vld [vmem:[#allocation20_spill] sm:$0xff] }
  0xec   :  { %v448_v61 = vadd.f32 %v439_v18, %v430_v63  ;;  %v449_v40 = vadd.f32 %v440_v33, %v431_v39  ;;  %v452_v28 = vadd.f32 %v3468_v21, %v441_v38  ;;  %v453_v12 = vadd.f32 %v3468_v21, %v442_v29  ;;  %v3471_v39 = vld [vmem:[#allocation21_spill] sm:$0xff]  ;;  %v3475_v38 = vld [vmem:[#allocation30_spill] sm:$0xff] }
  0xed   :  { %v454_v0 = vadd.f32 %v3468_v21, %v443_v27  ;;  %v455_v43 = vadd.f32 %v3468_v21, %v444_v56  ;;  %v456_v25 = vadd.f32 %v3468_v21, %v445_v44  ;;  %v457_v19 = vadd.f32 %v3468_v21, %v446_v1  ;;  %v3473_v1 = vld [vmem:[#allocation28_spill] sm:$0xff] }
  0xee   :  { %v458_v16 = vadd.f32 %v3468_v21, %v447_v36  ;;  %v459_v47 = vadd.f32 %v3468_v21, %v448_v61  ;;  %v460_v58 = vadd.f32 %v3468_v21, %v449_v40  ;;  %461 = vst [vmem:[%s3112_s3] sm:$0xff] %v452_v28  ;;  %462 = vst [vmem:[%s3112_s3 + $0x8] sm:$0xff] %v453_v12  ;;  %v3472_v40 = vld [vmem:[#allocation27_spill] sm:$0xff] }
  0xef   :  { %v635_v48 = vmul.f32 %v2856_v41, %v3469_v50  ;;  %463 = vst [vmem:[%s3112_s3 + $0x10] sm:$0xff] %v454_v0  ;;  %464 = vst [vmem:[%s3112_s3 + $0x18] sm:$0xff] %v455_v43  ;;  %v636_v63 = vmul.f32 %v2856_v41, %v3470_v20  ;;  %v637_v12 = vmul.f32 %v2856_v41, %v3471_v39  ;;  %v3478_v0 = vld [vmem:[#allocation17_spill] sm:$0xff]  ;;  %v3481_v50 = vld [vmem:[#allocation18_spill] sm:$0xff] }
  0xf0   :  { %465 = vst [vmem:[%s3112_s3 + $0x20] sm:$0xff] %v456_v25  ;;  %466 = vst [vmem:[%s3112_s3 + $0x28] sm:$0xff] %v457_v19  ;;  %v638_v36 = vmul.f32 %v2856_v41, %v3472_v40  ;;  %v639_v56 = vmul.f32 %v2856_v41, %v3473_v1  ;;  %v3474_v25 = vld [vmem:[#allocation29_spill] sm:$0xff]  ;;  %v641_v14 = vmul.f32 %v2856_v41, %v3475_v38  ;;  %v3482_v20 = vld [vmem:[#allocation82_spill] sm:$0xff] }
  0xf1   :  { %467 = vst [vmem:[%s3112_s3 + $0x30] sm:$0xff] %v458_v16  ;;  %468 = vst [vmem:[%s3112_s3 + $0x38] sm:$0xff] %v459_v47  ;;  %v640_v27 = vmul.f32 %v2856_v41, %v3474_v25  ;;  %v642_v37 = vmul.f32 %v2856_v41, %v3476_v54  ;;  %v643_v2 = vmul.f32 %v2856_v41, %v3477_v24  ;;  %v3480_v47 = vld [vmem:[#allocation81_spill] sm:$0xff] }
  0xf2   :  { %469 = vst [vmem:[%s3112_s3 + $0x40] sm:$0xff] %v460_v58  ;;  %v644_v49 = vadd.f32 %v635_v48, %v2791_v7  ;;  %v645_v57 = vadd.f32 %v636_v63, %v2794_v11  ;;  %v646_v31 = vadd.f32 %v637_v12, %v2797_v52  ;;  %v647_v18 = vadd.f32 %v638_v36, %v2800_v35  ;;  %v3483_v63 = vld [vmem:[#allocation83_spill] sm:$0xff]  ;;  %v3484_v12 = vld [vmem:[#allocation84_spill] sm:$0xff] }
  0xf3   :  { %v648_v33 = vadd.f32 %v639_v56, %v2803_v26  ;;  %v649_v29 = vadd.f32 %v640_v27, %v2806_v6  ;;  %v650_v44 = vadd.f32 %v641_v14, %v2809_v60  ;;  %v651_v61 = vadd.f32 %v642_v37, %v2812_v32 }
  0xf4   :  { %v652_v28 = vadd.f32 %v643_v2, %v2815_v23  ;;  %v655_v43 = vadd.f32 %v3478_v0, %v644_v49  ;;  %v656_v7 = vadd.f32 %v3478_v0, %v645_v57  ;;  %v657_v11 = vadd.f32 %v3478_v0, %v646_v31  ;;  %v3485_v31 = vld [vmem:[#allocation58_spill] sm:$0xff] }
  0xf5   :  { %v658_v52 = vadd.f32 %v3478_v0, %v647_v18  ;;  %v659_v35 = vadd.f32 %v3478_v0, %v648_v33  ;;  %v660_v26 = vadd.f32 %v3478_v0, %v649_v29  ;;  %v661_v6 = vadd.f32 %v3478_v0, %v650_v44  ;;  %v3487_v29 = vld [vmem:[#allocation5_spill] sm:$0xff]  ;;  %v3488_v44 = vld [vmem:[#allocation31_spill] sm:$0xff] }
  0xf6   :  { %v662_v60 = vadd.f32 %v3478_v0, %v651_v61  ;;  %v663_v32 = vadd.f32 %v3478_v0, %v652_v28  ;;  %1178 = vst [vmem:[%s3112_s3 + $0x48] sm:$0xff] %v655_v43  ;;  %1179 = vst [vmem:[%s3112_s3 + $0x50] sm:$0xff] %v656_v7  ;;  %v845_v23 = vmul.f32 %v2856_v41, %v2615_v45  ;;  %v3490_v43 = vld [vmem:[#allocation33_spill] sm:$0xff]  ;;  %v3491_v7 = vld [vmem:[#allocation43_spill] sm:$0xff] }
  0xf7   :  { %1180 = vst [vmem:[%s3112_s3 + $0x58] sm:$0xff] %v657_v11  ;;  %v846_v19 = vmul.f32 %v2856_v41, %v2617_v10  ;;  %1181 = vst [vmem:[%s3112_s3 + $0x60] sm:$0xff] %v658_v52  ;;  %v847_v45 = vmul.f32 %v2856_v41, %v2619_v13  ;;  %v3479_v10 = vld [vmem:[#allocation80_spill] sm:$0xff]  ;;  %v849_v58 = vmul.f32 %v2856_v41, %v3480_v47 }
  0xf8   :  { %1182 = vst [vmem:[%s3112_s3 + $0x68] sm:$0xff] %v659_v35  ;;  %1183 = vst [vmem:[%s3112_s3 + $0x70] sm:$0xff] %v660_v26  ;;  %v848_v16 = vmul.f32 %v2856_v41, %v3479_v10  ;;  %v850_v48 = vmul.f32 %v2856_v41, %v3481_v50  ;;  %v851_v13 = vmul.f32 %v2856_v41, %v3482_v20  ;;  %v3492_v52 = vld [vmem:[#allocation68_spill] sm:$0xff]  ;;  %v3493_v26 = vld [vmem:[#allocation71_spill] sm:$0xff] }
  0xf9   :  { %1184 = vst [vmem:[%s3112_s3 + $0x78] sm:$0xff] %v661_v6  ;;  %1185 = vst [vmem:[%s3112_s3 + $0x80] sm:$0xff] %v662_v60  ;;  %v852_v39 = vmul.f32 %v2856_v41, %v3483_v63  ;;  %v853_v40 = vmul.f32 %v2856_v41, %v3484_v12  ;;  %v854_v36 = vadd.f32 %v845_v23, %v2818_v17 }
  0xfa   :  { %1186 = vst [vmem:[%s3112_s3 + $0x88] sm:$0xff] %v663_v32  ;;  %v855_v1 = vadd.f32 %v846_v19, %v2821_v3  ;;  %v856_v56 = vadd.f32 %v847_v45, %v2824_v53  ;;  %v857_v25 = vadd.f32 %v848_v16, %v2827_v62  ;;  %v858_v27 = vadd.f32 %v849_v58, %v2830_v30 }
  0xfb   :  { %v859_v38 = vadd.f32 %v850_v48, %v2833_v51  ;;  %v860_v14 = vadd.f32 %v851_v13, %v2836_v46  ;;  %v861_v54 = vadd.f32 %v852_v39, %v2839_v55  ;;  %v862_v37 = vadd.f32 %v853_v40, %v2842_v15 }
  0xfc   :  { %v865_v24 = vadd.f32 %v854_v36, %v3468_v21  ;;  %v866_v17 = vadd.f32 %v855_v1, %v3468_v21  ;;  %v867_v3 = vadd.f32 %v856_v56, %v3468_v21  ;;  %v868_v53 = vadd.f32 %v857_v25, %v3468_v21 }
  0xfd   :  { %v869_v62 = vadd.f32 %v858_v27, %v3468_v21  ;;  %v870_v30 = vadd.f32 %v859_v38, %v3468_v21  ;;  %v871_v51 = vadd.f32 %v860_v14, %v3468_v21  ;;  %v872_v46 = vadd.f32 %v861_v54, %v3468_v21 }
  0xfe   :  { %v873_v55 = vadd.f32 %v862_v37, %v3468_v21  ;;  %1247 = vst [vmem:[%s3112_s3 + $0x90] sm:$0xff] %v865_v24  ;;  %1248 = vst [vmem:[%s3112_s3 + $0x98] sm:$0xff] %v866_v17  ;;  %v1049_v15 = vmul.f32 %v2856_v41, %v2763_v59  ;;  %v1050_v21 = vmul.f32 %v2856_v41, %v2765_v22 }
  0xff   :  { %1249 = vst [vmem:[%s3112_s3 + $0xa0] sm:$0xff] %v867_v3  ;;  %1250 = vst [vmem:[%s3112_s3 + $0xa8] sm:$0xff] %v868_v53  ;;  %v1051_v2 = vmul.f32 %v2856_v41, %v2767_v4  ;;  %v1052_v59 = vmul.f32 %v2856_v41, %v2769_v34  ;;  %v1053_v22 = vmul.f32 %v2856_v41, %v2771_v9  ;;  %v3486_v34 = vld [vmem:[#allocation22_spill] sm:$0xff] }
 0x100   :  { %1251 = vst [vmem:[%s3112_s3 + $0xb0] sm:$0xff] %v869_v62  ;;  %1252 = vst [vmem:[%s3112_s3 + $0xb8] sm:$0xff] %v870_v30  ;;  %v1054_v4 = vmul.f32 %v2856_v41, %v2773_v42  ;;  %v1055_v49 = vmul.f32 %v2856_v41, %v2775_v8  ;;  %v1056_v57 = vmul.f32 %v2856_v41, %v2777_v5  ;;  %v3489_v42 = vld [vmem:[#allocation32_spill] sm:$0xff]  ;;  %v3494_v5 = vld [vmem:[#allocation10_spill] sm:$0xff] }
 0x101   :  { %1253 = vst [vmem:[%s3112_s3 + $0xc0] sm:$0xff] %v871_v51  ;;  %1254 = vst [vmem:[%s3112_s3 + $0xc8] sm:$0xff] %v872_v46  ;;  %v1057_v18 = vmul.f32 %v2856_v41, %v3485_v31  ;;  %v1058_v33 = vadd.f32 %v1049_v15, %v3486_v34  ;;  %v1059_v9 = vadd.f32 %v1050_v21, %v3487_v29 }
 0x102   :  { %1255 = vst [vmem:[%s3112_s3 + $0xd0] sm:$0xff] %v873_v55  ;;  %v1060_v61 = vadd.f32 %v1051_v2, %v3488_v44  ;;  %v1061_v28 = vadd.f32 %v1052_v59, %v3489_v42  ;;  %v1062_v8 = vadd.f32 %v1053_v22, %v3490_v43  ;;  %v1063_v11 = vadd.f32 %v1054_v4, %v3491_v7 }
 0x103   :  { %v1064_v35 = vadd.f32 %v1055_v49, %v3492_v52  ;;  %v1065_v6 = vadd.f32 %v1056_v57, %v3493_v26  ;;  %v1066_v60 = vadd.f32 %v1057_v18, %v3494_v5  ;;  %v1069_v41 = vadd.f32 %v1058_v33, %v3478_v0 }
 0x104   :  { %v1070_v32 = vadd.f32 %v1059_v9, %v3478_v0  ;;  %v1071_v23 = vadd.f32 %v1060_v61, %v3478_v0  ;;  %v1072_v19 = vadd.f32 %v1061_v28, %v3478_v0  ;;  %v1073_v45 = vadd.f32 %v1062_v8, %v3478_v0 }
 0x105   :  { %v1074_v10 = vadd.f32 %v1063_v11, %v3478_v0  ;;  %v1075_v16 = vadd.f32 %v1064_v35, %v3478_v0  ;;  %v1076_v47 = vadd.f32 %v1065_v6, %v3478_v0  ;;  %v1077_v58 = vadd.f32 %v1066_v60, %v3478_v0  ;;  %1317 = vst [vmem:[%s3112_s3 + $0xd8] sm:$0xff] %v1069_v41 }
 0x106   :  { %1318 = vst [vmem:[%s3112_s3 + $0xe0] sm:$0xff] %v1070_v32  ;;  %1319 = vst [vmem:[%s3112_s3 + $0xe8] sm:$0xff] %v1071_v23 }
 0x107   :  { %1320 = vst [vmem:[%s3112_s3 + $0xf0] sm:$0xff] %v1072_v19  ;;  %1321 = vst [vmem:[%s3112_s3 + $0xf8] sm:$0xff] %v1073_v45 }
 0x108   :  { %1322 = vst [vmem:[%s3112_s3 + $0x100] sm:$0xff] %v1074_v10  ;;  %1323 = vst [vmem:[%s3112_s3 + $0x108] sm:$0xff] %v1075_v16 }
 0x109   :  { %1324 = vst [vmem:[%s3112_s3 + $0x110] sm:$0xff] %v1076_v47  ;;  %1325 = vst [vmem:[%s3112_s3 + $0x118] sm:$0xff] %v1077_v58 }
 0x10a   :  { %1092 = vsyncpa [#allocation3], 1 }

// kernel: custom-call.124
= control target key start
LH: loop header
LB: loop body
LE: loop exit
PB: predicated region body
PF: predicated region fallthrough
CT: control target
= control target key end

     0   :  { %s243_s6 = smov 0   ;;  %s270_s0 = inlined_call_operand.vmem [shape: f32[2,3,3], index: 0, kind: input, shape index: {}]   ;;  %s271_s1 = inlined_call_operand.vmem [shape: f32[2,3,3], index: 1, kind: output, shape index: {}]  }
   0x1 LB: > { %s205_s7 = sadd.s32 4294967295, %s231_s6   ;;  %p207_p0 = scmp.ge.s32.totalorder %s231_s6, 2  ;;  %s231_s6 = sphi %s243_s6, %s7_s6  }
   0x2   : > { %s23_s8 = sand.u32 (!%p207_p0), 1, %s231_s6   ;;  %s209_s9 = sshll.u32 (!%p207_p0), %s231_s6, 2 }
   0x3   : > { %21 = sbr.rel (%p207_p0) target bundleno = 10 (0xa), region = 16  ;;  %s208_s10 = sshll.u32 (!%p207_p0), %s23_s8, 2 }
   0x4   : > { %s27_s13 = scalar_lea.vmem (!%p207_p0), %s270_s0, %s209_s9  ;;  %s25_s14 = scalar_lea.vmem (!%p207_p0), [#allocation1], %s208_s10 }
   0x8   : > { %v44_v0 = vld [vmem:[%s27_s13] sm:$0xf] }
   0x9   : > { %45 = vst [vmem:[%s25_s14] sm:$0xf] %v44_v0 }
   0xa PF: > { %p210_p1 = scmp.ge.s32.totalorder %s231_s6, 1  ;;  %p62_p2 = scmp.lt.s32.totalorder %s231_s6, 3 }
   0xc   : > { %p63_p3 = pnand %p210_p1, %p62_p2 }
   0xd   : > { %s259_s15 = sand.u32 (!%p63_p3), 1, %s205_s7   ;;  %s214_s19 = sshll.u32 (!%p63_p3), %s205_s7, 2 }
   0xe   : > { %66 = sbr.rel (%p63_p3) target bundleno = 329 (0x149), region = 50  ;;  %s211_s16 = sshll.u32 (!%p63_p3), %s259_s15, 2 }
   0xf   : > { %s75_s17 = scalar_lea.vmem (!%p63_p3), [#allocation1], %s211_s16  ;;  %s79_s18 = scalar_lea.vmem (!%p63_p3), [#allocation3], %s211_s16 }
  0x10   : > { %s133_s22 = scalar_lea.vmem (!%p63_p3), %s271_s1, %s214_s19 }
  0x13   : > { %v85_v1 = vlaneseq  ;;  %v83_v2 = vld [vmem:[%s75_s17] sm:$0xf]  ;;  %vm99_vm1 = vcmask 23552  }
  0x14   : > { %84 = vst [vmem:[#allocation0] sm:$0xf] %v83_v2 }
  0x15   : > { %v86_v3 = vand.u32 127, %v85_v1  ;;  %v88_v4 = vshrl.u32 %v85_v1, 7 }
  0x17   : > { %vm94_vm0 = vcmp.eq.s32.totalorder %v86_v3, 0  ;;  %vm90_vm2 = vcmp.eq.s32.totalorder %v86_v3, %v88_v4  ;;  %vm103_vm3 = vcmp.eq.s32.totalorder %v86_v3, 1  ;;  %vm114_vm4 = vcmp.eq.s32.totalorder %v86_v3, 2 }
  0x1b   : > { %v91_v5 = vld [vmem:[#allocation0] sm:$0xff] }
  0x1c   : > { %v98_v6 = vld [vmem:[#allocation0 + $0x1] ss:$0 sm:$0xff]  ;;  %v95_v7 = vsel %vm94_vm0, %v91_v5, 1.0  ;;  %v109_v11 = vld [vmem:[#allocation0 + $0x2] ss:$0 sm:$0xff] }
  0x1d   : > { %v100_v8 = vsel %vm99_vm1, %v98_v6, 0.0  ;;  %v96_v9 = vsel %vm90_vm2, %v95_v7, 0.0  ;;  %v111_v12 = vsel %vm99_vm1, %v109_v11, 0.0 }
  0x1e   : > { %v104_v10 = vmul.f32 %v100_v8, %v96_v9 }
  0x20   : > { %105 = vadd.xlane.f32.xlu0 %v104_v10 }
  0xa9   : > { %v106_v13 = vpop.xlane.xlu0 %105 }
  0xaa   : > { %v107_v14 = vsel %vm103_vm3, %v106_v13, %v96_v9 }
  0xab   : > { %v115_v15 = vmul.f32 %v111_v12, %v107_v14 }
  0xad   : > { %116 = vadd.xlane.f32.xlu0 %v115_v15 }
 0x136   : > { %v117_v16 = vpop.xlane.xlu0 %116 }
 0x137   : > { %v118_v17 = vsel %vm114_vm4, %v117_v16, %v107_v14 }
 0x138   : > { %119 = vst [vmem:[#allocation2] sm:$0xff] %v118_v17 }
 0x13f   : > { %v124_v18 = vld [vmem:[#allocation2] sm:$0xf] }
 0x140   : > { %127 = vst [vmem:[%s79_s18] sm:$0xf] %v124_v18 }
 0x147   : > { %v150_v19 = vld [vmem:[%s79_s18] sm:$0xf] }
 0x148   : > { %151 = vst [vmem:[%s133_s22] sm:$0xf] %v150_v19 }
 0x149 PF: > { %s7_s6 = sadd.s32 1, %s231_s6  }
 0x14a   : > { %p4_p4 = scmp.ge.s32.totalorder %s7_s6, 4  }
 0x14c   :  { %6 = sbr.rel (!%p4_p4) target bundleno = 1 (0x1), region = 112 }

// kernel: custom-call.116
= control target key start
LH: loop header
LB: loop body
LE: loop exit
PB: predicated region body
PF: predicated region fallthrough
CT: control target
= control target key end

     0   :  { %s6_s0 = inlined_call_operand.hbm [shape: pred[2], index: 0, kind: output, shape index: {}]  }

// kernel: custom-call.121
= control target key start
LH: loop header
LB: loop body
LE: loop exit
PB: predicated region body
PF: predicated region fallthrough
CT: control target
= control target key end

     0   :  { %s350_s6 = smov 0   ;;  %s352_s7 = smov 0   ;;  %s397_s0 = inlined_call_operand.vmem [shape: f32[2,3,3], index: 0, kind: input, shape index: {}]   ;;  %s398_s1 = inlined_call_operand.vmem [shape: f32[2,3,3], index: 1, kind: output, shape index: {}]  }
   0x1   :  { %s354_s8 = smov 0  }
   0x2 LB: > { %s272_s9 = sadd.s32 4294967295, %s337_s8   ;;  %s26_s10 = sadd.s32 1, %s333_s7  ;;  %s337_s8 = sphi %s354_s8, %s7_s8   ;;  %s333_s7 = sphi %s352_s7, %s400_s7   ;;  %s329_s6 = sphi %s350_s6, %s399_s6  }
   0x3   : > { %p28_p0 = scmp.ge.s32.totalorder %s26_s10, 2  ;;  %p274_p1 = scmp.ge.s32.totalorder %s337_s8, 2 }
   0x4   : > { %s42_s11 = sand.u32 (!%p274_p1), 1, %s337_s8   ;;  %s276_s12 = sshll.u32 (!%p274_p1), %s333_s7, 2 }
   0x5   : > { %s402_s10 = smov (%p28_p0, %s26_s10), 0  ;;  %40 = sbr.rel (%p274_p1) target bundleno = 12 (0xc), region = 16 }
   0x6   : > { %s275_s13 = sshll.u32 (!%p274_p1), %s42_s11, 2  ;;  %s48_s16 = scalar_lea.vmem (!%p274_p1), %s397_s0, %s276_s12 }
   0x7   : > { %s44_s17 = scalar_lea.vmem (!%p274_p1), [#allocation1], %s275_s13 }
   0xa   : > { %v65_v0 = vld [vmem:[%s48_s16] sm:$0xf] }
   0xb   : > { %66 = vst [vmem:[%s44_s17] sm:$0xf] %v65_v0 }
   0xc PF: > { %p277_p2 = scmp.ge.s32.totalorder %s337_s8, 1  ;;  %p83_p3 = scmp.lt.s32.totalorder %s337_s8, 3 }
   0xe   : > { %p84_p4 = pnand %p277_p2, %p83_p3 }
   0xf   : > { %s377_s18 = sand.u32 (!%p84_p4), 1, %s272_s9   ;;  %s281_s22 = sshll.u32 (!%p84_p4), %s329_s6, 2 }
  0x10   : > { %87 = sbr.rel (%p84_p4) target bundleno = 544 (0x220), region = 50  ;;  %s278_s19 = sshll.u32 (!%p84_p4), %s377_s18, 2 }
  0x11   : > { %s96_s20 = scalar_lea.vmem (!%p84_p4), [#allocation1], %s278_s19  ;;  %s100_s21 = scalar_lea.vmem (!%p84_p4), [#allocation3], %s278_s19 }
  0x12   : > { %s184_s25 = scalar_lea.vmem (!%p84_p4), %s398_s1, %s281_s22 }
  0x15   : > { %v339_v1 = vmov 0.0   ;;  %v104_v5 = vld [vmem:[%s96_s20] sm:$0xf]  ;;  %vm107_vm0 = vcmask 7168   ;;  %vm125_vm1 = vcmask 15368   ;;  %vm142_vm2 = vcmask 1047553  }
  0x16   : > { %106 = vst [vmem:[#allocation2] sm:$0xff] %v339_v1  ;;  %105 = vst [vmem:[#allocation0] sm:$0xf] %v104_v5  ;;  %vm147_vm4 = vcmask 23568   ;;  %vm164_vm5 = vcmask 1047554  }
  0x17   : > { %vm143_vm3 = vmand %vm125_vm1, %vm142_vm2 }
  0x18   : > { %vm165_vm6 = vmand %vm147_vm4, %vm164_vm5 }
  0x1d   : > { %v108_v2 = vld [vmem:[#allocation2] ss:$0 sm:$0xff]  ;;  %v109_v6 = vld [vmem:[#allocation0] ss:$0 sm:$0xff]  ;;  %v129_v18 = vld [vmem:[#allocation0 + $0x1] ss:$0 sm:$0xff] }
  0x1e   : > { %v110_v3 = vmul.f32 %v108_v2, %v108_v2  ;;  %v117_v4 = vmul.f32 0.0, %v108_v2  ;;  %v115_v10 = vld [vmem:[#allocation0] sm:$0xff] }
  0x1f   : > { %v151_v30 = vld [vmem:[#allocation0 + $0x2] ss:$0 sm:$0xff] }
  0x20   : > { %111 = vadd.xlane.f32.xlu0 %v110_v3 }
  0x24   : > { %118 = vadd.xlane.f32.xlu0 %v117_v4 }
  0xa9   : > { %v112_v7 = vpop.xlane.xlu0 %111 }
  0xaa   : > { %v113_v8 = vsub.f32 %v109_v6, %v112_v7 }
  0xac   : > { %309 = vrsqrt.f32 %v113_v8 }
  0xad   : > { %v119_v9 = vpop.xlane.xlu0 %118 }
  0xae   : > { %v120_v11 = vsub.f32 %v115_v10, %v119_v9 }
  0xb9   : > { %v310_v12 = vpop.eup %309 }
  0xba   : > { %v121_v13 = vmul.f32 %v310_v12, %v120_v11 }
  0xbc   : > { %v122_v14 = vsel %vm107_vm0, %v121_v13, 0.0 }
  0xbd   : > { %124 = vst [vmem:[#allocation2] sm:$0xff] %v122_v14 }
  0xc4   : > { %v127_v15 = vld [vmem:[#allocation2 + $0x1] ss:$0 sm:$0xff] }
  0xc5   : > { %v130_v16 = vmul.f32 %v127_v15, %v127_v15  ;;  %v137_v17 = vmul.f32 %v127_v15, %v122_v14 }
  0xc7   : > { %131 = vadd.xlane.f32.xlu1 %v130_v16 }
  0xcb   : > { %138 = vadd.xlane.f32.xlu1 %v137_v17 }
 0x150   : > { %v132_v19 = vpop.xlane.xlu1 %131 }
 0x151   : > { %v133_v20 = vsub.f32 %v129_v18, %v132_v19 }
 0x153   : > { %311 = vrsqrt.f32 %v133_v20 }
 0x154   : > { %v139_v21 = vpop.xlane.xlu1 %138 }
 0x155   : > { %v140_v22 = vsub.f32 %v115_v10, %v139_v21 }
 0x160   : > { %v312_v23 = vpop.eup %311 }
 0x161   : > { %v141_v24 = vmul.f32 %v312_v23, %v140_v22 }
 0x163   : > { %v144_v25 = vsel %vm143_vm3, %v141_v24, 0.0 }
 0x164   : > { %v145_v26 = vadd.f32 %v144_v25, %v122_v14 }
 0x166   : > { %146 = vst [vmem:[#allocation2] sm:$0xff] %v145_v26 }
 0x16d   : > { %v149_v27 = vld [vmem:[#allocation2 + $0x2] ss:$0 sm:$0xff] }
 0x16e   : > { %v159_v28 = vmul.f32 %v149_v27, %v145_v26  ;;  %v152_v29 = vmul.f32 %v149_v27, %v149_v27 }
 0x170   : > { %160 = vadd.xlane.f32.xlu1 %v159_v28  ;;  %153 = vadd.xlane.f32.xlu0 %v152_v29 }
 0x1f9   : > { %v154_v31 = vpop.xlane.xlu0 %153  ;;  %v161_v33 = vpop.xlane.xlu1 %160 }
 0x1fa   : > { %v155_v32 = vsub.f32 %v151_v30, %v154_v31  ;;  %v162_v34 = vsub.f32 %v115_v10, %v161_v33 }
 0x1fc   : > { %313 = vrsqrt.f32 %v155_v32 }
 0x209   : > { %v314_v35 = vpop.eup %313 }
 0x20a   : > { %v163_v36 = vmul.f32 %v314_v35, %v162_v34 }
 0x20c   : > { %v166_v37 = vsel %vm165_vm6, %v163_v36, 0.0 }
 0x20d   : > { %v167_v38 = vadd.f32 %v166_v37, %v145_v26 }
 0x20f   : > { %168 = vst [vmem:[#allocation2] sm:$0xff] %v167_v38 }
 0x216   : > { %v173_v39 = vld [vmem:[#allocation2] sm:$0xf] }
 0x217   : > { %176 = vst [vmem:[%s100_s21] sm:$0xf] %v173_v39 }
 0x21e   : > { %v201_v40 = vld [vmem:[%s100_s21] sm:$0xf] }
 0x21f   : > { %202 = vst [vmem:[%s184_s25] sm:$0xf] %v201_v40 }
 0x220 PF: > { %s7_s8 = sadd.s32 1, %s337_s8   ;;  %s399_s6 = smov %s333_s7 }
 0x221   : > { %p4_p5 = scmp.ge.s32.totalorder %s7_s8, 4   ;;  %s400_s7 = smov %s402_s10 }
 0x223   :  { %6 = sbr.rel (!%p4_p5) target bundleno = 2 (0x2), region = 114 }

// kernel: custom-call.122
= control target key start
LH: loop header
LB: loop body
LE: loop exit
PB: predicated region body
PF: predicated region fallthrough
CT: control target
= control target key end

     0   :  { %s350_s6 = smov 0   ;;  %s352_s7 = smov 0   ;;  %s397_s0 = inlined_call_operand.vmem [shape: f32[2,1,3,3], index: 0, kind: input, shape index: {}]   ;;  %s398_s1 = inlined_call_operand.vmem [shape: f32[2,1,3,3], index: 1, kind: output, shape index: {}]  }
   0x1   :  { %s354_s8 = smov 0  }
   0x2 LB: > { %s276_s9 = sadd.s32 4294967295, %s337_s8   ;;  %s33_s10 = sadd.s32 1, %s333_s7  ;;  %s337_s8 = sphi %s354_s8, %s7_s8   ;;  %s333_s7 = sphi %s352_s7, %s400_s7   ;;  %s329_s6 = sphi %s350_s6, %s399_s6  }
   0x3   : > { %p35_p0 = scmp.ge.s32.totalorder %s33_s10, 2  ;;  %p278_p1 = scmp.ge.s32.totalorder %s337_s8, 2 }
   0x4   : > { %s49_s11 = sand.u32 (!%p278_p1), 1, %s337_s8   ;;  %s280_s12 = sshll.u32 (!%p278_p1), %s333_s7, 2 }
   0x5   : > { %s402_s10 = smov (%p35_p0, %s33_s10), 0  ;;  %47 = sbr.rel (%p278_p1) target bundleno = 12 (0xc), region = 16 }
   0x6   : > { %s279_s13 = sshll.u32 (!%p278_p1), %s49_s11, 2  ;;  %s56_s16 = scalar_lea.vmem (!%p278_p1), %s397_s0, %s280_s12 }
   0x7   : > { %s51_s17 = scalar_lea.vmem (!%p278_p1), [#allocation1], %s279_s13 }
   0xa   : > { %v73_v0 = vld [vmem:[%s56_s16] sm:$0xf] }
   0xb   : > { %74 = vst [vmem:[%s51_s17] sm:$0xf] %v73_v0 }
   0xc PF: > { %p281_p2 = scmp.ge.s32.totalorder %s337_s8, 1  ;;  %p91_p3 = scmp.lt.s32.totalorder %s337_s8, 3 }
   0xe   : > { %p92_p4 = pnand %p281_p2, %p91_p3 }
  0x10   : > { %95 = sbr.rel (%p92_p4) target bundleno = 500 (0x1f4), region = 50 }
  0x15   : > { %s377_s18 = sand.u32 1, %s276_s9   ;;  %v114_v1 = vlaneseq  ;;  %v339_v11 = vmov -1.0   ;;  %s285_s22 = sshll.u32 %s329_s6, 2 }
  0x16   : > { %s282_s19 = sshll.u32 %s377_s18, 2  ;;  %s183_s25 = scalar_lea.vmem %s398_s1, %s285_s22 }
  0x17   : > { %s104_s20 = scalar_lea.vmem [#allocation1], %s282_s19  ;;  %v115_v3 = vand.u32 127, %v114_v1  ;;  %v118_v4 = vshrl.u32 %v114_v1, 7  ;;  %s108_s21 = scalar_lea.vmem [#allocation3], %s282_s19 }
  0x18   : > { %v112_v2 = vld [vmem:[%s104_s20] sm:$0xf] }
  0x19   : > { %113 = vst [vmem:[#allocation0] sm:$0xf] %v112_v2  ;;  %vm116_vm0 = vcmp.lt.s32.totalorder %v115_v3, 3  ;;  %vm125_vm1 = vcmp.ge.s32.totalorder %v118_v4, %v115_v3  ;;  %vm120_vm2 = vcmp.eq.s32.totalorder %v118_v4, %v115_v3  ;;  %vm139_vm4 = vcmp.eq.s32.totalorder %v115_v3, 0 }
  0x1a   : > { %vm126_vm3 = vmand %vm125_vm1, %vm116_vm0  ;;  %vm136_vm5 = vcmp.eq.s32.totalorder %v115_v3, %v118_v4  ;;  %v140_v12 = vsel %vm139_vm4, 1.0, %v339_v11  ;;  %vm147_vm6 = vcmp.eq.s32.totalorder %v115_v3, 1  ;;  %vm157_vm7 = vcmp.eq.s32.totalorder %v115_v3, 2 }
  0x1b   : > { %v141_v13 = vsel %vm136_vm5, %v140_v12, 0.0 }
  0x20   : > { %v121_v5 = vld [vmem:[#allocation0] sm:$0xff] }
  0x21   : > { %v122_v6 = vsel %vm120_vm2, %v121_v5, 0.0  ;;  %v127_v7 = vsel %vm126_vm3, %v121_v5, 0.0 }
  0x22   : > { %123 = vadd.xlane.f32.xlu0 %v122_v6 }
  0xab   : > { %v124_v8 = vpop.xlane.xlu0 %123 }
  0xac   : > { %313 = vrcp.f32 %v124_v8  ;;  %vm164_vm8 = vweird.f32 %v124_v8 }
  0xb9   : > { %v314_v9 = vpop.eup %313 }
  0xba   : > { %v129_v10 = vmul.f32 %v314_v9, %v127_v7 }
  0xbc   : > { %130 = vst [vmem:[#allocation4] sm:$0xff] %v129_v10 }
  0xc3   : > { %v143_v14 = vld [vmem:[#allocation4 + $0x1] ss:$0 sm:$0xff]  ;;  %v153_v17 = vld [vmem:[#allocation4 + $0x2] ss:$0 sm:$0xff] }
  0xc4   : > { %v144_v15 = vxor.u32 2147483648, %v143_v14  ;;  %v154_v19 = vxor.u32 2147483648, %v153_v17 }
  0xc6   : > { %v148_v16 = vmul.f32 %v144_v15, %v141_v13 }
  0xc8   : > { %149 = vadd.xlane.f32.xlu0 %v148_v16 }
 0x151   : > { %v150_v18 = vpop.xlane.xlu0 %149 }
 0x152   : > { %v151_v20 = vsel %vm147_vm6, %v150_v18, %v141_v13 }
 0x153   : > { %v158_v21 = vmul.f32 %v154_v19, %v151_v20 }
 0x155   : > { %159 = vadd.xlane.f32.xlu1 %v158_v21 }
 0x1de   : > { %v160_v22 = vpop.xlane.xlu1 %159 }
 0x1df   : > { %v161_v23 = vsel %vm157_vm7, %v160_v22, %v151_v20 }
 0x1e0   : > { %v163_v24 = vmul.f32 %v314_v9, %v161_v23 }
 0x1e2   : > { %v165_v25 = vsel %vm164_vm8, %v161_v23, %v163_v24 }
 0x1e3   : > { %166 = vst [vmem:[#allocation2] sm:$0xff] %v165_v25 }
 0x1ea   : > { %v171_v26 = vld [vmem:[#allocation2] sm:$0xf] }
 0x1eb   : > { %174 = vst [vmem:[%s108_s21] sm:$0xf] %v171_v26 }
 0x1f2   : > { %v200_v27 = vld [vmem:[%s108_s21] sm:$0xf] }
 0x1f3   : > { %201 = vst [vmem:[%s183_s25] sm:$0xf] %v200_v27 }
 0x1f4 PF: > { %s7_s8 = sadd.s32 1, %s337_s8   ;;  %s399_s6 = smov %s333_s7 }
 0x1f5   : > { %p4_p5 = scmp.ge.s32.totalorder %s7_s8, 4   ;;  %s400_s7 = smov %s402_s10 }
 0x1f7   :  { %6 = sbr.rel (!%p4_p5) target bundleno = 2 (0x2), region = 112 }

// kernel: reverse
= control target key start
LH: loop header
LB: loop body
LE: loop exit
PB: predicated region body
PF: predicated region fallthrough
CT: control target
= control target key end

     0   :  { %v2_v0 = vlaneseq  ;;  %s112_s0 = inlined_call_operand.vmem [shape: f32[2,3], index: 0, kind: input, shape index: {}]   ;;  %s113_s1 = inlined_call_operand.vmem [shape: f32[2,3], index: 1, kind: output, shape index: {}]  }
   0x2   :  { %v3_v1 = vsub.s32 2, %v2_v0 }
   0x4   :  { %4 = vset.pattern.permute.xlu0 %v3_v1 }
   0x5   :  { %v21_v2 = vld [vmem:[%s112_s0] sm:$0x3] }
   0x6   :  { %22 = vst [vmem:[#allocation1] sm:$0x3] %v21_v2 }
   0xd   :  { %v41_v3 = vld [vmem:[#allocation1] sm:$0x3] }
   0xe   :  { %42 = vst [vmem:[#allocation0] sm:$0x3] %v41_v3 }
  0x15   :  { %v43_v4 = vld [vmem:[#allocation0] sm:$0xff] }
  0x16   :  { %44 = vperm.xlu0 %4, %v43_v4  }
  0x91   :  { %v45_v5 = vpop.permute.xlu0 %44 }
  0x92   :  { %46 = vst [vmem:[#allocation2] sm:$0xff] %v45_v5 }
  0x99   :  { %v51_v6 = vld [vmem:[#allocation2] sm:$0x3] }
  0x9a   :  { %54 = vst [vmem:[#allocation3] sm:$0x3] %v51_v6 }
  0xa1   :  { %v71_v7 = vld [vmem:[#allocation3] sm:$0x3] }
  0xa2   :  { %72 = vst [vmem:[%s113_s1] sm:$0x3] %v71_v7 }

// kernel: custom-call.38
= control target key start
LH: loop header
LB: loop body
LE: loop exit
PB: predicated region body
PF: predicated region fallthrough
CT: control target
= control target key end

     0   :  { %s1740_s30 = smov 0   ;;  %s1742_s10 = smov 0   ;;  %s2066_s0 = inlined_call_operand.vmem [shape: f32[2,2,2], index: 0, kind: input, shape index: {}]   ;;  %s2067_s1 = inlined_call_operand.vmem [shape: f32[2,2,2], index: 1, kind: input, shape index: {}]   ;;  %s2068_s2 = inlined_call_operand.vmem [shape: f32[2,2,2], index: 2, kind: input, shape index: {}]   ;;  %s2069_s3 = inlined_call_operand.vmem [shape: f32[2,2,2], index: 3, kind: input, shape index: {}]   ;;  %s2070_s4 = inlined_call_operand.vmem [shape: f32[2,2], index: 4, kind: output, shape index: {0}]   ;;  %s2071_s5 = inlined_call_operand.vmem [shape: f32[2,2], index: 5, kind: output, shape index: {1}]   ;;  %s2072_s6 = inlined_call_operand.vmem [shape: f32[2,2,2], index: 6, kind: output, shape index: {2}]   ;;  %s2073_s7 = inlined_call_operand.vmem [shape: f32[2,2,2], index: 7, kind: output, shape index: {3}]   ;;  %s2074_s8 = inlined_call_operand.vmem [shape: f32[2,2,2], index: 8, kind: output, shape index: {4}]   ;;  %s2075_s9 = inlined_call_operand.vmem [shape: f32[2,2,2], index: 9, kind: output, shape index: {5}]  }
   0x1   :  { %s1744_s11 = smov 0  }
   0x2 LB: > { %s1756_s12 = sadd.s32 4294967295, %s1677_s11   ;;  %s1759_s13 = sadd.s32 1, %s1677_s11   ;;  %s1677_s11 = sphi %s1744_s11, %s2094_s11   ;;  %s1673_s10 = sphi %s1742_s10, %s2093_s10   ;;  %s1669_s30 = sphi %s1740_s30, %s2092_s30  }
   0x3   : > { %s20_s14 = sshrl.u32 %s1677_s11, 3  ;;  %s21_s15 = sshrl.u32 %s1759_s13, 3 }
   0x4   : > { %s22_s16 = ssub.s32 %s20_s14, %s21_s15  ;;  %s25_s17 = sadd.s32 1, %s1673_s10 }
   0x5   : > { %p23_p0 = scmp.eq.s32.totalorder %s22_s16, 0  ;;  %p35_p1 = scmp.ne.s32.totalorder %s1673_s10, %s1669_s30 }
   0x6   : > { %p36_p2 = scmp.eq.s32.totalorder %s1756_s12, 1  ;;  %p1538_p4 = scmp.ge.s32.totalorder %s1677_s11, 2 }
   0x7   : > { %s1768_s18 = scalar_select %p23_p0, %s1673_s10, %s25_s17  }
   0x8   : > { %p1770_p3 = por %p36_p2, %p35_p1  ;;  %86 = sbr.rel (%p1538_p4) target bundleno = 18 (0x12), region = 16 }
   0x9   : > { %2076 = sst [smem:[#allocation33_spill]] %s1768_s18  ;;  %s88_s20 = sand.u32 (!%p1538_p4), 1, %s1677_s11  }
   0xa   : > { %s1540_s21 = sshll.u32 (!%p1538_p4), %s1677_s11, 1  ;;  %s1539_s22 = sshll.u32 (!%p1538_p4), %s88_s20, 1 }
   0xb   : > { %s92_s25 = scalar_lea.vmem (!%p1538_p4), %s2066_s0, %s1540_s21  ;;  %s90_s26 = scalar_lea.vmem (!%p1538_p4), [#allocation1], %s1539_s22 }
   0xc   : > { %s131_s29 = scalar_lea.vmem (!%p1538_p4), %s2067_s1, %s1540_s21  ;;  %s170_s16 = scalar_lea.vmem (!%p1538_p4), %s2068_s2, %s1540_s21 }
   0xd   : > { %v109_v0 = vld [vmem:[%s92_s25] sm:$0x3]  ;;  %s129_s17 = scalar_lea.vmem [#allocation3], %s1539_s22  ;;  %s209_s23 = scalar_lea.vmem %s2069_s3, %s1540_s21 }
   0xe   : > { %110 = vst [vmem:[%s90_s26] sm:$0x3] %v109_v0  ;;  %v148_v1 = vld [vmem:[%s131_s29] sm:$0x3]  ;;  %s168_s24 = scalar_lea.vmem [#allocation5], %s1539_s22  ;;  %s207_s25 = scalar_lea.vmem [#allocation7], %s1539_s22 }
   0xf   : > { %149 = vst [vmem:[%s129_s17] sm:$0x3] %v148_v1  ;;  %v187_v2 = vld [vmem:[%s170_s16] sm:$0x3] }
  0x10   : > { %188 = vst [vmem:[%s168_s24] sm:$0x3] %v187_v2  ;;  %v226_v3 = vld [vmem:[%s209_s23] sm:$0x3] }
  0x11   : > { %227 = vst [vmem:[%s207_s25] sm:$0x3] %v226_v3 }
  0x12 PF: > { %p1547_p5 = scmp.ge.s32.totalorder %s1677_s11, 1  ;;  %p244_p6 = scmp.lt.s32.totalorder %s1677_s11, 3 }
  0x14   : > { %p245_p7 = pnand %p1547_p5, %p244_p6 }
  0x16   : > { %248 = sbr.rel (%p245_p7) target bundleno = 994 (0x3e2), region = 140 }
  0x1b   : > { %s267_s26 = sand.u32 1, %s1756_s12   ;;  %s285_s27 = sand.u32 1, %s1669_s30   ;;  %v349_v4 = vlaneseq  ;;  %v1687_v5 = vmov 0.0  }
  0x1c   : > { %s1793_s28 = sshll.u32 %s267_s26, 1  ;;  %s1795_s18 = sshll.u32 %s285_s27, 1  ;;  %344 = vst [vmem:[#allocation12] sm:$0xff] %v1687_v5  ;;  %345 = vst [vmem:[#allocation14] sm:$0xff] %v1687_v5 }
  0x1d   : > { %346 = vst [vmem:[#allocation16] sm:$0xff] %v1687_v5  ;;  %347 = vst [vmem:[#allocation18] sm:$0xff] %v1687_v5  ;;  %v1797_v6 = vand.u32 127, %v349_v4  ;;  %v1799_v7 = vshrl.u32 %v349_v4, 7  ;;  %s269_s11 = scalar_lea.vmem [#allocation1], %s1793_s28  ;;  %s273_s30 = scalar_lea.vmem [#allocation3], %s1793_s28 }
  0x1e   : > { %v313_v8 = vld [vmem:[%s269_s11] sm:$0x3]  ;;  %v318_v9 = vld [vmem:[%s273_s30] sm:$0x3]  ;;  %s277_s21 = scalar_lea.vmem [#allocation5], %s1793_s28  ;;  %s281_s22 = scalar_lea.vmem [#allocation7], %s1793_s28 }
  0x1f   : > { %314 = vst [vmem:[#allocation0] sm:$0x3] %v313_v8  ;;  %319 = vst [vmem:[#allocation2] sm:$0x3] %v318_v9  ;;  %v323_v10 = vld [vmem:[%s277_s21] sm:$0x3]  ;;  %v351_v6 = vmov %v1797_v6  ;;  %v354_v7 = vmov %v1799_v7 }
  0x20   : > { %v328_v11 = vld [vmem:[%s281_s22] sm:$0x3]  ;;  %324 = vst [vmem:[#allocation4] sm:$0x3] %v323_v10  ;;  %v364_v6 = vmov %v1797_v6  ;;  %v367_v7 = vmov %v1799_v7  ;;  %s332_s29 = smov [#allocation20]  ;;  %s335_s14 = smov [#allocation21]  ;;  %vm358_vm0 = vcmp.eq.s32.totalorder %v354_v7, %v351_v6 }
  0x21   : > { %329 = vst [vmem:[#allocation6] sm:$0x3] %v328_v11  ;;  %vm371_vm1 = vcmp.eq.s32.totalorder %v367_v7, %v364_v6  ;;  %s348_s15 = smov [#allocation12]  ;;  %s361_s16 = smov [#allocation18]  ;;  %vm1427_vm2 = vcmp.lt.s32.totalorder %v1797_v6, 2  ;;  %v1419_v6 = vmov %v1797_v6  ;;  %v1422_v7 = vmov %v1799_v7 }
  0x22   : > { %s338_s17 = smov [#allocation22]  ;;  %s341_s20 = smov [#allocation23]  ;;  %vm1432_vm3 = vcmp.eq.s32.totalorder %v1422_v7, %v1419_v6  ;;  %v1470_v6 = vmov %v1797_v6  ;;  %v1439_v7 = vmov %v1799_v7 }
  0x23   : > { %v355_v12 = vld [vmem:[%s348_s15] sm:$0x3]  ;;  %s1423_s30 = smov [#allocation20]  ;;  %s1440_s21 = smov [#allocation21]  ;;  %v1436_v6 = vmov %v1797_v6  ;;  %v1473_v7 = vmov %v1799_v7 }
  0x24   : > { %v368_v13 = vld [vmem:[%s361_s16] sm:$0x3]  ;;  %v359_v16 = vsel %vm358_vm0, 1.0, %v355_v12  ;;  %s1457_s22 = smov [#allocation22]  ;;  %v1453_v6 = vmov %v1797_v6  ;;  %v1456_v7 = vmov %v1799_v7  ;;  %vm1483_vm4 = vcmp.eq.s32.totalorder %v1473_v7, %v1470_v6 }
  0x25   : > { %v372_v17 = vsel %vm371_vm1, 1.0, %v368_v13  ;;  %360 = vst [vmem:[%s348_s15] sm:$0x3] %v359_v16 }
  0x26   : > { %v333_v14 = vld [vmem:[#allocation0] sm:$0xff]  ;;  %v336_v15 = vld [vmem:[#allocation2] sm:$0xff]  ;;  %373 = vst [vmem:[%s361_s16] sm:$0x3] %v372_v17 }
  0x27   : > { %334 = vst [vmem:[%s332_s29] sm:$0xff] %v333_v14  ;;  %337 = vst [vmem:[%s335_s14] sm:$0xff] %v336_v15  ;;  %v339_v18 = vld [vmem:[#allocation4] sm:$0xff]  ;;  %s1474_s29 = smov [#allocation23] }
  0x28   : > { %v342_v19 = vld [vmem:[#allocation6] sm:$0xff]  ;;  %340 = vst [vmem:[%s338_s17] sm:$0xff] %v339_v18 }
  0x29   : > { %343 = vst [vmem:[%s341_s20] sm:$0xff] %v342_v19 }
  0x2e   : > { %v1429_v20 = vld [vmem:[%s1423_s30] sm:$0x3] }
  0x2f   : > { %v1446_v21 = vld [vmem:[%s1440_s21] sm:$0x3]  ;;  %v1430_v22 = vsel %vm1427_vm2, %v1429_v20, 0.0 }
  0x30   : > { %v1447_v23 = vsel %vm1427_vm2, %v1446_v21, 0.0  ;;  %v1463_v24 = vld [vmem:[%s1457_s22] sm:$0x3]  ;;  %v1431_v26 = vmul.f32 %v1430_v22, %v1430_v22 }
  0x31   : > { %v1480_v25 = vld [vmem:[%s1474_s29] sm:$0x3]  ;;  %v1448_v27 = vmul.f32 %v1447_v23, %v1447_v23  ;;  %v1464_v28 = vsel %vm1427_vm2, %v1463_v24, 0.0 }
  0x32   : > { %v1481_v29 = vsel %vm1427_vm2, %v1480_v25, 0.0  ;;  %v1465_v30 = vmul.f32 %v1464_v28, %v1464_v28  ;;  %v1433_v33 = vsel %vm1432_vm3, 0.0, %v1431_v26 }
  0x33   : > { %v1450_v31 = vadd.f32 %v1448_v27, %v1431_v26  ;;  %v1482_v32 = vmul.f32 %v1481_v29, %v1481_v29  ;;  %v1449_v34 = vadd.f32 %v1448_v27, %v1433_v33 }
  0x35   : > { %v1467_v35 = vadd.f32 %v1465_v30, %v1450_v31  ;;  %v1466_v36 = vadd.f32 %v1465_v30, %v1449_v34  ;;  %v1484_v37 = vsel %vm1483_vm4, 0.0, %v1482_v32 }
  0x37   : > { %v1486_v38 = vadd.f32 %v1482_v32, %v1467_v35  ;;  %v1485_v39 = vadd.f32 %v1484_v37, %v1466_v36 }
  0x39   : > { %1487 = vadd.xlane.f32.xlu0 %v1486_v38 }
  0x3d   : > { %1495 = vadd.xlane.f32.xlu0 %v1485_v39 }
  0xc2   : > { %v1488_v40 = vpop.xlane.xlu0 %1487 }
  0xc3   : > { %v1489_v41 = vrot.slane %v1488_v40, 4 }
  0xc5   : > { %v1490_v42 = vadd.f32 %v1489_v41, %v1488_v40 }
  0xc6   : > { %v1496_v43 = vpop.xlane.xlu0 %1495 }
  0xc7   : > { %v1491_v44 = vrot.slane %v1490_v42, 2  ;;  %v1497_v45 = vrot.slane %v1496_v43, 4 }
  0xc9   : > { %v1498_v46 = vadd.f32 %v1497_v45, %v1496_v43  ;;  %v1492_v47 = vadd.f32 %v1491_v44, %v1490_v42 }
  0xcb   : > { %v1499_v48 = vrot.slane %v1498_v46, 2  ;;  %v1493_v50 = vrot.slane %v1492_v47, 1 }
  0xcd   : > { %v1500_v49 = vadd.f32 %v1499_v48, %v1498_v46  ;;  %v1494_v53 = vadd.f32 %v1493_v50, %v1492_v47 }
  0xcf   : > { %v1501_v51 = vrot.slane %v1500_v49, 1 }
  0xd1   : > { %v1502_v52 = vadd.f32 %v1501_v51, %v1500_v49 }
  0xd3   : > { %1588 = vpush %v1502_v52 }
  0xd4   : > { %1590 = vpush %v1494_v53 }
 0x104   : > { %s1589_s14 = spop %1588 }
 0x105   : > { %s1591_s15 = spop %1590 }
 0x106   : > { %s1505_s16 = smul.f32 1e-10, %s1591_s15 }
 0x108   : > { %p1506_p8 = scmp.le.f32.partialorder %s1589_s14, %s1505_s16 }
 0x109   : > { %s1833_s17 = smov (!%p1506_p8), 0  }
 0x10a   : > { %1509 = sbr.rel (%p1506_p8) target bundleno = 948 (0x3b4), region = 467 }
 0x10f LB: >> { %s1838_s20 = smov 0   ;;  %s1681_s17 = sphi %s1833_s17, %s2078_s17  }
 0x110 LB: >>> { %s478_s30 = smov [#allocation20]  ;;  %v482_v6 = vmov %v1797_v6  ;;  %v485_v7 = vmov %v1799_v7  ;;  %s498_s21 = smov [#allocation21]  ;;  %vm801_vm14 = vcmp.eq.s32.totalorder %v1799_v7, 0  ;;  %vm813_vm15 = vcmp.eq.s32.totalorder %v1799_v7, 1  ;;  %s1685_s20 = sphi %s1838_s20, %s477_s20  }
 0x111   : >>> { %v502_v6 = vmov %v1797_v6  ;;  %v505_v7 = vmov %v1799_v7  ;;  %v486_v54 = vld [vmem:[%s478_s30] sm:$0x3]  ;;  %vm489_vm5 = vcmp.eq.s32.totalorder %v485_v7, %v482_v6  ;;  %s518_s22 = smov [#allocation23]  ;;  %s479_s29 = smov [#allocation24] }
 0x112   : >>> { %vm509_vm6 = vcmp.eq.s32.totalorder %v505_v7, %v502_v6  ;;  %v522_v6 = vmov %v1797_v6  ;;  %v525_v7 = vmov %v1799_v7  ;;  %v490_v55 = vsel %vm489_vm5, %v486_v54, 0.0  ;;  %v506_v56 = vld [vmem:[%s498_s21] sm:$0x3]  ;;  %s499_s14 = smov [#allocation25]  ;;  %s519_s15 = smov [#allocation26] }
 0x113   : >>> { %vm529_vm7 = vcmp.eq.s32.totalorder %v525_v7, %v522_v6  ;;  %v491_v57 = vrot.slane %v490_v55, 4  ;;  %v510_v58 = vsel %vm509_vm6, %v506_v56, 0.0  ;;  %v526_v59 = vld [vmem:[%s518_s22] sm:$0x3]  ;;  %s542_s16 = smov [#allocation25]  ;;  %s540_s30 = smov [#allocation24]  ;;  %v591_v6 = vmov %v1797_v6 }
 0x114   : >>> { %v511_v60 = vrot.slane %v510_v58, 4  ;;  %v530_v61 = vsel %vm529_vm7, %v526_v59, 0.0  ;;  %s544_s21 = smov [#allocation26]  ;;  %s579_s22 = smov [#allocation27]  ;;  %v594_v7 = vmov %v1799_v7  ;;  %v606_v6 = vmov %v1797_v6 }
 0x115   : >>> { %v492_v62 = vadd.f32 %v491_v57, %v490_v55  ;;  %v531_v63 = vrot.slane %v530_v61, 4  ;;  %v609_v7 = vmov %v1799_v7  ;;  %vm596_vm12 = vcmp.eq.s32.totalorder %v594_v7, %v591_v6  ;;  %s1857_s24 = smov [#allocation22]  ;;  %s1863_s23 = smov [#allocation14] }
 0x116   : >>> { %v512_v0 = vadd.f32 %v511_v60, %v510_v58  ;;  %vm611_vm13 = vcmp.eq.s32.totalorder %v609_v7, %v606_v6  ;;  %s841_s11 = smov [#allocation31]  ;;  %s1869_s27 = smov [#allocation18]  ;;  %v627_v55 = vld [vmem:[%s1857_s24] sm:$0x3]  ;;  %v704_v6 = vmov %v1797_v6  ;;  %v707_v7 = vmov %v1799_v7 }
 0x117   : >>> { %v493_v1 = vrot.slane %v492_v62, 2  ;;  %v532_v2 = vadd.f32 %v531_v63, %v530_v61  ;;  %v850_v58 = vld [vmem:[%s1863_s23] sm:$0x3]  ;;  %s619_s26 = smov [#allocation32]  ;;  %s843_s25 = smov [#allocation32]  ;;  %v718_v6 = vmov %v1797_v6  ;;  %v721_v7 = vmov %v1799_v7 }
 0x118   : >>> { %v513_v3 = vrot.slane %v512_v0, 2  ;;  %v852_v61 = vld [vmem:[%s1869_s27] sm:$0x3]  ;;  %vm711_vm0 = vcmp.eq.s32.totalorder %v707_v7, %v704_v6  ;;  %v677_v6 = vmov %v1797_v6  ;;  %v680_v7 = vmov %v1799_v7  ;;  %s477_s20 = sadd.s32 1, %s1685_s20  }
 0x119   : >>> { %v494_v4 = vadd.f32 %v493_v1, %v492_v62  ;;  %v533_v5 = vrot.slane %v532_v2, 2  ;;  %v691_v6 = vmov %v1797_v6  ;;  %v694_v7 = vmov %v1799_v7  ;;  %p474_p9 = scmp.ge.s32.totalorder %s477_s20, 3  }
 0x11a   : >>> { %v514_v8 = vadd.f32 %v513_v3, %v512_v0  ;;  %vm726_vm1 = vcmp.eq.s32.totalorder %v721_v7, %v718_v6  ;;  %vm685_vm3 = vcmp.eq.s32.totalorder %v680_v7, %v677_v6  ;;  %vm698_vm4 = vcmp.eq.s32.totalorder %v694_v7, %v691_v6 }
 0x11b   : >>> { %v495_v9 = vrot.slane %v494_v4, 1  ;;  %v534_v10 = vadd.f32 %v533_v5, %v532_v2  ;;  %vm740_vm5 = vcmp.eq.s32.totalorder %v1797_v6, 0  ;;  %vm744_vm6 = vcmp.eq.s32.totalorder %v1797_v6, 1 }
 0x11c   : >>> { %v515_v11 = vrot.slane %v514_v8, 1  ;;  %v378_v6 = vmov (%p474_p9), %v1797_v6  ;;  %v381_v7 = vmov (%p474_p9), %v1799_v7 }
 0x11d   : >>> { %v496_v12 = vadd.f32 %v495_v9, %v494_v4  ;;  %v535_v13 = vrot.slane %v534_v10, 1  ;;  %v431_v6 = vmov (%p474_p9), %v1797_v6  ;;  %vm393_vm7 = vcmp.eq.s32.totalorder (%p474_p9), %v381_v7, %v378_v6 }
 0x11e   : >>> { %v516_v14 = vadd.f32 %v515_v11, %v514_v8  ;;  %v434_v7 = vmov (%p474_p9), %v1799_v7  ;;  %v397_v6 = vmov (%p474_p9), %v1797_v6 }
 0x11f   : >>> { %497 = vst [vmem:[%s479_s29] sm:$0x1] %v496_v12  ;;  %v536_v15 = vadd.f32 %v535_v13, %v534_v10  ;;  %s581_s29 = smov [#allocation28]  ;;  %v400_v7 = vmov (%p474_p9), %v1799_v7  ;;  %v414_v6 = vmov (%p474_p9), %v1797_v6 }
 0x120   : >>> { %517 = vst [vmem:[%s499_s14] sm:$0x1] %v516_v14  ;;  %s538_s14 = smov [#allocation29]  ;;  %v417_v7 = vmov (%p474_p9), %v1799_v7 }
 0x121   : >>> { %537 = vst [vmem:[%s519_s15] sm:$0x1] %v536_v15  ;;  %s539_s15 = smov [#allocation30]  ;;  %s583_s14 = smov %s538_s14 }
 0x122   : >>> { %s585_s15 = smov %s539_s15 }
 0x126   : >>> { %v541_v18 = vld [vmem:[%s540_s30] sm:$0xff]  ;;  %s602_s30 = smov [#allocation30] }
 0x127   : >>> { %v543_v16 = vld [vmem:[%s542_s16] sm:$0xff]  ;;  %v564_v33 = vand.u32 2147483647, %v541_v18  ;;  %s587_s16 = smov [#allocation29] }
 0x128   : >>> { %v547_v17 = vmul.f32 2.0, %v543_v16  ;;  %v545_v19 = vld [vmem:[%s544_s21] sm:$0xff]  ;;  %v565_v36 = vand.u32 2147483647, %v543_v16  ;;  %s600_s21 = smov [#allocation31] }
 0x129   : >>> { %v546_v20 = vsub.f32 %v545_v19, %v541_v18  ;;  %v566_v34 = vand.u32 2147483647, %v545_v19 }
 0x12a   : >>> { %1639 = vrcp.f32 %v547_v17 }
 0x12b   : >>> { %v567_v35 = vmin.f32 %v564_v33, %v566_v34 }
 0x12d   : >>> { %v568_v37 = vmul.f32 1.1920929e-08, %v567_v35 }
 0x12f   : >>> { %vm569_vm11 = vcmp.le.f32.partialorder %v565_v36, %v568_v37 }
 0x137   : >>> { %v1640_v21 = vpop.eup %1639 }
 0x138   : >>> { %v549_v22 = vmul.f32 %v1640_v21, %v546_v20 }
 0x13a   : >>> { %v551_v23 = vmul.f32 %v549_v22, %v549_v22  ;;  %vm550_vm10 = vcmp.ge.f32.partialorder %v549_v22, 0.0 }
 0x13c   : >>> { %v552_v24 = vadd.f32 1.0, %v551_v23 }
 0x13e   : >>> { %1641 = vrsqrt.f32 %v552_v24  ;;  %vm555_vm8 = vcmp.eq.f32.partialorder %v552_v24, inf  ;;  %v558_v26 = vand.u32 2147483648, %v552_v24  ;;  %vm557_vm9 = vcmp.eq.f32.partialorder %v552_v24, 0.0 }
 0x14b   : >>> { %v1642_v25 = vpop.eup %1641 }
 0x14c   : >>> { %v554_v27 = vmul.f32 %v1642_v25, %v552_v24 }
 0x14e   : >>> { %v556_v28 = vsel %vm555_vm8, %v552_v24, %v554_v27  ;;  %vm446_vm8 = vcmp.eq.s32.totalorder (%p474_p9), %v434_v7, %v431_v6 }
 0x14f   : >>> { %v559_v29 = vsel %vm557_vm9, %v558_v26, %v556_v28 }
 0x150   : >>> { %v560_v30 = vxor.u32 2147483648, %v559_v29 }
 0x152   : >>> { %v561_v31 = vsel %vm550_vm10, %v559_v29, %v560_v30 }
 0x153   : >>> { %v562_v32 = vadd.f32 %v561_v31, %v549_v22 }
 0x155   : >>> { %1643 = vrcp.f32 %v562_v32 }
 0x162   : >>> { %v1644_v38 = vpop.eup %1643 }
 0x163   : >>> { %v570_v39 = vsel %vm569_vm11, 0.0, %v1644_v38 }
 0x164   : >>> { %v571_v40 = vmul.f32 %v570_v39, %v570_v39  ;;  %v575_v41 = vmul.f32 %v570_v39, %v543_v16 }
 0x166   : >>> { %v572_v42 = vadd.f32 1.0, %v571_v40  ;;  %v576_v43 = vsub.f32 %v541_v18, %v575_v41  ;;  %v578_v44 = vadd.f32 %v575_v41, %v545_v19 }
 0x168   : >>> { %1645 = vrsqrt.f32 %v572_v42  ;;  %580 = vst [vmem:[%s579_s22] sm:$0xff] %v576_v43  ;;  %582 = vst [vmem:[%s581_s29] sm:$0xff] %v578_v44  ;;  %s617_s22 = smov [#allocation31]  ;;  %s1853_s29 = smov [#allocation20] }
 0x169   : >>> { %v625_v53 = vld [vmem:[%s1853_s29] sm:$0x3] }
 0x175   : >>> { %v1646_v45 = vpop.eup %1645 }
 0x176   : >>> { %584 = vst [vmem:[%s583_s14] sm:$0xff] %v1646_v45  ;;  %v574_v46 = vmul.f32 %v1646_v45, %v570_v39  ;;  %s615_s14 = smov [#allocation32] }
 0x178   : >>> { %586 = vst [vmem:[%s585_s15] sm:$0xff] %v574_v46  ;;  %s1855_s15 = smov [#allocation21] }
 0x179   : >>> { %v626_v54 = vld [vmem:[%s1855_s15] sm:$0x3] }
 0x17d   : >>> { %v588_v47 = vld [vmem:[%s587_s16] ss:$0 sm:$0xff]  ;;  %s1859_s16 = smov [#allocation23] }
 0x17e   : >>> { %v597_v48 = vsel %vm596_vm12, %v588_v47, 0.0  ;;  %v628_v56 = vld [vmem:[%s1859_s16] sm:$0x3] }
 0x17f   : >>> { %598 = vadd.xlane.f32.xlu0 %v597_v48  ;;  %v603_v49 = vld [vmem:[%s602_s30] ss:$0 sm:$0xff]  ;;  %s1861_s30 = smov [#allocation12] }
 0x180   : >>> { %v612_v50 = vsel %vm611_vm13, %v603_v49, 0.0  ;;  %v849_v57 = vld [vmem:[%s1861_s30] sm:$0x3] }
 0x183   : >>> { %613 = vadd.xlane.f32.xlu0 %v612_v50 }
 0x208   : >>> { %v599_v51 = vpop.xlane.xlu0 %598 }
 0x209   : >>> { %601 = vst [vmem:[%s600_s21] sm:$0xff] %v599_v51  ;;  %s1865_s21 = smov [#allocation16] }
 0x20a   : >>> { %v851_v59 = vld [vmem:[%s1865_s21] sm:$0x3] }
 0x20c   : >>> { %v614_v52 = vpop.xlane.xlu0 %613 }
 0x20d   : >>> { %616 = vst [vmem:[%s615_s14] sm:$0xff] %v614_v52  ;;  %s1889_s14 = smov [#allocation23] }
 0x210   : >>> { %v618_v60 = vld [vmem:[%s617_s22] sm:$0xff]  ;;  %s1887_s22 = smov [#allocation22] }
 0x211   : >>> { %v842_v62 = vld [vmem:[%s841_s11] sm:$0xff]  ;;  %v629_v63 = vmul.f32 %v625_v53, %v618_v60  ;;  %v632_v0 = vmul.f32 %v626_v54, %v618_v60  ;;  %v636_v1 = vmul.f32 %v627_v55, %v618_v60  ;;  %v639_v2 = vmul.f32 %v628_v56, %v618_v60  ;;  %s1885_s11 = smov [#allocation12] }
 0x212   : >>> { %v853_v3 = vmul.f32 %v849_v57, %v842_v62  ;;  %v856_v4 = vmul.f32 %v850_v58, %v842_v62  ;;  %v860_v5 = vmul.f32 %v851_v59, %v842_v62  ;;  %v863_v8 = vmul.f32 %v852_v61, %v842_v62 }
 0x214   : >>> { %v620_v9 = vld [vmem:[%s619_s26] sm:$0xff]  ;;  %s647_s26 = smov [#allocation30] }
 0x215   : >>> { %v844_v10 = vld [vmem:[%s843_s25] sm:$0xff]  ;;  %v630_v11 = vmul.f32 %v627_v55, %v620_v9  ;;  %v633_v12 = vmul.f32 %v628_v56, %v620_v9  ;;  %v635_v13 = vmul.f32 %v625_v53, %v620_v9  ;;  %v638_v14 = vmul.f32 %v626_v54, %v620_v9  ;;  %s645_s25 = smov [#allocation29] }
 0x216   : >>> { %v854_v15 = vmul.f32 %v851_v59, %v844_v10  ;;  %v857_v16 = vmul.f32 %v852_v61, %v844_v10  ;;  %v859_v17 = vmul.f32 %v849_v57, %v844_v10  ;;  %v862_v18 = vmul.f32 %v850_v58, %v844_v10  ;;  %v646_v27 = vld [vmem:[%s645_s25] ss:$0 sm:$0xff]  ;;  %s674_s25 = smov [#allocation27] }
 0x217   : >>> { %v631_v19 = vsub.f32 %v629_v63, %v630_v11  ;;  %v634_v20 = vsub.f32 %v632_v0, %v633_v12  ;;  %v637_v21 = vadd.f32 %v636_v1, %v635_v13  ;;  %v640_v22 = vadd.f32 %v639_v2, %v638_v14  ;;  %v648_v28 = vld [vmem:[%s647_s26] ss:$0 sm:$0xff]  ;;  %s673_s26 = smov [#allocation20] }
 0x218   : >>> { %v855_v23 = vsub.f32 %v853_v3, %v854_v15  ;;  %v858_v24 = vsub.f32 %v856_v4, %v857_v16  ;;  %v861_v25 = vadd.f32 %v860_v5, %v859_v17  ;;  %v864_v26 = vadd.f32 %v863_v8, %v862_v18  ;;  %v681_v63 = vld [vmem:[%s674_s25] ss:$0 sm:$0xff]  ;;  %s917_s25 = sadd.s32 (%p474_p9), 1, %s1681_s17  }
 0x219   : >>> { %642 = vst [vmem:[%s1855_s15] sm:$0x3] %v634_v20  ;;  %644 = vst [vmem:[%s1859_s16] sm:$0x3] %v640_v22  ;;  %s1891_s15 = smov [#allocation20]  ;;  %s715_s16 = smov [#allocation28] }
 0x21a   : >>> { %641 = vst [vmem:[%s1853_s29] sm:$0x3] %v631_v19  ;;  %643 = vst [vmem:[%s1857_s24] sm:$0x3] %v637_v21  ;;  %s1893_s24 = smov [#allocation16]  ;;  %s1901_s29 = smov [#allocation21]  ;;  %v722_v59 = vld [vmem:[%s715_s16] ss:$0 sm:$0xff] }
 0x21b   : >>> { %865 = vst [vmem:[%s1861_s30] sm:$0x3] %v855_v23  ;;  %866 = vst [vmem:[%s1863_s23] sm:$0x3] %v858_v24  ;;  %s1895_s23 = smov [#allocation14]  ;;  %s701_s30 = smov [#allocation22] }
 0x21c   : >>> { %867 = vst [vmem:[%s1865_s21] sm:$0x3] %v861_v25  ;;  %868 = vst [vmem:[%s1869_s27] sm:$0x3] %v864_v26  ;;  %s1899_s27 = smov [#allocation18]  ;;  %s714_s21 = smov [#allocation23] }
 0x21d   : >>> { %s817_s16 = smov [#allocation21]  ;;  %p470_p10 = scmp.ge.s32.totalorder (%p474_p9), %s917_s25, 15 }
 0x21e   : >> { %s2078_s17 = smov (%p474_p9), %s917_s25 }
 0x220   : >>> { %v656_v30 = vld [vmem:[%s1889_s14] sm:$0x3] }
 0x221   : >>> { %v655_v29 = vld [vmem:[%s1887_s22] sm:$0x3]  ;;  %v664_v36 = vmul.f32 %v656_v30, %v648_v28  ;;  %v667_v42 = vmul.f32 %v656_v30, %v646_v27 }
 0x222   : >>> { %v653_v31 = vld [vmem:[%s1891_s15] sm:$0x3]  ;;  %v663_v35 = vmul.f32 %v655_v29, %v646_v27  ;;  %v666_v37 = vmul.f32 %v655_v29, %v648_v28 }
 0x223   : >>> { %v871_v32 = vld [vmem:[%s1885_s11] ss:$0 sm:$0xff]  ;;  %v1567_v34 = vld [vmem:[%s1885_s11 + $0x1] ss:$0 sm:$0xff]  ;;  %v657_v48 = vmul.f32 %v653_v31, %v646_v27  ;;  %v660_v49 = vmul.f32 %v653_v31, %v648_v28 }
 0x224   : >>> { %v1566_v33 = vld [vmem:[%s1885_s11 - $0x1] sm:$0x2]  ;;  %v1569_v40 = vld [vmem:[%s1893_s24 + $0x1] sm:$0x1]  ;;  %v665_v47 = vsub.f32 %v663_v35, %v664_v36  ;;  %v668_v53 = vadd.f32 %v667_v42, %v666_v37 }
 0x225   : >>> { %v878_v38 = vsel %vm801_vm14, %v871_v32, %v1566_v33  ;;  %v882_v39 = vld [vmem:[%s1893_s24] ss:$0 sm:$0xff]  ;;  %v890_v43 = vsel %vm813_vm15, %v1567_v34, %v1569_v40  ;;  %v1571_v45 = vld [vmem:[%s1895_s23 + $0x1] ss:$0 sm:$0xff] }
 0x226   : >>> { %v895_v41 = vld [vmem:[%s1895_s23] ss:$0 sm:$0xff]  ;;  %881 = vst [vmem:[%s1885_s11] sm:$0x3] %v878_v38  ;;  %892 = vst [vmem:[%s1893_s24] sm:$0x3] %v890_v43  ;;  %v1573_v51 = vld [vmem:[%s1899_s27 + $0x1] sm:$0x1] }
 0x227   : >>> { %v1570_v44 = vld [vmem:[%s1895_s23 - $0x1] sm:$0x2]  ;;  %1568 = vst [vmem:[%s1885_s11 + $0x1] sm:$0x1] %v882_v39  ;;  %v914_v54 = vsel %vm813_vm15, %v1571_v45, %v1573_v51  ;;  %671 = vst [vmem:[%s1887_s22] sm:$0x3] %v665_v47  ;;  %s688_s11 = smov [#allocation21] }
 0x228   : >>> { %v906_v46 = vld [vmem:[%s1899_s27] ss:$0 sm:$0xff]  ;;  %v902_v50 = vsel %vm801_vm14, %v895_v41, %v1570_v44  ;;  %672 = vst [vmem:[%s1889_s14] sm:$0x3] %v668_v53  ;;  %s1943_s22 = smov [#allocation22]  ;;  %s1688_s14 = smov 1  }
 0x229   : >>> { %v654_v52 = vld [vmem:[%s1901_s29] sm:$0x3]  ;;  %905 = vst [vmem:[%s1895_s23] sm:$0x3] %v902_v50  ;;  %916 = vst [vmem:[%s1899_s27] sm:$0x3] %v914_v54  ;;  %s730_s24 = smov [#allocation21]  ;;  %s1946_s27 = smov [#allocation23] }
 0x22a   : >>> { %v658_v55 = vmul.f32 %v654_v52, %v648_v28  ;;  %v661_v56 = vmul.f32 %v654_v52, %v646_v27  ;;  %1572 = vst [vmem:[%s1895_s23 + $0x1] sm:$0x1] %v906_v46  ;;  %s1689_s23 = smov 127  }
 0x22c   : >>> { %v659_v57 = vsub.f32 %v657_v48, %v658_v55  ;;  %v662_v58 = vadd.f32 %v661_v56, %v660_v49 }
 0x22e   : >>> { %669 = vst [vmem:[%s1891_s15] sm:$0x3] %v659_v57  ;;  %670 = vst [vmem:[%s1901_s29] sm:$0x3] %v662_v58  ;;  %v708_v60 = vld [vmem:[%s701_s30] sm:$0x3]  ;;  %s729_s15 = smov [#allocation20]  ;;  %s793_s29 = smov [#allocation20] }
 0x22f   : >>> { %v712_v61 = vsel %vm711_vm0, 0.0, %v708_v60  ;;  %v723_v62 = vld [vmem:[%s714_s21] sm:$0x3] }
 0x230   : >>> { %713 = vst [vmem:[%s701_s30] sm:$0x3] %v712_v61  ;;  %v727_v0 = vsel %vm726_vm1, %v722_v59, %v723_v62  ;;  %s794_s30 = smov [#allocation22] }
 0x231   : >>> { %728 = vst [vmem:[%s714_s21] sm:$0x3] %v727_v0  ;;  %s818_s21 = smov [#allocation23] }
 0x235   : >>> { %v682_v1 = vld [vmem:[%s673_s26] sm:$0x3] }
 0x236   : >>> { %v695_v2 = vld [vmem:[%s688_s11] sm:$0x3]  ;;  %v686_v3 = vsel %vm685_vm3, %v681_v63, %v682_v1 }
 0x237   : >>> { %v699_v4 = vsel %vm698_vm4, 0.0, %v695_v2  ;;  %687 = vst [vmem:[%s673_s26] sm:$0x3] %v686_v3  ;;  %v767_v5 = vld [vmem:[%s1943_s22] sm:$0x3]  ;;  %s382_s26 = smov (%p474_p9), [#allocation20] }
 0x238   : >>> { %700 = vst [vmem:[%s688_s11] sm:$0x3] %v699_v4  ;;  %768 = vrot.lane.b32.xlu0 %v767_v5, %s1688_s14  ;;  %v763_v11 = vld [vmem:[%s1946_s27] sm:$0x3]  ;;  %s401_s11 = smov (%p474_p9), [#allocation21] }
 0x239   : >>> { %v784_v12 = vld [vmem:[%s1946_s27] sm:$0x3] }
 0x23a   : >>> { %v766_v30 = vld [vmem:[%s1943_s22] sm:$0x3] }
 0x23e   : >>> { %v735_v8 = vld [vmem:[%s729_s15] sm:$0x3] }
 0x23f   : >>> { %736 = vrot.lane.b32.xlu1 %v735_v8, %s1688_s14  ;;  %v731_v9 = vld [vmem:[%s730_s24] sm:$0x3] }
 0x240   : >>> { %v752_v10 = vld [vmem:[%s730_s24] sm:$0x3] }
 0x241   : >>> { %v734_v18 = vld [vmem:[%s729_s15] sm:$0x3] }
 0x243   : >>> { %732 = vrot.lane.b32.xlu1 %v731_v9, %s1688_s14 }
 0x247   : >>> { %753 = vrot.lane.b32.xlu1 %v752_v10, %s1689_s23 }
 0x24b   : >>> { %764 = vrot.lane.b32.xlu1 %v763_v11, %s1688_s14  ;;  %s435_s14 = smov (%p474_p9), [#allocation23] }
 0x24f   : >>> { %785 = vrot.lane.b32.xlu1 %v784_v12, %s1689_s23 }
 0x2aa   : >>> { %v769_v20 = vpop.permute.xlu0 %768 }
 0x2ab   : >>> { %v773_v22 = vsel %vm740_vm5, %v767_v5, %v769_v20 }
 0x2b1   : >>> { %v737_v13 = vpop.permute.xlu1 %736 }
 0x2b2   : >>> { %v741_v14 = vsel %vm740_vm5, %v735_v8, %v737_v13 }
 0x2b5   : >>> { %v733_v15 = vpop.permute.xlu1 %732 }
 0x2b6   : >>> { %v745_v16 = vsel %vm744_vm6, %v733_v15, %v741_v14 }
 0x2b7   : >>> { %v751_v17 = vsel %vm1427_vm2, %v745_v16, 0.0 }
 0x2b8   : >>> { %759 = vst [vmem:[%s729_s15] sm:$0x3] %v751_v17 }
 0x2b9   : >>> { %v754_v19 = vpop.permute.xlu1 %753 }
 0x2ba   : >>> { %v758_v21 = vsel %vm744_vm6, %v734_v18, %v754_v19 }
 0x2bb   : >>> { %760 = vst [vmem:[%s730_s24] sm:$0x3] %v758_v21 }
 0x2bd   : >>> { %v765_v23 = vpop.permute.xlu1 %764 }
 0x2be   : >>> { %v777_v24 = vsel %vm744_vm6, %v765_v23, %v773_v22 }
 0x2bf   : >>> { %v795_v25 = vld [vmem:[%s793_s29] ss:$0 sm:$0xff]  ;;  %v1559_v27 = vld [vmem:[%s793_s29 + $0x1] ss:$0 sm:$0xff]  ;;  %v783_v29 = vsel %vm1427_vm2, %v777_v24, 0.0 }
 0x2c0   : >>> { %v1558_v26 = vld [vmem:[%s793_s29 - $0x1] sm:$0x2]  ;;  %791 = vst [vmem:[%s1943_s22] sm:$0x3] %v783_v29  ;;  %s418_s22 = smov (%p474_p9), [#allocation22] }
 0x2c1   : >>> { %v802_v28 = vsel %vm801_vm14, %v795_v25, %v1558_v26  ;;  %v786_v31 = vpop.permute.xlu1 %785 }
 0x2c2   : >>> { %805 = vst [vmem:[%s793_s29] sm:$0x3] %v802_v28  ;;  %v819_v32 = vld [vmem:[%s817_s16] ss:$0 sm:$0xff]  ;;  %v1563_v34 = vld [vmem:[%s817_s16 + $0x1] ss:$0 sm:$0xff]  ;;  %v790_v35 = vsel %vm744_vm6, %v766_v30, %v786_v31 }
 0x2c3   : >>> { %v1562_v33 = vld [vmem:[%s817_s16 - $0x1] sm:$0x2]  ;;  %792 = vst [vmem:[%s1946_s27] sm:$0x3] %v790_v35 }
 0x2c4   : >>> { %v826_v36 = vsel %vm801_vm14, %v819_v32, %v1562_v33 }
 0x2c5   : >>> { %829 = vst [vmem:[%s817_s16] sm:$0x3] %v826_v36 }
 0x2c7   : >>> { %v806_v37 = vld [vmem:[%s794_s30] ss:$0 sm:$0xff]  ;;  %v1561_v38 = vld [vmem:[%s794_s30 + $0x1] sm:$0x1] }
 0x2c8   : >>> { %1560 = vst [vmem:[%s793_s29 + $0x1] sm:$0x1] %v806_v37  ;;  %v814_v39 = vsel %vm813_vm15, %v1559_v27, %v1561_v38 }
 0x2c9   : >>> { %816 = vst [vmem:[%s794_s30] sm:$0x3] %v814_v39 }
 0x2ca   : >>> { %v830_v40 = vld [vmem:[%s818_s21] ss:$0 sm:$0xff]  ;;  %v1565_v41 = vld [vmem:[%s818_s21 + $0x1] sm:$0x1] }
 0x2cb   : >>> { %1564 = vst [vmem:[%s817_s16 + $0x1] sm:$0x1] %v830_v40  ;;  %v838_v42 = vsel %vm813_vm15, %v1563_v34, %v1565_v41 }
 0x2cc   : >>> { %840 = vst [vmem:[%s818_s21] sm:$0x3] %v838_v42  ;;  %476 = sbr.rel (!%p474_p9) target bundleno = 272 (0x110), region = 462 }
 0x2cf   : >> { %v388_v43 = vld [vmem:[%s382_s26] sm:$0x3] (%p474_p9) }
 0x2d0   : >> { %v389_v45 = vsel (%p474_p9), %vm1427_vm2, %v388_v43, 0.0  ;;  %v424_v47 = vld [vmem:[%s418_s22] sm:$0x3] (%p474_p9) }
 0x2d1   : >> { %v390_v49 = vmul.f32 %v389_v45, %v389_v45  ;;  %v425_v51 = vsel %vm1427_vm2, %v424_v47, 0.0 }
 0x2d2   : >> { %v407_v44 = vld [vmem:[%s401_s11] sm:$0x3]  ;;  %v426_v53 = vmul.f32 %v425_v51, %v425_v51 }
 0x2d3   : >> { %v408_v46 = vsel %vm1427_vm2, %v407_v44, 0.0  ;;  %v441_v48 = vld [vmem:[%s435_s14] sm:$0x3]  ;;  %v394_v56 = vsel %vm393_vm7, 0.0, %v390_v49 }
 0x2d4   : >> { %v409_v50 = vmul.f32 %v408_v46, %v408_v46  ;;  %v442_v52 = vsel %vm1427_vm2, %v441_v48, 0.0 }
 0x2d5   : >> { %v443_v55 = vmul.f32 %v442_v52, %v442_v52 }
 0x2d6   : >> { %v411_v54 = vadd.f32 %v409_v50, %v390_v49  ;;  %v410_v57 = vadd.f32 %v409_v50, %v394_v56 }
 0x2d7   : >> { %v447_v60 = vsel %vm446_vm8, 0.0, %v443_v55 }
 0x2d8   : >> { %v428_v58 = vadd.f32 %v426_v53, %v411_v54  ;;  %v427_v59 = vadd.f32 %v426_v53, %v410_v57 }
 0x2da   : >> { %v449_v61 = vadd.f32 %v443_v55, %v428_v58  ;;  %v448_v62 = vadd.f32 %v447_v60, %v427_v59 }
 0x2dc   : >> { %450 = vadd.xlane.f32.xlu0 %v449_v61 }
 0x2e0   : >> { %458 = vadd.xlane.f32.xlu0 %v448_v62 }
 0x365   : >> { %v451_v63 = vpop.xlane.xlu0 %450 }
 0x366   : >> { %v452_v0 = vrot.slane %v451_v63, 4 }
 0x368   : >> { %v453_v1 = vadd.f32 %v452_v0, %v451_v63 }
 0x369   : >> { %v459_v2 = vpop.xlane.xlu0 %458 }
 0x36a   : >> { %v454_v3 = vrot.slane %v453_v1, 2  ;;  %v460_v4 = vrot.slane %v459_v2, 4 }
 0x36c   : >> { %v461_v5 = vadd.f32 %v460_v4, %v459_v2  ;;  %v455_v8 = vadd.f32 %v454_v3, %v453_v1 }
 0x36e   : >> { %v462_v9 = vrot.slane %v461_v5, 2  ;;  %v456_v11 = vrot.slane %v455_v8, 1 }
 0x370   : >> { %v463_v10 = vadd.f32 %v462_v9, %v461_v5  ;;  %v457_v14 = vadd.f32 %v456_v11, %v455_v8 }
 0x372   : >> { %v464_v12 = vrot.slane %v463_v10, 1 }
 0x374   : >> { %v465_v13 = vadd.f32 %v464_v12, %v463_v10 }
 0x376   : >> { %1592 = vpush %v465_v13 }
 0x377   : >> { %1594 = vpush %v457_v14 }
 0x3a7   : >> { %s1593_s20 = spop %1592 }
 0x3a8   : >> { %s1595_s15 = spop %1594 }
 0x3a9   : >> { %s468_s24 = smul.f32 1e-10, %s1595_s15 }
 0x3ab   : >> { %p469_p11 = scmp.le.f32.partialorder %s1593_s20, %s468_s24 }
 0x3ad   : >> { %p471_p12 = por %p470_p10, %p469_p11 }
 0x3af   : > { %919 = sbr.rel (!%p471_p12) target bundleno = 271 (0x10f), region = 473 }
 0x3b4 PF: > { %s924_s23 = smov [#allocation20]  ;;  %v928_v6 = vmov %v1797_v6  ;;  %v931_v7 = vmov %v1799_v7  ;;  %v984_v15 = vld [vmem:[#allocation12] sm:$0x3]  ;;  %v992_v16 = vld [vmem:[#allocation14] sm:$0x3]  ;;  %s2079_s17 = scalar_lea.vmem [#allocation13], %s1793_s28 }
 0x3b5   : > { %v948_v6 = vmov %v1797_v6  ;;  %v951_v7 = vmov %v1799_v7  ;;  %v932_v17 = vld [vmem:[%s924_s23] sm:$0x3]  ;;  %vm935_vm9 = vcmp.eq.s32.totalorder %v931_v7, %v928_v6  ;;  %987 = vst [vmem:[%s2079_s17] sm:$0x3] %v984_v15  ;;  %s2080_s27 = scalar_lea.vmem [#allocation15], %s1793_s28  ;;  %s944_s29 = smov [#allocation23] }
 0x3b6   : > { %vm955_vm10 = vcmp.eq.s32.totalorder %v951_v7, %v948_v6  ;;  %995 = vst [vmem:[%s2080_s27] sm:$0x3] %v992_v16  ;;  %v1000_v18 = vld [vmem:[#allocation16] sm:$0x3]  ;;  %v936_v19 = vsel %vm935_vm9, %v932_v17, 0.0  ;;  %s2081_s16 = scalar_lea.vmem [#allocation17], %s1793_s28  ;;  %s2082_s30 = scalar_lea.vmem [#allocation19], %s1793_s28 }
 0x3b7   : > { %1003 = vst [vmem:[%s2081_s16] sm:$0x3] %v1000_v18  ;;  %v1008_v20 = vld [vmem:[#allocation18] sm:$0x3]  ;;  %v937_v21 = vrot.slane %v936_v19, 4  ;;  %v952_v22 = vld [vmem:[%s944_s29] sm:$0x3] }
 0x3b8   : > { %1011 = vst [vmem:[%s2082_s30] sm:$0x3] %v1008_v20  ;;  %v956_v23 = vsel %vm955_vm10, %v952_v22, 0.0  ;;  %s920_s21 = sand.u32 7, %s1756_s12   ;;  %s2083_s11 = scalar_lea.vmem [#allocation9], %s1795_s18 }
 0x3b9   : > { %v938_v24 = vadd.f32 %v937_v21, %v936_v19  ;;  %v957_v25 = vrot.slane %v956_v23, 4  ;;  %s921_s25 = scalar_lea.vmem [#allocation8], %s920_s21  ;;  %s923_s26 = scalar_lea.vmem [#allocation10], %s920_s21 }
 0x3ba   : > { %s925_s25 = smov %s921_s25  ;;  %s945_s26 = smov %s923_s26 }
 0x3bb   : > { %v939_v26 = vrot.slane %v938_v24, 2  ;;  %v958_v6 = vadd.f32 %v957_v25, %v956_v23  ;;  %s2084_s22 = scalar_lea.vmem [#allocation11], %s1795_s18  ;;  %s1039_s14 = sshrl.u32 (%p1770_p3), %s1756_s12, 3 }
 0x3bc   : > { %s2085_s20 = scalar_lea.vmem (%p1770_p3), [#allocation9], %s1795_s18  ;;  %s1580_s15 = sshll.u32 (%p1770_p3), %s1039_s14, 1 }
 0x3bd   : > { %v940_v7 = vadd.f32 %v939_v26, %v938_v24  ;;  %v959_v27 = vrot.slane %v958_v6, 2  ;;  %s1041_s17 = scalar_lea.vmem (%p1770_p3), %s2070_s4, %s1580_s15 }
 0x3bf   : > { %v941_v28 = vrot.slane %v940_v7, 1  ;;  %v960_v29 = vadd.f32 %v959_v27, %v958_v6 }
 0x3c1   : > { %v942_v30 = vadd.f32 %v941_v28, %v940_v7  ;;  %v961_v31 = vrot.slane %v960_v29, 1 }
 0x3c3   : > { %943 = vst [vmem:[%s925_s25] sm:$0x1] %v942_v30  ;;  %v962_v32 = vadd.f32 %v961_v31, %v960_v29 }
 0x3c5   : > { %963 = vst [vmem:[%s945_s26] sm:$0x1] %v962_v32 }
 0x3c9   : > { %1038 = sbr.rel (!%p1770_p3) target bundleno = 980 (0x3d4), region = 158 }
 0x3ca   : > { %v968_v33 = vld [vmem:[#allocation8] sm:$0x3] }
 0x3cb   : > { %971 = vst [vmem:[%s2083_s11] sm:$0x3] %v968_v33 }
 0x3cc   : > { %v976_v34 = vld [vmem:[#allocation10] sm:$0x3] }
 0x3cd   : > { %979 = vst [vmem:[%s2084_s22] sm:$0x3] %v976_v34 }
 0x3d2   : > { %v1058_v35 = vld [vmem:[%s2085_s20] sm:$0x3] }
 0x3d3   : > { %1059 = vst [vmem:[%s1041_s17] sm:$0x3] %v1058_v35 }
 0x3d4 PF: > { %1077 = sbr.rel (!%p1770_p3) target bundleno = 988 (0x3dc), region = 192  ;;  %s1078_s27 = sshrl.u32 (%p1770_p3), %s1756_s12, 3 }
 0x3d5   : > { %s2086_s29 = scalar_lea.vmem (%p1770_p3), [#allocation11], %s1795_s18  ;;  %s1581_s16 = sshll.u32 (%p1770_p3), %s1078_s27, 1 }
 0x3d6   : > { %s1080_s25 = scalar_lea.vmem (%p1770_p3), %s2071_s5, %s1581_s16 }
 0x3da   : > { %v1097_v36 = vld [vmem:[%s2086_s29] sm:$0x3] }
 0x3db   : > { %1098 = vst [vmem:[%s1080_s25] sm:$0x3] %v1097_v36 }
 0x3dc PF: > { %s1582_s26 = sshll.u32 %s1756_s12, 1  ;;  %s2087_s19 = scalar_lea.vmem [#allocation13], %s1793_s28 }
 0x3dd   : > { %v1132_v37 = vld [vmem:[%s2087_s19] sm:$0x3]  ;;  %s2088_s11 = scalar_lea.vmem [#allocation15], %s1793_s28  ;;  %s1115_s14 = scalar_lea.vmem %s2072_s6, %s1582_s26 }
 0x3de   : > { %v1167_v38 = vld [vmem:[%s2088_s11] sm:$0x3]  ;;  %s1150_s24 = scalar_lea.vmem %s2073_s7, %s1582_s26  ;;  %s2089_s23 = scalar_lea.vmem [#allocation17], %s1793_s28  ;;  %1133 = vst [vmem:[%s1115_s14] sm:$0x3] %v1132_v37 }
 0x3df   : > { %v1202_v39 = vld [vmem:[%s2089_s23] sm:$0x3]  ;;  %s2090_s17 = scalar_lea.vmem [#allocation19], %s1793_s28  ;;  %1168 = vst [vmem:[%s1150_s24] sm:$0x3] %v1167_v38  ;;  %s1185_s29 = scalar_lea.vmem %s2074_s8, %s1582_s26 }
 0x3e0   : > { %v1237_v40 = vld [vmem:[%s2090_s17] sm:$0x3]  ;;  %s1220_s21 = scalar_lea.vmem %s2075_s9, %s1582_s26  ;;  %1203 = vst [vmem:[%s1185_s29] sm:$0x3] %v1202_v39 }
 0x3e1   : > { %1238 = vst [vmem:[%s1220_s21] sm:$0x3] %v1237_v40 }
 0x3e2 PF: > { %s2091_s25 = sld [smem:[#allocation33_spill]]  ;;  %p13_p13 = scmp.ge.s32.totalorder %s1759_s13, 4  }
 0x3e3   : > { %s2092_s30 = smov %s1673_s10  ;;  %s2094_s11 = smov %s1759_s13 }
 0x3e4   :  { %15 = sbr.rel (!%p13_p13) target bundleno = 2 (0x2), region = 484 }
 0x3e8   : > { %s2093_s10 = smov %s2091_s25 }

// kernel: custom-call.19
= control target key start
LH: loop header
LB: loop body
LE: loop exit
PB: predicated region body
PF: predicated region fallthrough
CT: control target
= control target key end

     0   :  { %s664_s9 = smov 0   ;;  %s666_s10 = smov 0   ;;  %s810_s0 = inlined_call_operand.vmem [shape: f32[2,3,3], index: 0, kind: input, shape index: {}]   ;;  %s811_s1 = inlined_call_operand.vmem [shape: f32[2,3,3], index: 1, kind: output, shape index: {0}]   ;;  %s812_s2 = inlined_call_operand.vmem [shape: f32[2,3], index: 2, kind: output, shape index: {1}]  }
   0x1   :  { %s668_s11 = smov 0   ;;  %s670_s12 = smov 0  }
   0x2   :  { %s672_s13 = smov 0  }
   0x3 LB: > { %s28_s14 = sadd.s32 1, %s637_s12  ;;  %s519_s15 = sadd.s32 4294967295, %s641_s13   ;;  %s641_s13 = sphi %s672_s13, %s9_s13   ;;  %s637_s12 = sphi %s670_s12, %s819_s12   ;;  %s633_s11 = sphi %s668_s11, %s818_s11   ;;  %s629_s10 = sphi %s666_s10, %s817_s10   ;;  %s625_s9 = sphi %s664_s9, %s816_s9  }
   0x4   : > { %p30_p0 = scmp.ge.s32.totalorder %s28_s14, 2  ;;  %s33_s16 = ssub.s32 0, %s637_s12 }
   0x5   : > { %s521_s17 = smin.u32 %s637_s12, %s33_s16  ;;  %p57_p1 = scmp.ne.s32.totalorder %s629_s10, %s625_s9 }
   0x6   : > { %s821_s14 = smov (%p30_p0, %s28_s14), 0  ;;  %s35_s18 = sshrl.u32 %s521_s17, 3 }
   0x7   : > { %s39_s19 = ssub.s32 0, %s821_s14  ;;  %p58_p2 = scmp.eq.s32.totalorder %s519_s15, 1 }
   0x8   : > { %s522_s20 = smin.u32 %s39_s19, %s821_s14  ;;  %s47_s24 = sadd.s32 1, %s629_s10 }
   0x9   : > { %s41_s21 = sshrl.u32 %s522_s20, 3  ;;  %p699_p3 = por %p58_p2, %p57_p1 }
   0xa   : > { %s44_s23 = ssub.s32 %s35_s18, %s41_s21  ;;  %p524_p5 = scmp.ge.s32.totalorder %s641_s13, 2 }
   0xb   : > { %p45_p4 = scmp.eq.s32.totalorder %s44_s23, 0  ;;  %s82_s26 = sand.u32 (!%p524_p5), 1, %s641_s13  }
   0xc   : > { %80 = sbr.rel (%p524_p5) target bundleno = 19 (0x13), region = 16  ;;  %s526_s27 = sshll.u32 (!%p524_p5), %s637_s12, 2 }
   0xd   : > { %s705_s25 = scalar_select %p45_p4, %s629_s10, %s47_s24  }
   0xe   : > { %s525_s28 = sshll.u32 (!%p524_p5), %s82_s26, 2  ;;  %s88_s3 = scalar_lea.vmem (!%p524_p5), %s810_s0, %s526_s27 }
   0xf   : > { %s84_s4 = scalar_lea.vmem (!%p524_p5), [#allocation1], %s525_s28 }
  0x11   : > { %v105_v0 = vld [vmem:[%s88_s3] sm:$0xf] }
  0x12   : > { %106 = vst [vmem:[%s84_s4] sm:$0xf] %v105_v0 }
  0x13 PF: > { %p527_p6 = scmp.ge.s32.totalorder %s641_s13, 1  ;;  %p123_p7 = scmp.lt.s32.totalorder %s641_s13, 3 }
  0x15   : > { %p124_p8 = pnand %p527_p6, %p123_p7 }
  0x17   : > { %127 = sbr.rel (%p124_p8) target bundleno = 352 (0x160), region = 50 }
  0x1c   : > { %s134_s5 = sand.u32 1, %s519_s15   ;;  %s144_s6 = sand.u32 1, %s625_s9   ;;  %v647_v2 = vmov 0.0  }
  0x1d   : > { %s528_s7 = sshll.u32 %s134_s5, 2  ;;  %s716_s8 = sshll.u32 %s144_s6, 1 }
  0x1e   : > { %s136_s16 = scalar_lea.vmem [#allocation1], %s528_s7  ;;  %s158_s17 = sand.u32 7, %s633_s11  }
  0x1f   : > { %v150_v1 = vld [vmem:[%s136_s16] sm:$0xf]  ;;  %s719_s18 = scalar_lea.vmem [#allocation4], %s158_s17  ;;  %s722_s19 = scalar_lea.vmem [#allocation3], %s528_s7 }
  0x20   : > { %151 = vst [vmem:[#allocation0] sm:$0xf] %v150_v1  ;;  %162 = vst [vmem:[%s719_s18] sm:$0x1] %v647_v2  ;;  %s146_s15 = scalar_lea.vmem [#allocation5], %s716_s8  ;;  %s725_s20 = smov 0  }
  0x27   : > { %v160_v3 = vld [vmem:[#allocation0] sm:$0xff] }
  0x28   : > { %161 = vst [vmem:[#allocation2] sm:$0xff] %v160_v3 }
  0x29 LB: >> { %v170_v4 = vlaneseq  ;;  %v734_v6 = vstv %s645_s20  ;;  %s197_s9 = scalar_lea.vmem [#allocation2], %s645_s20  ;;  %s233_s21 = smov [#allocation2]  ;;  %v648_v60 = vmov 1.0   ;;  %v268_v61 = vld [vmem:[%s719_s18] ss:$0 sm:$0xff]  ;;  %s645_s20 = sphi %s725_s20, %s168_s20  }
  0x2a   : >> { %s255_s23 = scalar_lea.vmem [#allocation6], %s645_s20  ;;  %s271_s24 = smov [#allocation2] }
  0x2b   : >> { %v731_v5 = vshrl.u32 %v170_v4, 7  ;;  %v249_v49 = vand.u32 127, %v170_v4  ;;  %s272_s26 = smov [#allocation6] }
  0x2d   : >> { %vm174_vm0 = vcmp.gt.s32.totalorder %v731_v5, %v734_v6  ;;  %vm175_vm1 = vcmp.lt.s32.totalorder %v731_v5, 3  ;;  %v236_v5 = vmov %v731_v5  ;;  %vm749_vm12 = vcmp.eq.s32.totalorder %v249_v49, %v734_v6 }
  0x2e   : >> { %vm176_vm2 = vmand %vm174_vm0, %vm175_vm1  ;;  %vm240_vm9 = vcmp.gt.s32.totalorder %v236_v5, %v734_v6  ;;  %vm241_vm10 = vcmp.lt.s32.totalorder %v236_v5, 3  ;;  %v275_v5 = vmov %v731_v5  ;;  %vm301_vm15 = vcmp.gt.s32.totalorder %v249_v49, %v734_v6 }
  0x2f   : >> { %v169_v7 = vld [vmem:[#allocation2] sm:$0xff]  ;;  %v198_v16 = vld [vmem:[%s197_s9] ss:$0 sm:$0xff]  ;;  %vm242_vm11 = vmand %vm240_vm9, %vm241_vm10  ;;  %vm280_vm13 = vcmp.lt.s32.totalorder %v275_v5, 3  ;;  %v292_v5 = vmov %v731_v5 }
  0x30   : >> { %v177_v8 = vsel %vm176_vm2, %v169_v7, 0.0  ;;  %v199_v17 = vand.u32 2147483647, %v198_v16  ;;  %vm224_vm8 = vcmp.lt.f32.partialorder %v198_v16, 0.0  ;;  %v237_v46 = vld [vmem:[%s233_s21] sm:$0xff]  ;;  %vm309_vm14 = vcmp.ge.s32.totalorder %v292_v5, %v734_v6 }
  0x31   : >> { %v178_v9 = vmul.f32 %v177_v8, %v177_v8  ;;  %v243_v50 = vsel %vm242_vm11, %v237_v46, 0.0  ;;  %v278_v0 = vld [vmem:[%s271_s24] sm:$0xff]  ;;  %s288_s24 = smov %s271_s24  ;;  %vm310_vm0 = vmand %vm749_vm12, %vm309_vm14 }
  0x32   : >> { %v200_v22 = vmax.f32 %v199_v17, 0.0  ;;  %s313_s27 = scalar_lea.vmem %s288_s24, %s645_s20  ;;  %s168_s20 = sadd.s32 1, %s645_s20  }
  0x33   : >> { %v179_v10 = vrot.slane %v178_v9, 4  ;;  %p165_p9 = scmp.ge.s32.totalorder %s168_s20, 3  }
  0x34   : > { %s534_s28 = sshll.u32 (%p165_p9), %s633_s11, 2 }
  0x35   : >> { %v180_v11 = vadd.f32 %v179_v10, %v178_v9  ;;  %s348_s3 = scalar_lea.vmem (%p165_p9), %s811_s1, %s534_s28 }
  0x37   : >> { %v181_v12 = vrot.slane %v180_v11, 2 }
  0x39   : >> { %v182_v13 = vadd.f32 %v181_v12, %v180_v11 }
  0x3b   : >> { %v183_v14 = vrot.slane %v182_v13, 1 }
  0x3d   : >> { %v184_v15 = vadd.f32 %v183_v14, %v182_v13  ;;  %v299_v14 = vld [vmem:[%s288_s24] sm:$0xff] }
  0x3f   : >> { %589 = vrsqrt.f32 %v184_v15  ;;  %vm187_vm3 = vcmp.eq.f32.partialorder %v184_v15, inf  ;;  %v190_v19 = vand.u32 2147483648, %v184_v15  ;;  %vm189_vm4 = vcmp.eq.f32.partialorder %v184_v15, 0.0 }
  0x4c   : >> { %v590_v18 = vpop.eup %589 }
  0x4d   : >> { %v186_v20 = vmul.f32 %v590_v18, %v184_v15 }
  0x4f   : >> { %v188_v21 = vsel %vm187_vm3, %v184_v15, %v186_v20 }
  0x50   : >> { %v191_v23 = vsel %vm189_vm4, %v190_v19, %v188_v21 }
  0x51   : >> { %v201_v24 = vand.u32 2147483647, %v191_v23 }
  0x53   : >> { %v202_v25 = vmax.f32 %v200_v22, %v201_v24 }
  0x55   : >> { %591 = vrcp.f32 %v202_v25  ;;  %vm214_vm7 = vcmp.eq.f32.partialorder %v202_v25, 0.0 }
  0x62   : >> { %v592_v26 = vpop.eup %591 }
  0x63   : >> { %v204_v27 = vmul.f32 %v592_v26, %v199_v17  ;;  %v207_v28 = vmul.f32 0.0, %v592_v26  ;;  %v211_v29 = vmul.f32 %v592_v26, %v201_v24 }
  0x65   : >> { %v205_v30 = vmul.f32 %v204_v27, %v204_v27  ;;  %v208_v31 = vmul.f32 %v207_v28, %v207_v28  ;;  %v212_v32 = vmul.f32 %v211_v29, %v211_v29 }
  0x67   : >> { %v209_v33 = vadd.f32 %v208_v31, %v205_v30 }
  0x69   : >> { %v213_v34 = vadd.f32 %v212_v32, %v209_v33 }
  0x6b   : >> { %593 = vrsqrt.f32 %v213_v34  ;;  %vm217_vm5 = vcmp.eq.f32.partialorder %v213_v34, inf  ;;  %v220_v36 = vand.u32 2147483648, %v213_v34  ;;  %vm219_vm6 = vcmp.eq.f32.partialorder %v213_v34, 0.0 }
  0x78   : >> { %v594_v35 = vpop.eup %593 }
  0x79   : >> { %v216_v37 = vmul.f32 %v594_v35, %v213_v34 }
  0x7b   : >> { %v218_v38 = vsel %vm217_vm5, %v213_v34, %v216_v37 }
  0x7c   : >> { %v221_v39 = vsel %vm219_vm6, %v220_v36, %v218_v38 }
  0x7d   : >> { %v222_v40 = vmul.f32 %v221_v39, %v202_v25 }
  0x7f   : >> { %v223_v41 = vsel %vm214_vm7, 0.0, %v222_v40 }
  0x80   : >> { %v225_v42 = vxor.u32 2147483648, %v223_v41 }
  0x82   : >> { %v226_v43 = vsel %vm224_vm8, %v223_v41, %v225_v42 }
  0x83   : >> { %v742_v44 = vsel %vm189_vm4, %v198_v16, %v226_v43  ;;  %595 = vrcp.f32 %v226_v43  ;;  %v227_v47 = vsub.f32 %v226_v43, %v198_v16 }
  0x84   : >> { %v232_v45 = vsub.f32 %v198_v16, %v742_v44 }
  0x86   : >> { %597 = vrcp.f32 %v232_v45 }
  0x90   : >> { %v596_v48 = vpop.eup %595 }
  0x91   : >> { %v229_v51 = vmul.f32 %v596_v48, %v227_v47 }
  0x93   : >> { %v598_v52 = vpop.eup %597  ;;  %v231_v56 = vsel %vm189_vm4, 0.0, %v229_v51 }
  0x94   : >> { %v245_v53 = vmul.f32 %v598_v52, %v243_v50  ;;  %v261_v58 = vsel %vm749_vm12, %v231_v56, 0.0 }
  0x96   : >> { %v246_v55 = vsel %vm189_vm4, 0.0, %v245_v53 }
  0x97   : >> { %v251_v57 = vsel %vm749_vm12, %v246_v55, 0.0 }
  0x98   : >> { %252 = vadd.xlane.f32.xlu0 %v251_v57 }
  0x9c   : >> { %262 = vadd.xlane.f32.xlu0 %v261_v58 }
 0x121   : >> { %v253_v59 = vpop.xlane.xlu0 %252 }
 0x122   : >> { %254 = vst [vmem:[#allocation6] sm:$0xff] %v253_v59 }
 0x123   : >> { %256 = vst [vmem:[%s255_s23] sm:$0x1] %v648_v60 }
 0x125   : >> { %v263_v62 = vpop.xlane.xlu0 %262 }
 0x126   : >> { %v269_v63 = vsel %vm749_vm12, %v263_v62, %v268_v61 }
 0x127   : >> { %270 = vst [vmem:[%s719_s18] sm:$0x1] %v269_v63 }
 0x12a   : >> { %v277_v1 = vld [vmem:[%s272_s26] sm:$0xff]  ;;  %s289_s26 = smov %s272_s26 }
 0x12b   : >> { %v279_v2 = vmul.f32 %v278_v0, %v277_v1  ;;  %v297_v13 = vld [vmem:[%s289_s26] sm:$0xff] }
 0x12d   : >> { %v281_v3 = vsel %vm280_vm13, %v279_v2, 0.0 }
 0x12e   : >> { %v282_v4 = vrot.slane %v281_v3, 4  ;;  %v333_v6 = vld [vmem:[#allocation4] sm:$0x3] (%p165_p9) }
 0x12f   : > { %336 = vst [vmem:[%s146_s15] sm:$0x3] (%p165_p9), %v333_v6 }
 0x130   : >> { %v283_v7 = vadd.f32 %v282_v4, %v281_v3 }
 0x132   : >> { %v284_v8 = vrot.slane %v283_v7, 2 }
 0x134   : >> { %v285_v9 = vadd.f32 %v284_v8, %v283_v7 }
 0x136   : >> { %v286_v10 = vrot.slane %v285_v9, 1 }
 0x138   : >> { %v287_v11 = vadd.f32 %v286_v10, %v285_v9 }
 0x13a   : >> { %v293_v12 = vmul.f32 %v287_v11, %v263_v62 }
 0x13c   : >> { %v298_v15 = vmul.f32 %v297_v13, %v293_v12 }
 0x13e   : >> { %v302_v16 = vsub.f32 %v299_v14, %v298_v15 }
 0x140   : >> { %v303_v17 = vsel %vm301_vm15, %v302_v16, %v299_v14 }
 0x141   : >> { %v311_v18 = vsel %vm310_vm0, %v297_v13, %v303_v17 }
 0x142   : >> { %312 = vst [vmem:[%s288_s24] sm:$0xff] %v311_v18 }
 0x147   : > { %167 = sbr.rel (!%p165_p9) target bundleno = 41 (0x29), region = 167 }
 0x149   : >> { %v314_v19 = vld [vmem:[%s313_s27] ss:$0 sm:$0xff] }
 0x14a   : >> { %v319_v20 = vsel %vm749_vm12, %v742_v44, %v314_v19 }
 0x14b   : >> { %320 = vst [vmem:[%s313_s27] sm:$0x1] %v319_v20 }
 0x14c   : > { %p385_p10 = scmp.lt.s32.totalorder (%p699_p3), %s633_s11, 0  ;;  %s386_s4 = ssub.s32 (%p699_p3), 0, %s633_s11  ;;  %v409_v22 = vld [vmem:[%s146_s15] sm:$0x3] (%p699_p3) }
 0x14d   : > { %s535_s5 = smin.u32 (%p699_p3), %s633_s11, %s386_s4 }
 0x14e   : > { %s388_s6 = sshrl.u32 (%p699_p3), %s535_s5, 3 }
 0x14f   : > { %s389_s7 = ssub.s32 (%p699_p3), 0, %s388_s6 }
 0x152   : > { %v325_v5 = vld [vmem:[#allocation2] sm:$0xf] }
 0x153   : > { %328 = vst [vmem:[%s722_s19] sm:$0xf] %v325_v5 }
 0x157   : > { %384 = sbr.rel (!%p699_p3) target bundleno = 352 (0x160), region = 91 }
 0x15a   : > { %v365_v21 = vld [vmem:[%s722_s19] sm:$0xf] }
 0x15b   : > { %366 = vst [vmem:[%s348_s3] sm:$0xf] %v365_v21 }
 0x15c   : > { %s823_s7 = smov (!%p385_p10, %s389_s7), %s388_s6 }
 0x15d   : > { %s536_s16 = sshll.u32 %s823_s7, 1 }
 0x15e   : > { %s392_s19 = scalar_lea.vmem %s812_s2, %s536_s16 }
 0x15f   : > { %410 = vst [vmem:[%s392_s19] sm:$0x3] %v409_v22 }
 0x160 PF: > { %s9_s13 = sadd.s32 1, %s641_s13   ;;  %s816_s9 = smov %s629_s10 }
 0x161   : > { %p6_p11 = scmp.ge.s32.totalorder %s9_s13, 4   ;;  %s817_s10 = smov %s705_s25 }
 0x162   : > { %s818_s11 = smov %s637_s12  ;;  %s819_s12 = smov %s821_s14 }
 0x163   :  { %8 = sbr.rel (!%p6_p11) target bundleno = 3 (0x3), region = 178 }

// kernel: aligned_l2.3
= control target key start
LH: loop header
LB: loop body
LE: loop exit
PB: predicated region body
PF: predicated region fallthrough
CT: control target
= control target key end

     0   :  { %11 = vsyncpa [#allocation6], 0  ;;  %s2121_s0 = inlined_call_operand.vmem [shape: f32[2,9], index: 0, kind: input, shape index: {}]   ;;  %s2122_s1 = inlined_call_operand.vmem [shape: f32[6,8,1152], index: 1, kind: input, shape index: {}]   ;;  %s2123_s2 = inlined_call_operand.vmem [shape: f32[6,8,1152], index: 2, kind: input, shape index: {}]   ;;  %s2124_s3 = inlined_call_operand.vmem [shape: f32[2,8,1152], index: 3, kind: input, shape index: {}]   ;;  %s2125_s4 = inlined_call_operand.hbm [shape: f32[1,1], index: 4, kind: output, shape index: {0}]   ;;  %s2126_s5 = inlined_call_operand.hbm [shape: f32[1,1], index: 5, kind: output, shape index: {1}]  }
   0x1   :  { %12 = vsyncpa [#allocation5], 0 }
   0x2   :  { %13 = vsyncpa [#allocation9], 0  ;;  %s20_s20 = sshll.u32 %s2121_s0, 4  ;;  %s21_s20 = int_to_ptr.vmem [resolvable:$true] %s20_s20 }
   0x3   :  { %s973_s21 = scalar_lea.vmem %s21_s20, 32  ;;  %p978_p1 = scmp.lt.s32.totalorder %s21_s20, %s21_s20 }
   0x4   :  { %p974_p0 = scmp.ne.s32.totalorder %s21_s20, %s973_s21  ;;  %p979_p2 = scmp.lt.s32.totalorder %s973_s21, %s973_s21 }
   0x6   :  { %p980_p3 = por %p979_p2, %p978_p1 }
   0x8   :  { %p981_p4 = pnand %p980_p3, %p974_p0 }
   0xa   :  { %984 = shalt.err (!%p981_p4)
}
   0xb   :  { %s1031_s22 = smov [#allocation4]  }
   0xc   :  { %23 = dma.vmem_to_smem %s21_s20, 32, %s1031_s22, [#allocation6]  }
   0xd   :  { %1025 = dma.done.wait [#allocation6], 32  }
   0xe   :  { %1026 = vsyncadd [#allocation6], 4294967264 }
   0xf   :  { %33 = sfence }
  0x10   :  { %s65_s23 = sld [smem:[#allocation4]]  ;;  %v1072_v0 = vld [vmem:[%s2122_s1] sm:$0xff]  ;;  %v1077_v1 = vld [vmem:[%s2122_s1 + $0x8] sm:$0xff]  ;;  %v1082_v2 = vld [vmem:[%s2122_s1 + $0x10] sm:$0xff]  ;;  %vm797_vm0 = vcmask 0  }
  0x11   :  { %s1067_s24 = sld [smem:[#allocation4 + $0x3]]  ;;  %v1087_v3 = vld [vmem:[%s2122_s1 + $0x18] sm:$0xff]  ;;  %v1092_v4 = vld [vmem:[%s2122_s1 + $0x20] sm:$0xff]  ;;  %v1097_v5 = vld [vmem:[%s2122_s1 + $0x28] sm:$0xff] }
  0x12   :  { %v1102_v6 = vld [vmem:[%s2122_s1 + $0x30] sm:$0xff]  ;;  %v1107_v7 = vld [vmem:[%s2122_s1 + $0x38] sm:$0xff]  ;;  %v1112_v8 = vld [vmem:[%s2122_s1 + $0x40] sm:$0xff]  ;;  %s1124_s21 = sld [smem:[#allocation4 + $0x6]] }
  0x13   :  { %v1117_v10 = vld [vmem:[%s2122_s1 + $0x48] sm:$0xff]  ;;  %v1122_v11 = vld [vmem:[%s2122_s1 + $0x50] sm:$0xff]  ;;  %v1131_v14 = vld [vmem:[%s2122_s1 + $0x58] sm:$0xff]  ;;  %s1234_s29 = sld [smem:[#allocation4 + $0x1]] }
  0x14   :  { %2186 = vst [vmem:[#allocation13_spill] sm:$0xff] %v1131_v14  ;;  %v1136_v15 = vld [vmem:[%s2122_s1 + $0x60] sm:$0xff]  ;;  %v1141_v16 = vld [vmem:[%s2122_s1 + $0x68] sm:$0xff]  ;;  %v1150_v21 = vld [vmem:[%s2122_s1 + $0x70] sm:$0xff]  ;;  %s876_s11 = sld [smem:[#allocation4 + $0x7]] }
  0x15   :  { %2187 = vst [vmem:[#allocation14_spill] sm:$0xff] %v1136_v15  ;;  %2188 = vst [vmem:[#allocation15_spill] sm:$0xff] %v1141_v16  ;;  %v1155_v22 = vld [vmem:[%s2122_s1 + $0x78] sm:$0xff]  ;;  %v1160_v23 = vld [vmem:[%s2122_s1 + $0x80] sm:$0xff]  ;;  %s1338_s12 = sld [smem:[#allocation4 + $0x2]] }
  0x16   :  { %v75_v9 = vstv %s65_s23  ;;  %2189 = vst [vmem:[#allocation16_spill] sm:$0xff] %v1150_v21  ;;  %2190 = vst [vmem:[#allocation17_spill] sm:$0xff] %v1155_v22  ;;  %v1168_v27 = vld [vmem:[%s2122_s1 + $0x88] sm:$0xff]  ;;  %v1182_v37 = vld [vmem:[%s2122_s1 + $0x90] sm:$0xff]  ;;  %s1349_s18 = sld [smem:[#allocation4 + $0x5]] }
  0x17   :  { %v76_v12 = vmul.f32 %v75_v9, %v1072_v0  ;;  %v77_v13 = vmul.f32 %v75_v9, %v1077_v1  ;;  %v78_v17 = vmul.f32 %v75_v9, %v1082_v2  ;;  %v79_v18 = vmul.f32 %v75_v9, %v1087_v3  ;;  %2191 = vst [vmem:[#allocation18_spill] sm:$0xff] %v1160_v23  ;;  %v1187_v38 = vld [vmem:[%s2122_s1 + $0x98] sm:$0xff]  ;;  %v1193_v42 = vld [vmem:[%s2122_s1 + $0xa0] sm:$0xff]  ;;  %v1198_v43 = vld [vmem:[%s2122_s1 + $0xa8] sm:$0xff]  ;;  %s1365_s23 = sld [smem:[#allocation4 + $0x8]] }
  0x18   :  { %v80_v19 = vmul.f32 %v75_v9, %v1092_v4  ;;  %v81_v20 = vmul.f32 %v75_v9, %v1097_v5  ;;  %v82_v24 = vmul.f32 %v75_v9, %v1102_v6  ;;  %v83_v25 = vmul.f32 %v75_v9, %v1107_v7  ;;  %v1203_v44 = vld [vmem:[%s2122_s1 + $0xb0] sm:$0xff]  ;;  %v1208_v49 = vld [vmem:[%s2122_s1 + $0xb8] sm:$0xff]  ;;  %v1213_v50 = vld [vmem:[%s2122_s1 + $0xc0] sm:$0xff]  ;;  %s1499_s20 = sld [smem:[#allocation4 + $0x80]] }
  0x19   :  { %v84_v26 = vmul.f32 %v75_v9, %v1112_v8  ;;  %v96_v28 = vstv %s1067_s24  ;;  %v1218_v51 = vld [vmem:[%s2122_s1 + $0xc8] sm:$0xff]  ;;  %v1223_v55 = vld [vmem:[%s2122_s1 + $0xd0] sm:$0xff]  ;;  %v126_v56 = vstv %s1124_s21  ;;  %s1237_s21 = sld [smem:[#allocation4 + $0x4]] }
  0x1a   :  { %v97_v29 = vmul.f32 %v1117_v10, %v96_v28  ;;  %v98_v30 = vmul.f32 %v1122_v11, %v96_v28  ;;  %v99_v31 = vmul.f32 %v1131_v14, %v96_v28  ;;  %v100_v32 = vmul.f32 %v1136_v15, %v96_v28  ;;  %s1510_s28 = sld [smem:[#allocation4 + $0x83]] }
  0x1b   :  { %v101_v33 = vmul.f32 %v1141_v16, %v96_v28  ;;  %v102_v34 = vmul.f32 %v1150_v21, %v96_v28  ;;  %v103_v35 = vmul.f32 %v1155_v22, %v96_v28  ;;  %v104_v36 = vmul.f32 %v1160_v23, %v96_v28  ;;  %s1521_s30 = sld [smem:[#allocation4 + $0x86]] }
  0x1c   :  { %v105_v39 = vmul.f32 %v1168_v27, %v96_v28  ;;  %v106_v40 = vadd.f32 %v97_v29, %v76_v12  ;;  %v107_v41 = vadd.f32 %v98_v30, %v77_v13  ;;  %v108_v45 = vadd.f32 %v99_v31, %v78_v17  ;;  %s1760_s16 = sld [smem:[#allocation4 + $0x81]] }
  0x1d   :  { %v109_v46 = vadd.f32 %v100_v32, %v79_v18  ;;  %v110_v47 = vadd.f32 %v101_v33, %v80_v19  ;;  %v111_v48 = vadd.f32 %v102_v34, %v81_v20  ;;  %v112_v52 = vadd.f32 %v103_v35, %v82_v24  ;;  %v145_v20 = vld [vmem:[%s2123_s2] sm:$0xff]  ;;  %v146_v24 = vld [vmem:[%s2123_s2 + $0x8] sm:$0xff]  ;;  %v151_v35 = vld [vmem:[%s2123_s2 + $0x30] sm:$0xff]  ;;  %s1771_s26 = sld [smem:[#allocation4 + $0x84]] }
  0x1e   :  { %v113_v53 = vadd.f32 %v104_v36, %v83_v25  ;;  %v114_v54 = vadd.f32 %v105_v39, %v84_v26  ;;  %v127_v57 = vmul.f32 %v1182_v37, %v126_v56  ;;  %v128_v58 = vmul.f32 %v1187_v38, %v126_v56  ;;  %v147_v25 = vld [vmem:[%s2123_s2 + $0x10] sm:$0xff]  ;;  %v148_v26 = vld [vmem:[%s2123_s2 + $0x18] sm:$0xff]  ;;  %v149_v32 = vld [vmem:[%s2123_s2 + $0x20] sm:$0xff]  ;;  %s1934_s8 = sld [smem:[#allocation4 + $0x82]] }
  0x1f   :  { %v129_v59 = vmul.f32 %v1193_v42, %v126_v56  ;;  %v130_v60 = vmul.f32 %v1198_v43, %v126_v56  ;;  %v131_v61 = vmul.f32 %v1203_v44, %v126_v56  ;;  %v132_v62 = vmul.f32 %v1208_v49, %v126_v56  ;;  %v150_v34 = vld [vmem:[%s2123_s2 + $0x28] sm:$0xff]  ;;  %v152_v36 = vld [vmem:[%s2123_s2 + $0x38] sm:$0xff] }
  0x20   :  { %v133_v63 = vmul.f32 %v1213_v50, %v126_v56  ;;  %v134_v9 = vmul.f32 %v1218_v51, %v126_v56  ;;  %v135_v12 = vmul.f32 %v1223_v55, %v126_v56  ;;  %v136_v13 = vadd.f32 %v127_v57, %v106_v40 }
  0x21   :  { %v137_v17 = vadd.f32 %v128_v58, %v107_v41  ;;  %v138_v18 = vadd.f32 %v129_v59, %v108_v45  ;;  %v139_v19 = vadd.f32 %v130_v60, %v109_v46  ;;  %v140_v28 = vadd.f32 %v131_v61, %v110_v47  ;;  %v153_v45 = vld [vmem:[%s2123_s2 + $0x40] sm:$0xff] }
  0x22   :  { %v141_v29 = vadd.f32 %v132_v62, %v111_v48  ;;  %v142_v30 = vadd.f32 %v133_v63, %v112_v52  ;;  %v143_v31 = vadd.f32 %v134_v9, %v113_v53  ;;  %v144_v33 = vadd.f32 %v135_v12, %v114_v54 }
  0x23   :  { %v154_v39 = vsub.f32 %v136_v13, %v145_v20  ;;  %v155_v40 = vsub.f32 %v137_v17, %v146_v24  ;;  %v156_v41 = vsub.f32 %v138_v18, %v147_v25  ;;  %v157_v46 = vsub.f32 %v139_v19, %v148_v26 }
  0x24   :  { %v1266_v47 = vsub.f32 %v140_v28, %v149_v32  ;;  %v1268_v48 = vsub.f32 %v141_v29, %v150_v34  ;;  %v1270_v52 = vsub.f32 %v142_v30, %v151_v35  ;;  %v1272_v53 = vsub.f32 %v143_v31, %v152_v36 }
  0x25   :  { %v1274_v54 = vsub.f32 %v144_v33, %v153_v45  ;;  %v1276_v56 = vmul.f32 %v154_v39, %v154_v39  ;;  %v1278_v57 = vmul.f32 %v155_v40, %v155_v40  ;;  %v1280_v58 = vmul.f32 %v156_v41, %v156_v41 }
  0x26   :  { %v1282_v59 = vmul.f32 %v157_v46, %v157_v46  ;;  %v182_v60 = vstv %s1234_s29  ;;  %v193_v61 = vstv %s1237_s21  ;;  %v213_v62 = vstv %s876_s11  ;;  %s1782_s29 = sld [smem:[#allocation4 + $0x87]] }
  0x27   :  { %v183_v63 = vmul.f32 %v182_v60, %v1072_v0  ;;  %v184_v9 = vmul.f32 %v182_v60, %v1077_v1  ;;  %v185_v12 = vmul.f32 %v182_v60, %v1082_v2  ;;  %v186_v13 = vmul.f32 %v182_v60, %v1087_v3 }
  0x28   :  { %v187_v17 = vmul.f32 %v182_v60, %v1092_v4  ;;  %v188_v18 = vmul.f32 %v182_v60, %v1097_v5  ;;  %v189_v19 = vmul.f32 %v182_v60, %v1102_v6  ;;  %v190_v20 = vmul.f32 %v182_v60, %v1107_v7 }
  0x29   :  { %v191_v24 = vmul.f32 %v182_v60, %v1112_v8  ;;  %v194_v25 = vmul.f32 %v1117_v10, %v193_v61  ;;  %v195_v26 = vmul.f32 %v1122_v11, %v193_v61  ;;  %v196_v28 = vmul.f32 %v1131_v14, %v193_v61 }
  0x2a   :  { %v197_v29 = vmul.f32 %v1136_v15, %v193_v61  ;;  %v198_v30 = vmul.f32 %v1141_v16, %v193_v61  ;;  %v199_v31 = vmul.f32 %v1150_v21, %v193_v61  ;;  %v200_v32 = vmul.f32 %v1155_v22, %v193_v61 }
  0x2b   :  { %v201_v33 = vmul.f32 %v1160_v23, %v193_v61  ;;  %v202_v34 = vmul.f32 %v1168_v27, %v193_v61  ;;  %v203_v35 = vadd.f32 %v194_v25, %v183_v63  ;;  %v204_v36 = vadd.f32 %v195_v26, %v184_v9  ;;  %v1328_v26 = vld [vmem:[%s2124_s3] sm:$0xff] }
  0x2c   :  { %v205_v39 = vadd.f32 %v196_v28, %v185_v12  ;;  %v206_v40 = vadd.f32 %v197_v29, %v186_v13  ;;  %v207_v41 = vadd.f32 %v198_v30, %v187_v17  ;;  %v208_v45 = vadd.f32 %v199_v31, %v188_v18  ;;  %v877_v13 = vld [vmem:[%s2123_s2 + $0x48] sm:$0xff]  ;;  %v878_v17 = vld [vmem:[%s2123_s2 + $0x50] sm:$0xff]  ;;  %v879_v18 = vld [vmem:[%s2123_s2 + $0x58] sm:$0xff]  ;;  %2192 = vst [vmem:[#allocation19_spill] sm:$0xff] %v1328_v26 }
  0x2d   :  { %v209_v46 = vadd.f32 %v200_v32, %v189_v19  ;;  %v210_v60 = vadd.f32 %v201_v33, %v190_v20  ;;  %v211_v14 = vadd.f32 %v202_v34, %v191_v24  ;;  %v214_v15 = vmul.f32 %v1182_v37, %v213_v62  ;;  %v1333_v28 = vld [vmem:[%s2124_s3 + $0x8] sm:$0xff]  ;;  %v882_v31 = vld [vmem:[%s2123_s2 + $0x70] sm:$0xff]  ;;  %v883_v32 = vld [vmem:[%s2123_s2 + $0x78] sm:$0xff] }
  0x2e   :  { %v215_v16 = vmul.f32 %v1187_v38, %v213_v62  ;;  %v216_v21 = vmul.f32 %v1193_v42, %v213_v62  ;;  %v217_v22 = vmul.f32 %v1198_v43, %v213_v62  ;;  %v218_v23 = vmul.f32 %v1203_v44, %v213_v62  ;;  %2193 = vst [vmem:[#allocation20_spill] sm:$0xff] %v1333_v28 }
  0x2f   :  { %v219_v61 = vmul.f32 %v1208_v49, %v213_v62  ;;  %v220_v63 = vmul.f32 %v1213_v50, %v213_v62  ;;  %v221_v9 = vmul.f32 %v1218_v51, %v213_v62  ;;  %v222_v12 = vmul.f32 %v1223_v55, %v213_v62  ;;  %v880_v62 = vld [vmem:[%s2123_s2 + $0x60] sm:$0xff] }
  0x30   :  { %v223_v19 = vadd.f32 %v214_v15, %v203_v35  ;;  %v224_v20 = vadd.f32 %v215_v16, %v204_v36  ;;  %v225_v24 = vadd.f32 %v216_v21, %v205_v39  ;;  %v226_v25 = vadd.f32 %v217_v22, %v206_v40  ;;  %v881_v21 = vld [vmem:[%s2123_s2 + $0x68] sm:$0xff] }
  0x31   :  { %v227_v29 = vadd.f32 %v218_v23, %v207_v41  ;;  %v228_v30 = vadd.f32 %v219_v61, %v208_v45  ;;  %v229_v15 = vadd.f32 %v220_v63, %v209_v46  ;;  %v230_v16 = vadd.f32 %v221_v9, %v210_v60  ;;  %v884_v23 = vld [vmem:[%s2123_s2 + $0x80] sm:$0xff]  ;;  %v885_v41 = vld [vmem:[%s2123_s2 + $0x88] sm:$0xff]  ;;  %v1370_v46 = vld [vmem:[%s2124_s3 + $0x18] sm:$0xff] }
  0x32   :  { %v231_v22 = vadd.f32 %v222_v12, %v211_v14  ;;  %v242_v33 = vsub.f32 %v223_v19, %v877_v13  ;;  %v243_v34 = vsub.f32 %v224_v20, %v878_v17  ;;  %v244_v35 = vsub.f32 %v225_v24, %v879_v18  ;;  %v1354_v14 = vld [vmem:[%s2124_s3 + $0x10] sm:$0xff]  ;;  %2195 = vst [vmem:[#allocation22_spill] sm:$0xff] %v1370_v46 }
  0x33   :  { %2194 = vst [vmem:[#allocation21_spill] sm:$0xff] %v1354_v14  ;;  %v167_v36 = vmul.f32 %v1266_v47, %v1266_v47  ;;  %v168_v39 = vmul.f32 %v1268_v48, %v1268_v48  ;;  %v169_v40 = vmul.f32 %v1270_v52, %v1270_v52  ;;  %v245_v45 = vsub.f32 %v226_v25, %v880_v62  ;;  %v1375_v47 = vld [vmem:[%s2124_s3 + $0x20] sm:$0xff]  ;;  %v1380_v48 = vld [vmem:[%s2124_s3 + $0x28] sm:$0xff]  ;;  %v1397_v9 = vld [vmem:[%s2124_s3 + $0x30] sm:$0xff] }
  0x34   :  { %2196 = vst [vmem:[#allocation23_spill] sm:$0xff] %v1375_v47  ;;  %2197 = vst [vmem:[#allocation24_spill] sm:$0xff] %v1380_v48  ;;  %v170_v52 = vmul.f32 %v1272_v53, %v1272_v53  ;;  %v171_v60 = vmul.f32 %v1274_v54, %v1274_v54  ;;  %v1388_v61 = vmul.f32 %v1276_v56, %v1328_v26  ;;  %v1402_v53 = vld [vmem:[%s2124_s3 + $0x38] sm:$0xff]  ;;  %v1407_v54 = vld [vmem:[%s2124_s3 + $0x40] sm:$0xff] }
  0x35   :  { %v1392_v63 = vmul.f32 %v1278_v57, %v1333_v28  ;;  %2198 = vst [vmem:[#allocation25_spill] sm:$0xff] %v1397_v9  ;;  %2199 = vst [vmem:[#allocation26_spill] sm:$0xff] %v1402_v53  ;;  %v246_v56 = vsub.f32 %v227_v29, %v881_v21  ;;  %v247_v12 = vsub.f32 %v228_v30, %v882_v31 }
  0x36   :  { %2200 = vst [vmem:[#allocation27_spill] sm:$0xff] %v1407_v54  ;;  %v248_v13 = vsub.f32 %v229_v15, %v883_v32  ;;  %v249_v57 = vsub.f32 %v230_v16, %v884_v23  ;;  %v250_v17 = vsub.f32 %v231_v22, %v885_v41  ;;  %v251_v18 = vmul.f32 %v242_v33, %v242_v33 }
  0x37   :  { %v252_v19 = vmul.f32 %v243_v34, %v243_v34  ;;  %v253_v20 = vmul.f32 %v244_v35, %v244_v35  ;;  %v1411_v24 = vmul.f32 %v1280_v58, %v1354_v14  ;;  %v1415_v25 = vmul.f32 %v1282_v59, %v1370_v46 }
  0x38   :  { %v1418_v62 = vmul.f32 %v167_v36, %v1375_v47  ;;  %v254_v29 = vmul.f32 %v245_v45, %v245_v45  ;;  %v1421_v30 = vmul.f32 %v168_v39, %v1380_v48  ;;  %v1424_v15 = vmul.f32 %v169_v40, %v1397_v9 }
  0x39   :  { %v1427_v58 = vmul.f32 %v170_v52, %v1402_v53  ;;  %v1430_v16 = vmul.f32 %v171_v60, %v1407_v54  ;;  %v1432_v59 = vmul.f32 %v246_v56, %v246_v56  ;;  %v1434_v21 = vmul.f32 %v247_v12, %v247_v12 }
  0x3a   :  { %2201 = vst [vmem:[#allocation28_spill] sm:$0xff] %v1424_v15  ;;  %v1436_v22 = vmul.f32 %v248_v13, %v248_v13  ;;  %v1438_v31 = vmul.f32 %v249_v57, %v249_v57  ;;  %v1440_v32 = vmul.f32 %v250_v17, %v250_v17  ;;  %v1443_v23 = vmul.f32 %v251_v18, %v1328_v26 }
  0x3b   :  { %2202 = vst [vmem:[#allocation29_spill] sm:$0xff] %v1427_v58  ;;  %2203 = vst [vmem:[#allocation30_spill] sm:$0xff] %v1430_v16  ;;  %v1446_v33 = vmul.f32 %v252_v19, %v1333_v28  ;;  %v1449_v34 = vmul.f32 %v253_v20, %v1354_v14  ;;  %v1452_v35 = vmul.f32 %v254_v29, %v1370_v46  ;;  %v279_v36 = vstv %s1338_s12  ;;  %v2204_v19 = vld [vmem:[#allocation13_spill] sm:$0xff]  ;;  %v2205_v20 = vld [vmem:[#allocation14_spill] sm:$0xff] }
  0x3c   :  { %v290_v39 = vstv %s1349_s18  ;;  %v310_v40 = vstv %s1365_s23  ;;  %v280_v41 = vmul.f32 %v279_v36, %v1072_v0  ;;  %v281_v45 = vmul.f32 %v279_v36, %v1077_v1  ;;  %v2206_v29 = vld [vmem:[#allocation15_spill] sm:$0xff]  ;;  %v2207_v46 = vld [vmem:[#allocation16_spill] sm:$0xff]  ;;  %v2208_v14 = vld [vmem:[#allocation17_spill] sm:$0xff] }
  0x3d   :  { %v282_v52 = vmul.f32 %v279_v36, %v1082_v2  ;;  %v283_v60 = vmul.f32 %v279_v36, %v1087_v3  ;;  %v284_v56 = vmul.f32 %v279_v36, %v1092_v4  ;;  %v285_v12 = vmul.f32 %v279_v36, %v1097_v5  ;;  %v2209_v28 = vld [vmem:[#allocation18_spill] sm:$0xff] }
  0x3e   :  { %v286_v13 = vmul.f32 %v279_v36, %v1102_v6  ;;  %v287_v57 = vmul.f32 %v279_v36, %v1107_v7  ;;  %v288_v17 = vmul.f32 %v279_v36, %v1112_v8  ;;  %v291_v18 = vmul.f32 %v1117_v10, %v290_v39 }
  0x3f   :  { %v292_v0 = vmul.f32 %v1122_v11, %v290_v39  ;;  %v293_v1 = vmul.f32 %v2204_v19, %v290_v39  ;;  %v294_v2 = vmul.f32 %v2205_v20, %v290_v39  ;;  %v295_v3 = vmul.f32 %v2206_v29, %v290_v39 }
  0x40   :  { %v296_v4 = vmul.f32 %v2207_v46, %v290_v39  ;;  %v297_v5 = vmul.f32 %v2208_v14, %v290_v39  ;;  %v298_v6 = vmul.f32 %v2209_v28, %v290_v39  ;;  %v299_v7 = vmul.f32 %v1168_v27, %v290_v39 }
  0x41   :  { %v300_v26 = vadd.f32 %v291_v18, %v280_v41  ;;  %v301_v8 = vadd.f32 %v292_v0, %v281_v45  ;;  %v302_v36 = vadd.f32 %v293_v1, %v282_v52  ;;  %v303_v10 = vadd.f32 %v294_v2, %v283_v60  ;;  %v897_v1 = vld [vmem:[%s2123_s2 + $0xd0] sm:$0xff] }
  0x42   :  { %v304_v16 = vadd.f32 %v295_v3, %v284_v56  ;;  %v305_v11 = vadd.f32 %v296_v4, %v285_v12  ;;  %v306_v58 = vadd.f32 %v297_v5, %v286_v13  ;;  %v307_v19 = vadd.f32 %v298_v6, %v287_v57  ;;  %v893_v56 = vld [vmem:[%s2123_s2 + $0xb0] sm:$0xff]  ;;  %v895_v13 = vld [vmem:[%s2123_s2 + $0xc0] sm:$0xff] }
  0x43   :  { %v308_v15 = vadd.f32 %v299_v7, %v288_v17  ;;  %v311_v20 = vmul.f32 %v1182_v37, %v310_v40  ;;  %v312_v29 = vmul.f32 %v1187_v38, %v310_v40  ;;  %v313_v46 = vmul.f32 %v1193_v42, %v310_v40  ;;  %v889_v37 = vld [vmem:[%s2123_s2 + $0x90] sm:$0xff]  ;;  %v890_v38 = vld [vmem:[%s2123_s2 + $0x98] sm:$0xff]  ;;  %v891_v42 = vld [vmem:[%s2123_s2 + $0xa0] sm:$0xff] }
  0x44   :  { %v314_v14 = vmul.f32 %v1198_v43, %v310_v40  ;;  %v315_v28 = vmul.f32 %v1203_v44, %v310_v40  ;;  %v316_v27 = vmul.f32 %v1208_v49, %v310_v40  ;;  %v317_v39 = vmul.f32 %v1213_v50, %v310_v40 }
  0x45   :  { %v318_v41 = vmul.f32 %v1218_v51, %v310_v40  ;;  %v319_v45 = vmul.f32 %v1223_v55, %v310_v40  ;;  %v320_v43 = vadd.f32 %v311_v20, %v300_v26  ;;  %v321_v44 = vadd.f32 %v312_v29, %v301_v8  ;;  %v892_v51 = vld [vmem:[%s2123_s2 + $0xa8] sm:$0xff]  ;;  %v894_v26 = vld [vmem:[%s2123_s2 + $0xb8] sm:$0xff] }
  0x46   :  { %v322_v49 = vadd.f32 %v313_v46, %v302_v36  ;;  %v323_v50 = vadd.f32 %v314_v14, %v303_v10  ;;  %v324_v55 = vadd.f32 %v315_v28, %v304_v16  ;;  %v325_v40 = vadd.f32 %v316_v27, %v305_v11  ;;  %v2212_v20 = vld [vmem:[#allocation30_spill] sm:$0xff]  ;;  %v1581_v14 = vld [vmem:[%s2122_s1 + $0xf8] sm:$0xff] }
  0x47   :  { %v326_v52 = vadd.f32 %v317_v39, %v306_v58  ;;  %v327_v60 = vadd.f32 %v318_v41, %v307_v19  ;;  %v328_v12 = vadd.f32 %v319_v45, %v308_v15  ;;  %v896_v58 = vld [vmem:[%s2123_s2 + $0xc8] sm:$0xff]  ;;  %v339_v16 = vsub.f32 %v320_v43, %v889_v37  ;;  %v1576_v46 = vld [vmem:[%s2122_s1 + $0xf0] sm:$0xff] }
  0x48   :  { %v340_v57 = vsub.f32 %v321_v44, %v890_v38  ;;  %v341_v17 = vsub.f32 %v322_v49, %v891_v42  ;;  %v264_v15 = vmul.f32 %v1432_v59, %v1375_v47  ;;  %v265_v18 = vmul.f32 %v1434_v21, %v1380_v48  ;;  %v1599_v45 = vld [vmem:[%s2122_s1 + $0x108] sm:$0xff]  ;;  %v1604_v37 = vld [vmem:[%s2122_s1 + $0x110] sm:$0xff]  ;;  %v1609_v38 = vld [vmem:[%s2122_s1 + $0x118] sm:$0xff] }
  0x49   :  { %v266_v0 = vmul.f32 %v1436_v22, %v1397_v9  ;;  %v342_v2 = vsub.f32 %v323_v50, %v892_v51  ;;  %v267_v3 = vmul.f32 %v1438_v31, %v1402_v53  ;;  %v268_v4 = vmul.f32 %v1440_v32, %v1407_v54  ;;  %2213 = vst [vmem:[#allocation13_spill] sm:$0xff] %v1604_v37  ;;  %v2215_v43 = vld [vmem:[#allocation19_spill] sm:$0xff]  ;;  %v2216_v49 = vld [vmem:[#allocation20_spill] sm:$0xff]  ;;  %v2217_v51 = vld [vmem:[#allocation21_spill] sm:$0xff] }
  0x4a   :  { %v1529_v59 = vadd.f32 %v1443_v23, %v1388_v61  ;;  %v1533_v21 = vadd.f32 %v1446_v33, %v1392_v63  ;;  %v343_v22 = vsub.f32 %v324_v55, %v893_v56  ;;  %v344_v5 = vsub.f32 %v325_v40, %v894_v26  ;;  %v1549_v23 = vld [vmem:[%s2122_s1 + $0xd8] sm:$0xff]  ;;  %v1554_v33 = vld [vmem:[%s2122_s1 + $0xe0] sm:$0xff]  ;;  %2214 = vst [vmem:[#allocation14_spill] sm:$0xff] %v1609_v38  ;;  %v2221_v56 = vld [vmem:[#allocation22_spill] sm:$0xff] }
  0x4b   :  { %v345_v6 = vsub.f32 %v326_v52, %v895_v13  ;;  %v346_v7 = vsub.f32 %v327_v60, %v896_v58  ;;  %v347_v8 = vsub.f32 %v328_v12, %v897_v1  ;;  %v348_v36 = vmul.f32 %v339_v16, %v339_v16  ;;  %v1625_v40 = vld [vmem:[%s2122_s1 + $0x120] sm:$0xff]  ;;  %v1630_v52 = vld [vmem:[%s2122_s1 + $0x128] sm:$0xff]  ;;  %v1635_v60 = vld [vmem:[%s2122_s1 + $0x130] sm:$0xff] }
  0x4c   :  { %v349_v10 = vmul.f32 %v340_v57, %v340_v57  ;;  %v350_v11 = vmul.f32 %v341_v17, %v341_v17  ;;  %v1537_v31 = vadd.f32 %v1449_v34, %v1411_v24  ;;  %v1541_v61 = vadd.f32 %v1452_v35, %v1415_v25  ;;  %v1559_v24 = vld [vmem:[%s2122_s1 + $0xe8] sm:$0xff]  ;;  %2218 = vst [vmem:[#allocation15_spill] sm:$0xff] %v1625_v40  ;;  %v1644_v13 = vld [vmem:[%s2122_s1 + $0x138] sm:$0xff] }
  0x4d   :  { %v1544_v32 = vadd.f32 %v264_v15, %v1418_v62  ;;  %v351_v63 = vmul.f32 %v342_v2, %v342_v2  ;;  %v1562_v25 = vadd.f32 %v265_v18, %v1421_v30  ;;  %v2210_v62 = vld [vmem:[#allocation28_spill] sm:$0xff]  ;;  %v2211_v35 = vld [vmem:[#allocation29_spill] sm:$0xff]  ;;  %v1571_v29 = vadd.f32 %v268_v4, %v2212_v20  ;;  %2219 = vst [vmem:[#allocation16_spill] sm:$0xff] %v1630_v52  ;;  %v1665_v2 = vld [vmem:[%s2122_s1 + $0x150] sm:$0xff] }
  0x4e   :  { %v1565_v34 = vadd.f32 %v266_v0, %v2210_v62  ;;  %v1568_v19 = vadd.f32 %v267_v3, %v2211_v35  ;;  %v1586_v30 = vld [vmem:[%s2122_s1 + $0x100] sm:$0xff]  ;;  %v1588_v28 = vmul.f32 %v343_v22, %v343_v22  ;;  %v1590_v27 = vmul.f32 %v344_v5, %v344_v5  ;;  %2220 = vst [vmem:[#allocation17_spill] sm:$0xff] %v1635_v60  ;;  %v1660_v1 = vld [vmem:[%s2122_s1 + $0x148] sm:$0xff] }
  0x4f   :  { %v1592_v39 = vmul.f32 %v345_v6, %v345_v6  ;;  %v1594_v41 = vmul.f32 %v346_v7, %v346_v7  ;;  %v1611_v42 = vmul.f32 %v347_v8, %v347_v8  ;;  %v1614_v44 = vmul.f32 %v348_v36, %v2215_v43  ;;  %2222 = vst [vmem:[#allocation18_spill] sm:$0xff] %v1644_v13  ;;  %v1655_v0 = vld [vmem:[%s2122_s1 + $0x140] sm:$0xff]  ;;  %v1674_v6 = vld [vmem:[%s2122_s1 + $0x158] sm:$0xff] }
  0x50   :  { %v1617_v50 = vmul.f32 %v349_v10, %v2216_v49  ;;  %v1620_v55 = vmul.f32 %v350_v11, %v2217_v51  ;;  %v1638_v12 = vmul.f32 %v351_v63, %v2221_v56  ;;  %v405_v26 = vstv %s1499_s20  ;;  %2223 = vst [vmem:[#allocation28_spill] sm:$0xff] %v1655_v0  ;;  %2224 = vst [vmem:[#allocation29_spill] sm:$0xff] %v1660_v1  ;;  %v1679_v7 = vld [vmem:[%s2122_s1 + $0x160] sm:$0xff]  ;;  %v1692_v56 = vld [vmem:[%s2122_s1 + $0x168] sm:$0xff] }
  0x51   :  { %v426_v58 = vstv %s1510_s28  ;;  %v456_v16 = vstv %s1521_s30  ;;  %v406_v57 = vmul.f32 %v1549_v23, %v405_v26  ;;  %v407_v17 = vmul.f32 %v1554_v33, %v405_v26  ;;  %2225 = vst [vmem:[#allocation30_spill] sm:$0xff] %v1665_v2  ;;  %2226 = vst [vmem:[#allocation31_spill] sm:$0xff] %v1674_v6  ;;  %v1702_v51 = vld [vmem:[%s2122_s1 + $0x178] sm:$0xff]  ;;  %s1945_s28 = sld [smem:[#allocation4 + $0x85]] }
  0x52   :  { %v408_v15 = vmul.f32 %v1559_v24, %v405_v26  ;;  %v409_v18 = vmul.f32 %v1576_v46, %v405_v26  ;;  %v410_v3 = vmul.f32 %v1581_v14, %v405_v26  ;;  %v411_v4 = vmul.f32 %v1586_v30, %v405_v26  ;;  %2227 = vst [vmem:[#allocation32_spill] sm:$0xff] %v1679_v7  ;;  %s1951_s30 = sld [smem:[#allocation4 + $0x88]] }
  0x53   :  { %v412_v22 = vmul.f32 %v1599_v45, %v405_v26  ;;  %v413_v5 = vmul.f32 %v1604_v37, %v405_v26  ;;  %v414_v8 = vmul.f32 %v1609_v38, %v405_v26  ;;  %v427_v36 = vmul.f32 %v1625_v40, %v426_v58  ;;  %2228 = vst [vmem:[#allocation33_spill] sm:$0xff] %v1692_v56  ;;  %v1697_v26 = vld [vmem:[%s2122_s1 + $0x170] sm:$0xff] }
  0x54   :  { %v428_v10 = vmul.f32 %v1630_v52, %v426_v58  ;;  %v429_v11 = vmul.f32 %v1635_v60, %v426_v58  ;;  %v430_v63 = vmul.f32 %v1644_v13, %v426_v58  ;;  %v431_v62 = vmul.f32 %v1655_v0, %v426_v58  ;;  %2229 = vst [vmem:[#allocation34_spill] sm:$0xff] %v1697_v26  ;;  %v1709_v0 = vld [vmem:[%s2122_s1 + $0x180] sm:$0xff]  ;;  %v1714_v13 = vld [vmem:[%s2122_s1 + $0x188] sm:$0xff]  ;;  %v1719_v60 = vld [vmem:[%s2122_s1 + $0x190] sm:$0xff] }
  0x55   :  { %v432_v35 = vmul.f32 %v1660_v1, %v426_v58  ;;  %v433_v20 = vmul.f32 %v1665_v2, %v426_v58  ;;  %2230 = vst [vmem:[#allocation35_spill] sm:$0xff] %v1702_v51  ;;  %v434_v49 = vmul.f32 %v1674_v6, %v426_v58  ;;  %v435_v43 = vmul.f32 %v1679_v7, %v426_v58 }
  0x56   :  { %v436_v2 = vadd.f32 %v427_v36, %v406_v57  ;;  %v437_v1 = vadd.f32 %v428_v10, %v407_v17  ;;  %2231 = vst [vmem:[#allocation36_spill] sm:$0xff] %v1709_v0  ;;  %2232 = vst [vmem:[#allocation37_spill] sm:$0xff] %v1714_v13  ;;  %v438_v6 = vadd.f32 %v429_v11, %v408_v15  ;;  %v1724_v17 = vld [vmem:[%s2122_s1 + $0x198] sm:$0xff]  ;;  %v1729_v36 = vld [vmem:[%s2122_s1 + $0x1a0] sm:$0xff] }
  0x57   :  { %2233 = vst [vmem:[#allocation38_spill] sm:$0xff] %v1719_v60  ;;  %v439_v52 = vadd.f32 %v430_v63, %v409_v18  ;;  %v440_v58 = vadd.f32 %v431_v62, %v410_v3  ;;  %v441_v57 = vadd.f32 %v432_v35, %v411_v4  ;;  %2234 = vst [vmem:[#allocation39_spill] sm:$0xff] %v1724_v17  ;;  %v1734_v10 = vld [vmem:[%s2122_s1 + $0x1a8] sm:$0xff] }
  0x58   :  { %2235 = vst [vmem:[#allocation40_spill] sm:$0xff] %v1729_v36  ;;  %2236 = vst [vmem:[#allocation41_spill] sm:$0xff] %v1734_v10  ;;  %v442_v7 = vadd.f32 %v433_v20, %v412_v22  ;;  %v443_v15 = vadd.f32 %v434_v49, %v413_v5  ;;  %v444_v18 = vadd.f32 %v435_v43, %v414_v8  ;;  %v937_v43 = vld [vmem:[%s2123_s2 + $0xd8] sm:$0xff]  ;;  %v938_v49 = vld [vmem:[%s2123_s2 + $0xe0] sm:$0xff] }
  0x59   :  { %v457_v3 = vmul.f32 %v1692_v56, %v456_v16  ;;  %v458_v4 = vmul.f32 %v1697_v26, %v456_v16  ;;  %v459_v11 = vmul.f32 %v1702_v51, %v456_v16  ;;  %v460_v63 = vmul.f32 %v1709_v0, %v456_v16  ;;  %v939_v5 = vld [vmem:[%s2123_s2 + $0xe8] sm:$0xff]  ;;  %v941_v51 = vld [vmem:[%s2123_s2 + $0xf8] sm:$0xff] }
  0x5a   :  { %v461_v62 = vmul.f32 %v1714_v13, %v456_v16  ;;  %v462_v35 = vmul.f32 %v1719_v60, %v456_v16  ;;  %v463_v40 = vmul.f32 %v1724_v17, %v456_v16  ;;  %v464_v38 = vmul.f32 %v1729_v36, %v456_v16 }
  0x5b   :  { %v465_v22 = vmul.f32 %v1734_v10, %v456_v16  ;;  %v466_v8 = vadd.f32 %v457_v3, %v436_v2  ;;  %v467_v20 = vadd.f32 %v458_v4, %v437_v1  ;;  %v468_v60 = vadd.f32 %v459_v11, %v438_v6  ;;  %v940_v16 = vld [vmem:[%s2123_s2 + $0xf0] sm:$0xff]  ;;  %v942_v1 = vld [vmem:[%s2123_s2 + $0x100] sm:$0xff] }
  0x5c   :  { %v469_v17 = vadd.f32 %v460_v63, %v439_v52  ;;  %v470_v10 = vadd.f32 %v461_v62, %v440_v58  ;;  %v471_v36 = vadd.f32 %v462_v35, %v441_v57  ;;  %v472_v13 = vadd.f32 %v463_v40, %v442_v7  ;;  %v943_v52 = vld [vmem:[%s2123_s2 + $0x108] sm:$0xff]  ;;  %v944_v40 = vld [vmem:[%s2123_s2 + $0x110] sm:$0xff] }
  0x5d   :  { %v473_v0 = vadd.f32 %v464_v38, %v443_v15  ;;  %v474_v26 = vadd.f32 %v465_v22, %v444_v18  ;;  %v485_v38 = vsub.f32 %v466_v8, %v937_v43  ;;  %v486_v2 = vsub.f32 %v467_v20, %v938_v49  ;;  %v945_v15 = vld [vmem:[%s2123_s2 + $0x118] sm:$0xff] }
  0x5e   :  { %v487_v6 = vsub.f32 %v468_v60, %v939_v5  ;;  %v361_v7 = vmul.f32 %v1588_v28, %v1375_v47  ;;  %v362_v58 = vmul.f32 %v1590_v27, %v1380_v48  ;;  %v363_v57 = vmul.f32 %v1592_v39, %v1397_v9 }
  0x5f   :  { %v488_v18 = vsub.f32 %v469_v17, %v940_v16  ;;  %v364_v60 = vmul.f32 %v1594_v41, %v1402_v53  ;;  %v365_v3 = vmul.f32 %v1611_v42, %v1407_v54  ;;  %v1790_v28 = vadd.f32 %v1614_v44, %v1529_v59  ;;  %v1815_v44 = vld [vmem:[%s2124_s3 + $0x50] sm:$0xff]  ;;  %v2247_v53 = vld [vmem:[#allocation32_spill] sm:$0xff] }
  0x60   :  { %v1794_v27 = vadd.f32 %v1617_v50, %v1533_v21  ;;  %v489_v39 = vsub.f32 %v470_v10, %v941_v51  ;;  %v490_v4 = vsub.f32 %v471_v36, %v942_v1  ;;  %v491_v11 = vsub.f32 %v472_v13, %v943_v52  ;;  %v1810_v21 = vld [vmem:[%s2124_s3 + $0x48] sm:$0xff] }
  0x61   :  { %v492_v17 = vsub.f32 %v473_v0, %v944_v40  ;;  %v493_v63 = vsub.f32 %v474_v26, %v945_v15  ;;  %v494_v62 = vmul.f32 %v485_v38, %v485_v38  ;;  %v495_v35 = vmul.f32 %v486_v2, %v486_v2  ;;  %v2240_v15 = vld [vmem:[#allocation16_spill] sm:$0xff] }
  0x62   :  { %v496_v22 = vmul.f32 %v487_v6, %v487_v6  ;;  %v1798_v41 = vadd.f32 %v1620_v55, %v1537_v31  ;;  %v1802_v59 = vadd.f32 %v1638_v12, %v1541_v61  ;;  %v1805_v42 = vadd.f32 %v361_v7, %v1544_v32  ;;  %v1820_v31 = vld [vmem:[%s2124_s3 + $0x58] sm:$0xff]  ;;  %v1837_v12 = vld [vmem:[%s2124_s3 + $0x60] sm:$0xff]  ;;  %v2238_v6 = vld [vmem:[#allocation14_spill] sm:$0xff] }
  0x63   :  { %v497_v61 = vmul.f32 %v488_v18, %v488_v18  ;;  %v1823_v32 = vadd.f32 %v362_v58, %v1562_v25  ;;  %v1826_v50 = vadd.f32 %v363_v57, %v1565_v34  ;;  %v1829_v51 = vadd.f32 %v364_v60, %v1568_v19  ;;  %v2239_v58 = vld [vmem:[#allocation15_spill] sm:$0xff]  ;;  %v2241_v60 = vld [vmem:[#allocation17_spill] sm:$0xff] }
  0x64   :  { %v1832_v55 = vadd.f32 %v365_v3, %v1571_v29  ;;  %v1839_v13 = vmul.f32 %v489_v39, %v489_v39  ;;  %v1841_v0 = vmul.f32 %v490_v4, %v490_v4  ;;  %v1843_v25 = vmul.f32 %v491_v11, %v491_v11  ;;  %v2242_v39 = vld [vmem:[#allocation18_spill] sm:$0xff]  ;;  %v2243_v11 = vld [vmem:[#allocation28_spill] sm:$0xff] }
  0x65   :  { %v1845_v26 = vmul.f32 %v492_v17, %v492_v17  ;;  %v1847_v34 = vmul.f32 %v493_v63, %v493_v63  ;;  %v1850_v19 = vmul.f32 %v1810_v21, %v494_v62  ;;  %v1853_v29 = vmul.f32 %v1815_v44, %v495_v35  ;;  %v2244_v63 = vld [vmem:[#allocation29_spill] sm:$0xff]  ;;  %v2245_v35 = vld [vmem:[#allocation30_spill] sm:$0xff] }
  0x66   :  { %2237 = vst [vmem:[#allocation42_spill] sm:$0xff] %v1832_v55  ;;  %v1856_v36 = vmul.f32 %v1820_v31, %v496_v22  ;;  %v1859_v10 = vmul.f32 %v1837_v12, %v497_v61  ;;  %v522_v43 = vstv %s1760_s16  ;;  %v533_v49 = vstv %s1771_s26  ;;  %v2246_v61 = vld [vmem:[#allocation31_spill] sm:$0xff] }
  0x67   :  { %v553_v5 = vstv %s1782_s29  ;;  %v523_v8 = vmul.f32 %v1549_v23, %v522_v43  ;;  %v524_v20 = vmul.f32 %v1554_v33, %v522_v43  ;;  %v525_v16 = vmul.f32 %v1559_v24, %v522_v43 }
  0x68   :  { %v526_v1 = vmul.f32 %v1576_v46, %v522_v43  ;;  %v527_v52 = vmul.f32 %v1581_v14, %v522_v43  ;;  %v528_v40 = vmul.f32 %v1586_v30, %v522_v43  ;;  %v529_v38 = vmul.f32 %v1599_v45, %v522_v43 }
  0x69   :  { %v530_v2 = vmul.f32 %v1604_v37, %v522_v43  ;;  %v531_v7 = vmul.f32 %v2238_v6, %v522_v43  ;;  %v534_v57 = vmul.f32 %v2239_v58, %v533_v49  ;;  %v535_v18 = vmul.f32 %v2240_v15, %v533_v49 }
  0x6a   :  { %v536_v3 = vmul.f32 %v2241_v60, %v533_v49  ;;  %v537_v4 = vmul.f32 %v2242_v39, %v533_v49  ;;  %v538_v17 = vmul.f32 %v2243_v11, %v533_v49  ;;  %v539_v62 = vmul.f32 %v2244_v63, %v533_v49  ;;  %v1886_v63 = vld [vmem:[%s2124_s3 + $0x68] sm:$0xff] }
  0x6b   :  { %v540_v22 = vmul.f32 %v2245_v35, %v533_v49  ;;  %v541_v54 = vmul.f32 %v2246_v61, %v533_v49  ;;  %v542_v9 = vmul.f32 %v2247_v53, %v533_v49  ;;  %v543_v48 = vadd.f32 %v534_v57, %v523_v8  ;;  %v1891_v49 = vld [vmem:[%s2124_s3 + $0x70] sm:$0xff] }
  0x6c   :  { %v544_v43 = vadd.f32 %v535_v18, %v524_v20  ;;  %v545_v47 = vadd.f32 %v536_v3, %v525_v16  ;;  %v546_v55 = vadd.f32 %v537_v4, %v526_v1  ;;  %v547_v58 = vadd.f32 %v538_v17, %v527_v52  ;;  %v2248_v8 = vld [vmem:[#allocation34_spill] sm:$0xff]  ;;  %v2249_v16 = vld [vmem:[#allocation35_spill] sm:$0xff]  ;;  %v2250_v52 = vld [vmem:[#allocation36_spill] sm:$0xff] }
  0x6d   :  { %v548_v15 = vadd.f32 %v539_v62, %v528_v40  ;;  %v549_v6 = vadd.f32 %v540_v22, %v529_v38  ;;  %v550_v60 = vadd.f32 %v541_v54, %v530_v2  ;;  %v551_v37 = vadd.f32 %v542_v9, %v531_v7  ;;  %v2251_v54 = vld [vmem:[#allocation37_spill] sm:$0xff]  ;;  %v2252_v38 = vld [vmem:[#allocation38_spill] sm:$0xff]  ;;  %v2253_v7 = vld [vmem:[#allocation39_spill] sm:$0xff] }
  0x6e   :  { %v554_v39 = vmul.f32 %v1692_v56, %v553_v5  ;;  %v555_v20 = vmul.f32 %v2248_v8, %v553_v5  ;;  %v556_v1 = vmul.f32 %v2249_v16, %v553_v5  ;;  %v557_v40 = vmul.f32 %v2250_v52, %v553_v5  ;;  %v2254_v18 = vld [vmem:[#allocation40_spill] sm:$0xff]  ;;  %v2255_v4 = vld [vmem:[#allocation41_spill] sm:$0xff] }
  0x6f   :  { %v558_v9 = vmul.f32 %v2251_v54, %v553_v5  ;;  %v559_v2 = vmul.f32 %v2252_v38, %v553_v5  ;;  %v560_v57 = vmul.f32 %v2253_v7, %v553_v5  ;;  %v561_v3 = vmul.f32 %v2254_v18, %v553_v5  ;;  %v949_v62 = vld [vmem:[%s2123_s2 + $0x120] sm:$0xff]  ;;  %v950_v22 = vld [vmem:[%s2123_s2 + $0x128] sm:$0xff]  ;;  %v951_v54 = vld [vmem:[%s2123_s2 + $0x130] sm:$0xff] }
  0x70   :  { %v562_v17 = vmul.f32 %v2255_v4, %v553_v5  ;;  %v1913_v7 = vld [vmem:[%s2124_s3 + $0x78] sm:$0xff]  ;;  %v563_v18 = vadd.f32 %v554_v39, %v543_v48  ;;  %v564_v38 = vadd.f32 %v555_v20, %v544_v43  ;;  %v565_v5 = vadd.f32 %v556_v1, %v545_v47  ;;  %v953_v16 = vld [vmem:[%s2123_s2 + $0x140] sm:$0xff]  ;;  %v1929_v48 = vld [vmem:[%s2124_s3 + $0x88] sm:$0xff] }
  0x71   :  { %v566_v4 = vadd.f32 %v557_v40, %v546_v55  ;;  %v952_v52 = vld [vmem:[%s2123_s2 + $0x138] sm:$0xff]  ;;  %v1924_v8 = vld [vmem:[%s2124_s3 + $0x80] sm:$0xff]  ;;  %2256 = vst [vmem:[#allocation28_spill] sm:$0xff] %v1929_v48  ;;  %v567_v47 = vadd.f32 %v558_v9, %v547_v58  ;;  %v568_v55 = vadd.f32 %v559_v2, %v548_v15  ;;  %v569_v39 = vadd.f32 %v560_v57, %v549_v6  ;;  %v954_v20 = vld [vmem:[%s2123_s2 + $0x148] sm:$0xff] }
  0x72   :  { %v570_v43 = vadd.f32 %v561_v3, %v550_v60  ;;  %v571_v1 = vadd.f32 %v562_v17, %v551_v37  ;;  %v955_v40 = vld [vmem:[%s2123_s2 + $0x150] sm:$0xff]  ;;  %v956_v56 = vld [vmem:[%s2123_s2 + $0x158] sm:$0xff]  ;;  %v957_v6 = vld [vmem:[%s2123_s2 + $0x160] sm:$0xff]  ;;  %v582_v58 = vsub.f32 %v563_v18, %v949_v62  ;;  %v583_v15 = vsub.f32 %v564_v38, %v950_v22 }
  0x73   :  { %v584_v60 = vsub.f32 %v565_v5, %v951_v54  ;;  %v507_v37 = vmul.f32 %v1886_v63, %v1839_v13  ;;  %v508_v9 = vmul.f32 %v1891_v49, %v1841_v0  ;;  %v585_v2 = vsub.f32 %v566_v4, %v952_v52 }
  0x74   :  { %v586_v57 = vsub.f32 %v567_v47, %v953_v16  ;;  %v509_v3 = vmul.f32 %v1913_v7, %v1843_v25  ;;  %v510_v18 = vmul.f32 %v1924_v8, %v1845_v26  ;;  %v1959_v54 = vmul.f32 %v1929_v48, %v1847_v34 }
  0x75   :  { %v1963_v13 = vadd.f32 %v1850_v19, %v1790_v28  ;;  %v587_v38 = vsub.f32 %v568_v55, %v954_v20  ;;  %v588_v0 = vsub.f32 %v569_v39, %v955_v40  ;;  %v589_v52 = vsub.f32 %v570_v43, %v956_v56 }
  0x76   :  { %v590_v16 = vsub.f32 %v571_v1, %v957_v6  ;;  %v591_v4 = vmul.f32 %v582_v58, %v582_v58  ;;  %v592_v17 = vmul.f32 %v583_v15, %v583_v15  ;;  %v593_v62 = vmul.f32 %v584_v60, %v584_v60  ;;  %v2259_v60 = vld [vmem:[#allocation13_spill] sm:$0xff] }
  0x77   :  { %v594_v22 = vmul.f32 %v585_v2, %v585_v2  ;;  %v1967_v25 = vadd.f32 %v1853_v29, %v1794_v27  ;;  %v1971_v26 = vadd.f32 %v1856_v36, %v1798_v41  ;;  %v1975_v28 = vadd.f32 %v1859_v10, %v1802_v59 }
  0x78   :  { %v595_v56 = vmul.f32 %v586_v57, %v586_v57  ;;  %v1978_v34 = vadd.f32 %v507_v37, %v1805_v42  ;;  %v1981_v19 = vadd.f32 %v508_v9, %v1823_v32  ;;  %v1984_v27 = vadd.f32 %v509_v3, %v1826_v50  ;;  %v2260_v9 = vld [vmem:[#allocation14_spill] sm:$0xff]  ;;  %v2261_v57 = vld [vmem:[#allocation15_spill] sm:$0xff] }
  0x79   :  { %v1987_v41 = vadd.f32 %v510_v18, %v1829_v51  ;;  %v1989_v29 = vmul.f32 %v587_v38, %v587_v38  ;;  %v1991_v36 = vmul.f32 %v588_v0, %v588_v0  ;;  %v1993_v59 = vmul.f32 %v589_v52, %v589_v52  ;;  %v2262_v18 = vld [vmem:[#allocation16_spill] sm:$0xff]  ;;  %v2263_v38 = vld [vmem:[#allocation17_spill] sm:$0xff]  ;;  %v2264_v0 = vld [vmem:[#allocation18_spill] sm:$0xff] }
  0x7a   :  { %2257 = vst [vmem:[#allocation30_spill] sm:$0xff] %v1984_v27  ;;  %v1995_v10 = vmul.f32 %v590_v16, %v590_v16  ;;  %v600_v42 = vmul.f32 %v1810_v21, %v591_v4  ;;  %v601_v5 = vmul.f32 %v1815_v44, %v592_v17  ;;  %v2000_v32 = vmul.f32 %v1820_v31, %v593_v62  ;;  %v2265_v52 = vld [vmem:[#allocation29_spill] sm:$0xff] }
  0x7b   :  { %2258 = vst [vmem:[#allocation31_spill] sm:$0xff] %v1987_v41  ;;  %v2003_v50 = vmul.f32 %v1837_v12, %v594_v22  ;;  %v2006_v51 = vmul.f32 %v1886_v63, %v595_v56  ;;  %v619_v47 = vstv %s1934_s8  ;;  %v630_v55 = vstv %s1945_s28  ;;  %s1033_s8 = smov [#allocation8]  }
  0x7c   :  { %v650_v39 = vstv %s1951_s30  ;;  %v620_v43 = vmul.f32 %v1549_v23, %v619_v47  ;;  %v621_v20 = vmul.f32 %v1554_v33, %v619_v47  ;;  %v622_v1 = vmul.f32 %v1559_v24, %v619_v47  ;;  %s841_s9 = sshll.u32 %s1033_s8, 4  ;;  %s842_s9 = int_to_ptr.vmem [resolvable:$true] %s841_s9 }
  0x7d   :  { %v623_v40 = vmul.f32 %v1576_v46, %v619_v47  ;;  %v624_v6 = vmul.f32 %v1581_v14, %v619_v47  ;;  %v625_v58 = vmul.f32 %v1586_v30, %v619_v47  ;;  %v626_v15 = vmul.f32 %v1599_v45, %v619_v47 }
  0x7e   :  { %v627_v37 = vmul.f32 %v2259_v60, %v619_v47  ;;  %v628_v2 = vmul.f32 %v2260_v9, %v619_v47  ;;  %v631_v3 = vmul.f32 %v2261_v57, %v630_v55  ;;  %v632_v23 = vmul.f32 %v2262_v18, %v630_v55  ;;  %v2266_v18 = vld [vmem:[#allocation33_spill] sm:$0xff] }
  0x7f   :  { %v633_v33 = vmul.f32 %v2263_v38, %v630_v55  ;;  %v634_v24 = vmul.f32 %v2264_v0, %v630_v55  ;;  %v635_v46 = vmul.f32 %v2243_v11, %v630_v55  ;;  %v636_v14 = vmul.f32 %v2265_v52, %v630_v55  ;;  %v2267_v11 = vld [vmem:[#allocation34_spill] sm:$0xff]  ;;  %v2268_v52 = vld [vmem:[#allocation35_spill] sm:$0xff] }
  0x80   :  { %v637_v30 = vmul.f32 %v2245_v35, %v630_v55  ;;  %v638_v45 = vmul.f32 %v2246_v61, %v630_v55  ;;  %v639_v16 = vmul.f32 %v2247_v53, %v630_v55  ;;  %v640_v4 = vadd.f32 %v631_v3, %v620_v43  ;;  %v2269_v35 = vld [vmem:[#allocation36_spill] sm:$0xff]  ;;  %v2270_v61 = vld [vmem:[#allocation37_spill] sm:$0xff]  ;;  %v2271_v53 = vld [vmem:[#allocation38_spill] sm:$0xff] }
  0x81   :  { %v641_v17 = vadd.f32 %v632_v23, %v621_v20  ;;  %v642_v62 = vadd.f32 %v633_v33, %v622_v1  ;;  %v643_v22 = vadd.f32 %v634_v24, %v623_v40  ;;  %v644_v56 = vadd.f32 %v635_v46, %v624_v6  ;;  %v2272_v43 = vld [vmem:[#allocation39_spill] sm:$0xff]  ;;  %v2273_v1 = vld [vmem:[#allocation40_spill] sm:$0xff]  ;;  %v2274_v6 = vld [vmem:[#allocation41_spill] sm:$0xff] }
  0x82   :  { %v645_v47 = vadd.f32 %v636_v14, %v625_v58  ;;  %v646_v60 = vadd.f32 %v637_v30, %v626_v15  ;;  %v647_v9 = vadd.f32 %v638_v45, %v627_v37  ;;  %v648_v57 = vadd.f32 %v639_v16, %v628_v2  ;;  %v961_v15 = vld [vmem:[%s2123_s2 + $0x168] sm:$0xff]  ;;  %v962_v37 = vld [vmem:[%s2123_s2 + $0x170] sm:$0xff]  ;;  %v963_v2 = vld [vmem:[%s2123_s2 + $0x178] sm:$0xff] }
  0x83   :  { %v651_v38 = vmul.f32 %v2266_v18, %v650_v39  ;;  %v652_v0 = vmul.f32 %v2267_v11, %v650_v39  ;;  %v653_v41 = vmul.f32 %v2268_v52, %v650_v39  ;;  %v654_v27 = vmul.f32 %v2269_v35, %v650_v39  ;;  %v965_v46 = vld [vmem:[%s2123_s2 + $0x188] sm:$0xff]  ;;  %v966_v14 = vld [vmem:[%s2123_s2 + $0x190] sm:$0xff] }
  0x84   :  { %v655_v48 = vmul.f32 %v2270_v61, %v650_v39  ;;  %v656_v55 = vmul.f32 %v2271_v53, %v650_v39  ;;  %v657_v20 = vmul.f32 %v2272_v43, %v650_v39  ;;  %v658_v40 = vmul.f32 %v2273_v1, %v650_v39 }
  0x85   :  { %v659_v58 = vmul.f32 %v2274_v6, %v650_v39  ;;  %v660_v3 = vadd.f32 %v651_v38, %v640_v4  ;;  %v661_v23 = vadd.f32 %v652_v0, %v641_v17  ;;  %v662_v33 = vadd.f32 %v653_v41, %v642_v62  ;;  %v964_v39 = vld [vmem:[%s2123_s2 + $0x180] sm:$0xff] }
  0x86   :  { %v663_v24 = vadd.f32 %v654_v27, %v643_v22  ;;  %v609_v30 = vadd.f32 %v600_v42, %v1963_v13  ;;  %v664_v45 = vadd.f32 %v655_v48, %v644_v56  ;;  %v665_v16 = vadd.f32 %v656_v55, %v645_v47  ;;  %v967_v27 = vld [vmem:[%s2123_s2 + $0x198] sm:$0xff]  ;;  %v968_v38 = vld [vmem:[%s2123_s2 + $0x1a0] sm:$0xff] }
  0x87   :  { %v666_v4 = vadd.f32 %v657_v20, %v646_v60  ;;  %v667_v41 = vadd.f32 %v658_v40, %v647_v9  ;;  %v679_v17 = vsub.f32 %v660_v3, %v961_v15  ;;  %v680_v62 = vsub.f32 %v661_v23, %v962_v37  ;;  %v969_v9 = vld [vmem:[%s2123_s2 + $0x1a8] sm:$0xff]  ;;  %s1032_s2 = smov [#allocation7]  }
  0x88   :  { %v681_v22 = vsub.f32 %v662_v33, %v963_v2  ;;  %v610_v18 = vadd.f32 %v601_v5, %v1967_v25  ;;  %v682_v11 = vsub.f32 %v663_v24, %v964_v39  ;;  %v683_v0 = vsub.f32 %v664_v45, %v965_v46  ;;  %v2275_v33 = vld [vmem:[#allocation19_spill] sm:$0xff]  ;;  %v2277_v39 = vld [vmem:[#allocation42_spill] sm:$0xff]  ;;  %s831_s7 = sshll.u32 %s1032_s2, 4  ;;  %s832_s7 = int_to_ptr.vmem [resolvable:$true] %s831_s7 }
  0x89   :  { %v684_v13 = vsub.f32 %v665_v16, %v966_v14  ;;  %v668_v48 = vadd.f32 %v659_v58, %v648_v57  ;;  %v685_v42 = vsub.f32 %v666_v4, %v967_v27  ;;  %v688_v56 = vmul.f32 %v679_v17, %v679_v17  ;;  %v2278_v14 = vld [vmem:[#allocation28_spill] sm:$0xff]  ;;  %s985_s10 = scalar_lea.vmem %s832_s7, 16  ;;  %s989_s1 = scalar_lea.vmem %s832_s7, 32 }
  0x8a   :  { %v689_v47 = vmul.f32 %v680_v62, %v680_v62  ;;  %v611_v60 = vadd.f32 %v2000_v32, %v1971_v26  ;;  %v690_v52 = vmul.f32 %v681_v22, %v681_v22  ;;  %v691_v25 = vmul.f32 %v682_v11, %v682_v11  ;;  %v2282_v22 = vld [vmem:[#allocation31_spill] sm:$0xff]  ;;  %p986_p5 = scmp.ne.s32.totalorder %s832_s7, %s985_s10  ;;  %p990_p6 = scmp.lt.s32.totalorder %s832_s7, %s832_s7 }
  0x8b   :  { %v692_v5 = vmul.f32 %v683_v0, %v683_v0  ;;  %v605_v35 = vmul.f32 %v1891_v49, %v1989_v29  ;;  %v686_v61 = vsub.f32 %v667_v41, %v968_v38  ;;  %v693_v53 = vmul.f32 %v684_v13, %v684_v13  ;;  %v2283_v11 = vld [vmem:[#allocation23_spill] sm:$0xff]  ;;  %p991_p7 = scmp.lt.s32.totalorder %s989_s1, %s985_s10 }
  0x8c   :  { %v697_v57 = vmul.f32 %v1810_v21, %v688_v56  ;;  %v612_v55 = vadd.f32 %v2003_v50, %v1975_v28  ;;  %v698_v43 = vmul.f32 %v1815_v44, %v689_v47  ;;  %v699_v26 = vmul.f32 %v1820_v31, %v690_v52  ;;  %v2284_v47 = vld [vmem:[#allocation24_spill] sm:$0xff] }
  0x8d   :  { %v700_v32 = vmul.f32 %v1837_v12, %v691_v25  ;;  %v606_v20 = vmul.f32 %v1913_v7, %v1991_v36  ;;  %v613_v1 = vadd.f32 %v2006_v51, %v1978_v34  ;;  %v687_v29 = vsub.f32 %v668_v48, %v969_v9  ;;  %v2276_v51 = vld [vmem:[#allocation20_spill] sm:$0xff]  ;;  %v2285_v25 = vld [vmem:[#allocation25_spill] sm:$0xff]  ;;  %p992_p8 = por %p991_p7, %p990_p6 }
  0x8e   :  { %v694_v40 = vmul.f32 %v685_v42, %v685_v42  ;;  %v701_v6 = vmul.f32 %v1886_v63, %v692_v5  ;;  %v706_v58 = vadd.f32 %v697_v57, %v609_v30  ;;  %v707_v15 = vadd.f32 %v698_v43, %v610_v18  ;;  %v2286_v57 = vld [vmem:[#allocation26_spill] sm:$0xff] }
  0x8f   :  { %v708_v37 = vadd.f32 %v699_v26, %v611_v60  ;;  %v607_v28 = vmul.f32 %v1924_v8, %v1993_v59  ;;  %v614_v50 = vadd.f32 %v605_v35, %v1981_v19  ;;  %v695_v2 = vmul.f32 %v686_v61, %v686_v61  ;;  %v2279_v59 = vld [vmem:[#allocation30_spill] sm:$0xff]  ;;  %v2280_v19 = vld [vmem:[#allocation21_spill] sm:$0xff]  ;;  %v2287_v26 = vld [vmem:[#allocation27_spill] sm:$0xff]  ;;  %p993_p9 = pnand %p992_p8, %p986_p5 }
  0x90   :  { %v702_v3 = vmul.f32 %v1891_v49, %v693_v53  ;;  %v709_v23 = vadd.f32 %v700_v32, %v612_v55  ;;  %v781_v36 = vadd.f32 %v707_v15, %v706_v58  ;;  %v385_v34 = vadd.f32 %v1810_v21, %v2275_v33  ;;  %v2281_v21 = vld [vmem:[#allocation22_spill] sm:$0xff] }
  0x91   :  { %v386_v24 = vadd.f32 %v1815_v44, %v2276_v51  ;;  %v520_v46 = vadd.f32 %v1959_v54, %v2277_v39  ;;  %v608_v30 = vmul.f32 %v2278_v14, %v1995_v10  ;;  %v615_v45 = vadd.f32 %v606_v20, %v2279_v59 }
  0x92   :  { %v387_v16 = vadd.f32 %v1820_v31, %v2280_v19  ;;  %v696_v4 = vmul.f32 %v687_v29, %v687_v29  ;;  %v703_v27 = vmul.f32 %v1913_v7, %v694_v40  ;;  %v710_v41 = vadd.f32 %v701_v6, %v613_v1 }
  0x93   :  { %v782_v17 = vadd.f32 %v781_v36, %v708_v37  ;;  %v388_v62 = vadd.f32 %v1837_v12, %v2281_v21  ;;  %v808_v44 = vadd.f32 %v386_v24, %v385_v34  ;;  %v616_v18 = vadd.f32 %v607_v28, %v2282_v22 }
  0x94   :  { %v704_v54 = vmul.f32 %v1924_v8, %v695_v2  ;;  %v711_v38 = vadd.f32 %v702_v3, %v614_v50  ;;  %v389_v0 = vadd.f32 %v1886_v63, %v2283_v11  ;;  %v617_v31 = vadd.f32 %v608_v30, %v520_v46 }
  0x95   :  { %v783_v10 = vadd.f32 %v782_v17, %v709_v23  ;;  %v809_v13 = vadd.f32 %v808_v44, %v387_v16  ;;  %v705_v48 = vmul.f32 %v2278_v14, %v696_v4  ;;  %v712_v42 = vadd.f32 %v703_v27, %v615_v45 }
  0x96   :  { %v390_v60 = vadd.f32 %v1891_v49, %v2284_v47  ;;  %v713_v9 = vadd.f32 %v704_v54, %v616_v18  ;;  %v391_v5 = vadd.f32 %v1913_v7, %v2285_v25  ;;  %v392_v63 = vadd.f32 %v1924_v8, %v2286_v57 }
  0x97   :  { %v784_v56 = vadd.f32 %v783_v10, %v710_v41  ;;  %v810_v12 = vadd.f32 %v809_v13, %v388_v62  ;;  %v714_v61 = vadd.f32 %v705_v48, %v617_v31  ;;  %v393_v32 = vadd.f32 %v2278_v14, %v2287_v26 }
  0x99   :  { %v785_v52 = vadd.f32 %v784_v56, %v711_v38  ;;  %v811_v35 = vadd.f32 %v810_v12, %v389_v0 }
  0x9b   :  { %v786_v53 = vadd.f32 %v785_v52, %v712_v42  ;;  %v812_v55 = vadd.f32 %v811_v35, %v390_v60 }
  0x9d   :  { %v787_v43 = vadd.f32 %v786_v53, %v713_v9  ;;  %v813_v20 = vadd.f32 %v812_v55, %v391_v5 }
  0x9f   :  { %v788_v1 = vadd.f32 %v787_v43, %v714_v61  ;;  %v814_v49 = vadd.f32 %v813_v20, %v392_v63 }
  0xa1   :  { %789 = vadd.xlane.f32.xlu0 %v788_v1  ;;  %v815_v29 = vadd.f32 %v814_v49, %v393_v32 }
  0xa5   :  { %816 = vadd.xlane.f32.xlu0 %v815_v29 }
 0x12a   :  { %v790_v40 = vpop.xlane.xlu0 %789 }
 0x12b   :  { %v791_v6 = vrot.slane %v790_v40, 4 }
 0x12d   :  { %v792_v7 = vadd.f32 %v791_v6, %v790_v40 }
 0x12e   :  { %v817_v58 = vpop.xlane.xlu0 %816 }
 0x12f   :  { %v793_v15 = vrot.slane %v792_v7, 2  ;;  %v818_v37 = vrot.slane %v817_v58, 4 }
 0x131   :  { %v794_v28 = vadd.f32 %v793_v15, %v792_v7  ;;  %v819_v50 = vadd.f32 %v818_v37, %v817_v58 }
 0x133   :  { %v795_v8 = vrot.slane %v794_v28, 1  ;;  %v820_v2 = vrot.slane %v819_v50, 2 }
 0x135   :  { %v796_v3 = vadd.f32 %v795_v8, %v794_v28  ;;  %v821_v23 = vadd.f32 %v820_v2, %v819_v50 }
 0x137   :  { %798 = vst.msk [vmem:[#allocation7] sm:$0x1] %vm797_vm0, %v796_v3  ;;  %v822_v36 = vrot.slane %v821_v23, 1 }
 0x138   :  { %996 = shalt.err (!%p993_p9)
}
 0x139   :  { %834 = dma.vmem_to_hbm [thread:$0]  %s832_s7, 16, %s2125_s4, [#allocation5]   ;;  %v823_v33 = vadd.f32 %v822_v36, %v821_v23 }
 0x13a   :  { %s1005_s11 = scalar_lea.vmem %s842_s9, 16  ;;  %s1009_s28 = scalar_lea.vmem %s842_s9, 32 }
 0x13b   :  { %824 = vst.msk [vmem:[#allocation8] sm:$0x1] %vm797_vm0, %v823_v33  ;;  %p1006_p10 = scmp.ne.s32.totalorder %s842_s9, %s1005_s11  ;;  %p1010_p11 = scmp.lt.s32.totalorder %s842_s9, %s842_s9 }
 0x13c   :  { %p1011_p12 = scmp.lt.s32.totalorder %s1009_s28, %s1005_s11 }
 0x13e   :  { %p1012_p13 = por %p1011_p12, %p1010_p11 }
 0x140   :  { %p1013_p0 = pnand %p1012_p13, %p1006_p10 }
 0x142   :  { %1016 = shalt.err (!%p1013_p0)
}
 0x143   :  { %844 = dma.vmem_to_hbm [thread:$0]  %s842_s9, 16, %s2126_s5, [#allocation9]  }
 0x144   :  { %1027 = dma.done.wait [#allocation5], 16  }
 0x145   :  { %1028 = vsyncadd [#allocation5], 4294967280 }
 0x146   :  { %1029 = dma.done.wait [#allocation9], 16  }
 0x147   :  { %1030 = vsyncadd [#allocation9], 4294967280 }
 0x148   :  { %851 = vsyncpa [#allocation5], 1 }
 0x149   :  { %852 = vsyncpa [#allocation9], 1 }
 0x14a   :  { %853 = vsyncpa [#allocation6], 1 }

</bundles_post_ra>
